<compile_context>
chip_gen: v7x
topology: tpu7x:2x2x1
jax: 0.10.0
libtpu: 0.0.40
codegen_flags: <defaults>
</compile_context>

<pallas_src>
import jax
import jax.numpy as jnp
from jax.experimental import pallas as pl
from jax.experimental.pallas import tpu as pltpu

NUM_KNOWN_POINT = 16                    # numKnownPoint (undefined in reference)
LAYER_DIMS = [41, 64, 128, 256, 256, 64, NUM_KNOWN_POINT]

IN_PAD = 128        # input features zero-padded 41 -> 128 (lane-aligned loads)
OUT_PAD = 128       # output columns zero-padded 16 -> 128 (lane-dense stores)
BATCH_TILE = 256    # rows per grid step; sweep 256-1024 on real batch sizes


def _mlp_kernel(x_ref,
                w1, b1, w2, b2, w3, b3, w4, b4, w5, b5, w6, b6,
                o_ref):
    """Fused MLP forward for one batch tile (all refs in VMEM).

    x_ref : (BATCH_TILE, IN_PAD)  f32, zero-padded beyond column 41.
    wN    : bf16 weights [in, out] (W1 rows / W6 cols zero-padded).
    bN    : f32 biases (1, out).
    o_ref : (BATCH_TILE, OUT_PAD) f32; probs live in cols [0, NUM_KNOWN_POINT).
    """

    def linear(h_f32, w_ref, b_ref):
        # bf16 MXU operands, f32 accumulation; bias-add stays f32 on the VPU.
        return jnp.dot(h_f32.astype(jnp.bfloat16), w_ref[...],
                       preferred_element_type=jnp.float32) + b_ref[...]

    h = x_ref[...]
    h = jnp.maximum(linear(h, w1, b1), 0.0)    # (TB, 64)
    h = jnp.maximum(linear(h, w2, b2), 0.0)    # (TB, 128)
    h = jnp.maximum(linear(h, w3, b3), 0.0)    # (TB, 256)
    h = jnp.maximum(linear(h, w4, b4), 0.0)    # (TB, 256)
    h = jnp.maximum(linear(h, w5, b5), 0.0)    # (TB, 64)
    logits = linear(h, w6, b6)                 # (TB, OUT_PAD)

    # Softmax over the real 16 columns only; padded columns -> prob 0 via -inf
    # masking so the store stays a full 128-lane (unmasked) write.
    col = jax.lax.broadcasted_iota(jnp.int32, logits.shape, 1)
    logits = jnp.where(col < NUM_KNOWN_POINT, logits, -jnp.inf)
    m = jnp.max(logits, axis=-1, keepdims=True)
    e = jnp.exp(logits - m)
    denom = jnp.sum(e, axis=-1, keepdims=True)
    o_ref[...] = (e * pl.reciprocal(denom, approx=True)).astype(o_ref.dtype)


def pst_model_forward(x, params):
    """x: [B, 41] f32.  params: list of (W [in,out] f32, b [1,out] f32)."""
    B, fin = x.shape
    assert fin == LAYER_DIMS[0]

    num_tiles = pl.cdiv(B, BATCH_TILE)
    b_pad = num_tiles * BATCH_TILE

    # Zero-pad batch to a tile multiple and features to a full 128-lane width.
    x_p = jnp.zeros((b_pad, IN_PAD), jnp.float32).at[:B, :fin].set(x)

    flat_params = []
    for li, (w, b) in enumerate(params):
        w = w.astype(jnp.bfloat16)
        b = b.astype(jnp.float32)
        if li == 0:                                   # pad W1 rows 41 -> 128
            w = jnp.zeros((IN_PAD, w.shape[1]), jnp.bfloat16).at[:fin, :].set(w)
        if li == len(params) - 1:                     # pad W6/b6 cols 16 -> 128
            w = (jnp.zeros((w.shape[0], OUT_PAD), jnp.bfloat16)
                 .at[:, :NUM_KNOWN_POINT].set(w))
            b = (jnp.zeros((1, OUT_PAD), jnp.float32)
                 .at[:, :NUM_KNOWN_POINT].set(b))
        flat_params += [w, b]

    x_spec = pl.BlockSpec((BATCH_TILE, IN_PAD), lambda i: (i, 0))
    out_spec = pl.BlockSpec((BATCH_TILE, OUT_PAD), lambda i: (i, 0))
    # Weights/biases are tiny (<0.5 MiB in bf16): keep them fully resident in
    # VMEM with no per-step blocking/double-buffering.
    param_specs = [pl.BlockSpec(memory_space=pltpu.MemorySpace.VMEM)
                   for _ in flat_params]

    out_padded = pl.pallas_call(
        _mlp_kernel,
        out_shape=jax.ShapeDtypeStruct((b_pad, OUT_PAD), jnp.float32),
        grid=(num_tiles,),
        in_specs=[x_spec] + param_specs,
        out_specs=out_spec,
        compiler_params=pltpu.CompilerParams(
            dimension_semantics=("parallel",),       # megacore-shard batch axis
            vmem_limit_bytes=48 * 1024 * 1024,
        ),
    )(x_p, *flat_params)

    return out_padded[:B, :NUM_KNOWN_POINT]


def init_params(key):
    """Deterministic init mimicking PyTorch Linear default U(-1/sqrt(in), 1/sqrt(in))."""
    params = []
    for i in range(len(LAYER_DIMS) - 1):
        fan_in, fan_out = LAYER_DIMS[i], LAYER_DIMS[i + 1]
        key, kw, kb = jax.random.split(key, 3)
        bound = 1.0 / jnp.sqrt(jnp.float32(fan_in))
        w = jax.random.uniform(kw, (fan_in, fan_out), jnp.float32, -bound, bound)
        b = jax.random.uniform(kb, (1, fan_out), jnp.float32, -bound, bound)
        params.append((w, b))
    return params


def reference_forward(x, params):
    """Pure-JAX reference with the same bf16-operand / f32-accumulate numerics."""
    h = x
    for i, (w, b) in enumerate(params):
        h = jnp.dot(h.astype(jnp.bfloat16), w.astype(jnp.bfloat16),
                    preferred_element_type=jnp.float32) + b
        if i < len(params) - 1:
            h = jnp.maximum(h, 0.0)
    return jax.nn.softmax(h, axis=-1)


if __name__ == "__main__":
    key = jax.random.PRNGKey(0)
    key, kx = jax.random.split(key)

    # B=300 deliberately NOT a multiple of BATCH_TILE: exercises the cdiv grid
    # and zero-padded batch tail (grid = 2 steps).
    B = 300
    x = jax.random.normal(kx, (B, LAYER_DIMS[0]), jnp.float32)
    params = init_params(key)

    out = pst_model_forward(x, params)
    out = jax.block_until_ready(out)

    ref = reference_forward(x, params)
    assert out.shape == (B, NUM_KNOWN_POINT)
    assert jnp.allclose(out, ref, atol=2e-3, rtol=2e-2), "mismatch vs reference"
    assert jnp.allclose(jnp.sum(out, axis=-1), 1.0, atol=2e-3), \
        "softmax rows must sum to 1"

    print("KERNEL_OK")
</pallas_src>

<mosaic_0001>
module attributes {stable_mosaic.version = 11 : i64} {
  func.func @_mlp_kernel(%arg0: i32, %arg1: memref<256x128xf32, #tpu.memory_space<vmem>>, %arg2: memref<128x64xbf16, #tpu.memory_space<vmem>>, %arg3: memref<1x64xf32, #tpu.memory_space<vmem>>, %arg4: memref<64x128xbf16, #tpu.memory_space<vmem>>, %arg5: memref<1x128xf32, #tpu.memory_space<vmem>>, %arg6: memref<128x256xbf16, #tpu.memory_space<vmem>>, %arg7: memref<1x256xf32, #tpu.memory_space<vmem>>, %arg8: memref<256x256xbf16, #tpu.memory_space<vmem>>, %arg9: memref<1x256xf32, #tpu.memory_space<vmem>>, %arg10: memref<256x64xbf16, #tpu.memory_space<vmem>>, %arg11: memref<1x64xf32, #tpu.memory_space<vmem>>, %arg12: memref<64x128xbf16, #tpu.memory_space<vmem>>, %arg13: memref<1x128xf32, #tpu.memory_space<vmem>>, %arg14: memref<256x128xf32, #tpu.memory_space<vmem>>) attributes {dimension_semantics = [#tpu.dimension_semantics<parallel>], iteration_bounds = array<i64: 2>, scalar_prefetch = 0 : i64, scratch_operands = 0 : i64, tpu.core_type = #tpu.core_type<tc>, window_params = [{transform_indices = @transform_0, window_bounds = array<i64: 256, 128>}, {pipeline_mode = #tpu.pipeline_mode<synchronous>, transform_indices = @transform_1, window_bounds = array<i64: 128, 64>}, {pipeline_mode = #tpu.pipeline_mode<synchronous>, transform_indices = @transform_2, window_bounds = array<i64: 1, 64>}, {pipeline_mode = #tpu.pipeline_mode<synchronous>, transform_indices = @transform_3, window_bounds = array<i64: 64, 128>}, {pipeline_mode = #tpu.pipeline_mode<synchronous>, transform_indices = @transform_4, window_bounds = array<i64: 1, 128>}, {pipeline_mode = #tpu.pipeline_mode<synchronous>, transform_indices = @transform_5, window_bounds = array<i64: 128, 256>}, {pipeline_mode = #tpu.pipeline_mode<synchronous>, transform_indices = @transform_6, window_bounds = array<i64: 1, 256>}, {pipeline_mode = #tpu.pipeline_mode<synchronous>, transform_indices = @transform_7, window_bounds = array<i64: 256, 256>}, {pipeline_mode = #tpu.pipeline_mode<synchronous>, transform_indices = @transform_8, window_bounds = array<i64: 1, 256>}, {pipeline_mode = #tpu.pipeline_mode<synchronous>, transform_indices = @transform_9, window_bounds = array<i64: 256, 64>}, {pipeline_mode = #tpu.pipeline_mode<synchronous>, transform_indices = @transform_10, window_bounds = array<i64: 1, 64>}, {pipeline_mode = #tpu.pipeline_mode<synchronous>, transform_indices = @transform_11, window_bounds = array<i64: 64, 128>}, {pipeline_mode = #tpu.pipeline_mode<synchronous>, transform_indices = @transform_12, window_bounds = array<i64: 1, 128>}, {transform_indices = @transform_13, window_bounds = array<i64: 256, 128>}]} {
    %c0 = arith.constant 0 : index
    %c0_0 = arith.constant 0 : index
    %0 = vector.load %arg1[%c0, %c0_0] : memref<256x128xf32, #tpu.memory_space<vmem>>, vector<256x128xf32>
    %1 = arith.truncf %0 : vector<256x128xf32> to vector<256x128xbf16>
    %c0_1 = arith.constant 0 : index
    %c0_2 = arith.constant 0 : index
    %2 = vector.load %arg2[%c0_1, %c0_2] : memref<128x64xbf16, #tpu.memory_space<vmem>>, vector<128x64xbf16>
    %cst = arith.constant dense<0.000000e+00> : vector<256x64xf32>
    %3 = tpu.matmul %1, %2, %cst {dimension_numbers = #tpu.dot_dimension_numbers<[1], [0], [0], [1], [0, 0, 1, 1], [], []>} : vector<256x128xbf16>, vector<128x64xbf16>, vector<256x64xf32> -> vector<256x64xf32>
    %c0_3 = arith.constant 0 : index
    %c0_4 = arith.constant 0 : index
    %4 = vector.load %arg3[%c0_3, %c0_4] : memref<1x64xf32, #tpu.memory_space<vmem>>, vector<1x64xf32>
    %5 = vector.broadcast %4 : vector<1x64xf32> to vector<256x64xf32>
    %6 = arith.addf %3, %5 : vector<256x64xf32>
    %cst_5 = arith.constant 0.000000e+00 : f32
    %7 = vector.broadcast %cst_5 : f32 to vector<256x64xf32>
    %8 = arith.maximumf %6, %7 : vector<256x64xf32>
    %9 = arith.truncf %8 : vector<256x64xf32> to vector<256x64xbf16>
    %c0_6 = arith.constant 0 : index
    %c0_7 = arith.constant 0 : index
    %10 = vector.load %arg4[%c0_6, %c0_7] : memref<64x128xbf16, #tpu.memory_space<vmem>>, vector<64x128xbf16>
    %cst_8 = arith.constant dense<0.000000e+00> : vector<256x128xf32>
    %11 = tpu.matmul %9, %10, %cst_8 {dimension_numbers = #tpu.dot_dimension_numbers<[1], [0], [0], [1], [0, 0, 1, 1], [], []>} : vector<256x64xbf16>, vector<64x128xbf16>, vector<256x128xf32> -> vector<256x128xf32>
    %c0_9 = arith.constant 0 : index
    %c0_10 = arith.constant 0 : index
    %12 = vector.load %arg5[%c0_9, %c0_10] : memref<1x128xf32, #tpu.memory_space<vmem>>, vector<1x128xf32>
    %13 = vector.broadcast %12 : vector<1x128xf32> to vector<256x128xf32>
    %14 = arith.addf %11, %13 : vector<256x128xf32>
    %cst_11 = arith.constant 0.000000e+00 : f32
    %15 = vector.broadcast %cst_11 : f32 to vector<256x128xf32>
    %16 = arith.maximumf %14, %15 : vector<256x128xf32>
    %17 = arith.truncf %16 : vector<256x128xf32> to vector<256x128xbf16>
    %c0_12 = arith.constant 0 : index
    %c0_13 = arith.constant 0 : index
    %18 = vector.load %arg6[%c0_12, %c0_13] : memref<128x256xbf16, #tpu.memory_space<vmem>>, vector<128x256xbf16>
    %cst_14 = arith.constant dense<0.000000e+00> : vector<256x256xf32>
    %19 = tpu.matmul %17, %18, %cst_14 {dimension_numbers = #tpu.dot_dimension_numbers<[1], [0], [0], [1], [0, 0, 1, 1], [], []>} : vector<256x128xbf16>, vector<128x256xbf16>, vector<256x256xf32> -> vector<256x256xf32>
    %c0_15 = arith.constant 0 : index
    %c0_16 = arith.constant 0 : index
    %20 = vector.load %arg7[%c0_15, %c0_16] : memref<1x256xf32, #tpu.memory_space<vmem>>, vector<1x256xf32>
    %21 = vector.broadcast %20 : vector<1x256xf32> to vector<256x256xf32>
    %22 = arith.addf %19, %21 : vector<256x256xf32>
    %cst_17 = arith.constant 0.000000e+00 : f32
    %23 = vector.broadcast %cst_17 : f32 to vector<256x256xf32>
    %24 = arith.maximumf %22, %23 : vector<256x256xf32>
    %25 = arith.truncf %24 : vector<256x256xf32> to vector<256x256xbf16>
    %c0_18 = arith.constant 0 : index
    %c0_19 = arith.constant 0 : index
    %26 = vector.load %arg8[%c0_18, %c0_19] : memref<256x256xbf16, #tpu.memory_space<vmem>>, vector<256x256xbf16>
    %cst_20 = arith.constant dense<0.000000e+00> : vector<256x256xf32>
    %27 = tpu.matmul %25, %26, %cst_20 {dimension_numbers = #tpu.dot_dimension_numbers<[1], [0], [0], [1], [0, 0, 1, 1], [], []>} : vector<256x256xbf16>, vector<256x256xbf16>, vector<256x256xf32> -> vector<256x256xf32>
    %c0_21 = arith.constant 0 : index
    %c0_22 = arith.constant 0 : index
    %28 = vector.load %arg9[%c0_21, %c0_22] : memref<1x256xf32, #tpu.memory_space<vmem>>, vector<1x256xf32>
    %29 = vector.broadcast %28 : vector<1x256xf32> to vector<256x256xf32>
    %30 = arith.addf %27, %29 : vector<256x256xf32>
    %cst_23 = arith.constant 0.000000e+00 : f32
    %31 = vector.broadcast %cst_23 : f32 to vector<256x256xf32>
    %32 = arith.maximumf %30, %31 : vector<256x256xf32>
    %33 = arith.truncf %32 : vector<256x256xf32> to vector<256x256xbf16>
    %c0_24 = arith.constant 0 : index
    %c0_25 = arith.constant 0 : index
    %34 = vector.load %arg10[%c0_24, %c0_25] : memref<256x64xbf16, #tpu.memory_space<vmem>>, vector<256x64xbf16>
    %cst_26 = arith.constant dense<0.000000e+00> : vector<256x64xf32>
    %35 = tpu.matmul %33, %34, %cst_26 {dimension_numbers = #tpu.dot_dimension_numbers<[1], [0], [0], [1], [0, 0, 1, 1], [], []>} : vector<256x256xbf16>, vector<256x64xbf16>, vector<256x64xf32> -> vector<256x64xf32>
    %c0_27 = arith.constant 0 : index
    %c0_28 = arith.constant 0 : index
    %36 = vector.load %arg11[%c0_27, %c0_28] : memref<1x64xf32, #tpu.memory_space<vmem>>, vector<1x64xf32>
    %37 = vector.broadcast %36 : vector<1x64xf32> to vector<256x64xf32>
    %38 = arith.addf %35, %37 : vector<256x64xf32>
    %cst_29 = arith.constant 0.000000e+00 : f32
    %39 = vector.broadcast %cst_29 : f32 to vector<256x64xf32>
    %40 = arith.maximumf %38, %39 : vector<256x64xf32>
    %41 = arith.truncf %40 : vector<256x64xf32> to vector<256x64xbf16>
    %c0_30 = arith.constant 0 : index
    %c0_31 = arith.constant 0 : index
    %42 = vector.load %arg12[%c0_30, %c0_31] : memref<64x128xbf16, #tpu.memory_space<vmem>>, vector<64x128xbf16>
    %cst_32 = arith.constant dense<0.000000e+00> : vector<256x128xf32>
    %43 = tpu.matmul %41, %42, %cst_32 {dimension_numbers = #tpu.dot_dimension_numbers<[1], [0], [0], [1], [0, 0, 1, 1], [], []>} : vector<256x64xbf16>, vector<64x128xbf16>, vector<256x128xf32> -> vector<256x128xf32>
    %c0_33 = arith.constant 0 : index
    %c0_34 = arith.constant 0 : index
    %44 = vector.load %arg13[%c0_33, %c0_34] : memref<1x128xf32, #tpu.memory_space<vmem>>, vector<1x128xf32>
    %45 = vector.broadcast %44 : vector<1x128xf32> to vector<256x128xf32>
    %46 = arith.addf %43, %45 : vector<256x128xf32>
    %47 = tpu.iota {dimensions = array<i32: 1>} : vector<256x128xi32>
    %c16_i32 = arith.constant 16 : i32
    %48 = vector.broadcast %c16_i32 : i32 to vector<256x128xi32>
    %49 = arith.cmpi slt, %47, %48 : vector<256x128xi32>
    %cst_35 = arith.constant 0xFF800000 : f32
    %50 = vector.broadcast %cst_35 : f32 to vector<256x128xf32>
    %51 = arith.select %49, %46, %50 : vector<256x128xi1>, vector<256x128xf32>
    %cst_36 = arith.constant dense<0xFF800000> : vector<256xf32>
    %52 = vector.multi_reduction <maximumf>, %51, %cst_36 [1] : vector<256x128xf32> to vector<256xf32>
    %53 = vector.shape_cast %52 : vector<256xf32> to vector<256x1xf32>
    %54 = vector.broadcast %53 : vector<256x1xf32> to vector<256x128xf32>
    %55 = arith.subf %51, %54 : vector<256x128xf32>
    %56 = math.exp %55 : vector<256x128xf32>
    %cst_37 = arith.constant dense<0.000000e+00> : vector<256xf32>
    %57 = vector.multi_reduction <add>, %56, %cst_37 [1] : vector<256x128xf32> to vector<256xf32>
    %58 = vector.shape_cast %57 : vector<256xf32> to vector<256x1xf32>
    %59 = tpu.reciprocal %58 {approx = true} : vector<256x1xf32> -> vector<256x1xf32>
    %60 = vector.broadcast %59 : vector<256x1xf32> to vector<256x128xf32>
    %61 = arith.mulf %56, %60 : vector<256x128xf32>
    %c0_38 = arith.constant 0 : index
    %c0_39 = arith.constant 0 : index
    %62 = vector.load %arg14[%c0_38, %c0_39] : memref<256x128xf32, #tpu.memory_space<vmem>>, vector<256x128xf32>
    tpu.vector_store %arg14[%c0_38, %c0_39], %61 {strides = array<i32>} : memref<256x128xf32, #tpu.memory_space<vmem>>, vector<256x128xf32>,
    return
  }
  func.func @transform_0(%arg0: i32) -> (i32, i32) {
    %c0_i32 = arith.constant 0 : i32
    %c0_i32_0 = arith.constant 0 : i32
    return %arg0, %c0_i32 : i32, i32
  }
  func.func @transform_1(%arg0: i32) -> (i32, i32) {
    %c0_i32 = arith.constant 0 : i32
    %c0_i32_0 = arith.constant 0 : i32
    %c0_i32_1 = arith.constant 0 : i32
    return %c0_i32, %c0_i32_0 : i32, i32
  }
  func.func @transform_2(%arg0: i32) -> (i32, i32) {
    %c0_i32 = arith.constant 0 : i32
    %c0_i32_0 = arith.constant 0 : i32
    %c0_i32_1 = arith.constant 0 : i32
    return %c0_i32, %c0_i32_0 : i32, i32
  }
  func.func @transform_3(%arg0: i32) -> (i32, i32) {
    %c0_i32 = arith.constant 0 : i32
    %c0_i32_0 = arith.constant 0 : i32
    %c0_i32_1 = arith.constant 0 : i32
    return %c0_i32, %c0_i32_0 : i32, i32
  }
  func.func @transform_4(%arg0: i32) -> (i32, i32) {
    %c0_i32 = arith.constant 0 : i32
    %c0_i32_0 = arith.constant 0 : i32
    %c0_i32_1 = arith.constant 0 : i32
    return %c0_i32, %c0_i32_0 : i32, i32
  }
  func.func @transform_5(%arg0: i32) -> (i32, i32) {
    %c0_i32 = arith.constant 0 : i32
    %c0_i32_0 = arith.constant 0 : i32
    %c0_i32_1 = arith.constant 0 : i32
    return %c0_i32, %c0_i32_0 : i32, i32
  }
  func.func @transform_6(%arg0: i32) -> (i32, i32) {
    %c0_i32 = arith.constant 0 : i32
    %c0_i32_0 = arith.constant 0 : i32
    %c0_i32_1 = arith.constant 0 : i32
    return %c0_i32, %c0_i32_0 : i32, i32
  }
  func.func @transform_7(%arg0: i32) -> (i32, i32) {
    %c0_i32 = arith.constant 0 : i32
    %c0_i32_0 = arith.constant 0 : i32
    %c0_i32_1 = arith.constant 0 : i32
    return %c0_i32, %c0_i32_0 : i32, i32
  }
  func.func @transform_8(%arg0: i32) -> (i32, i32) {
    %c0_i32 = arith.constant 0 : i32
    %c0_i32_0 = arith.constant 0 : i32
    %c0_i32_1 = arith.constant 0 : i32
    return %c0_i32, %c0_i32_0 : i32, i32
  }
  func.func @transform_9(%arg0: i32) -> (i32, i32) {
    %c0_i32 = arith.constant 0 : i32
    %c0_i32_0 = arith.constant 0 : i32
    %c0_i32_1 = arith.constant 0 : i32
    return %c0_i32, %c0_i32_0 : i32, i32
  }
  func.func @transform_10(%arg0: i32) -> (i32, i32) {
    %c0_i32 = arith.constant 0 : i32
    %c0_i32_0 = arith.constant 0 : i32
    %c0_i32_1 = arith.constant 0 : i32
    return %c0_i32, %c0_i32_0 : i32, i32
  }
  func.func @transform_11(%arg0: i32) -> (i32, i32) {
    %c0_i32 = arith.constant 0 : i32
    %c0_i32_0 = arith.constant 0 : i32
    %c0_i32_1 = arith.constant 0 : i32
    return %c0_i32, %c0_i32_0 : i32, i32
  }
  func.func @transform_12(%arg0: i32) -> (i32, i32) {
    %c0_i32 = arith.constant 0 : i32
    %c0_i32_0 = arith.constant 0 : i32
    %c0_i32_1 = arith.constant 0 : i32
    return %c0_i32, %c0_i32_0 : i32, i32
  }
  func.func @transform_13(%arg0: i32) -> (i32, i32) {
    %c0_i32 = arith.constant 0 : i32
    %c0_i32_0 = arith.constant 0 : i32
    return %arg0, %c0_i32 : i32, i32
  }
}

</mosaic_0001>

<bundles_post_ra>
// kernel: tpu_custom_call.1
= control target key start
LH: loop header
LB: loop body
LE: loop exit
PB: predicated region body
PF: predicated region fallthrough
CT: control target
= control target key end

     0   :  { %s5586_s0 = inlined_call_operand.hbm [shape: f32[512,128], index: 0, kind: input, shape index: {}]   ;;  %s5587_s1 = inlined_call_operand.vmem [shape: bf16[128,64], index: 1, kind: input, shape index: {}]   ;;  %s5588_s2 = inlined_call_operand.hbm [shape: f32[1,64], index: 2, kind: input, shape index: {}]   ;;  %s5589_s3 = inlined_call_operand.hbm [shape: bf16[64,128], index: 3, kind: input, shape index: {}]   ;;  %s5590_s4 = inlined_call_operand.hbm [shape: f32[1,128], index: 4, kind: input, shape index: {}]   ;;  %s5591_s5 = inlined_call_operand.hbm [shape: bf16[128,256], index: 5, kind: input, shape index: {}]   ;;  %s5592_s6 = inlined_call_operand.vmem [shape: f32[1,256], index: 6, kind: input, shape index: {}]   ;;  %s5593_s7 = inlined_call_operand.vmem [shape: bf16[256,256], index: 7, kind: input, shape index: {}]   ;;  %s5594_s8 = inlined_call_operand.hbm [shape: f32[1,256], index: 8, kind: input, shape index: {}]   ;;  %s5595_s9 = inlined_call_operand.vmem [shape: bf16[256,64], index: 9, kind: input, shape index: {}]   ;;  %s5596_s10 = inlined_call_operand.vmem [shape: f32[1,64], index: 10, kind: input, shape index: {}]   ;;  %s5597_s11 = inlined_call_operand.hbm [shape: bf16[64,128], index: 11, kind: input, shape index: {}]   ;;  %s5598_s12 = inlined_call_operand.vmem [shape: f32[1,128], index: 12, kind: input, shape index: {}]   ;;  %s5599_s13 = inlined_call_operand.hbm [shape: f32[512,128], index: 13, kind: output, shape index: {}]  }
   0x1   :  { %5609 = sst [smem:[#allocation20_spill]] %s5588_s2 }
   0x2   :  { %5610 = sst [smem:[#allocation21_spill]] %s5595_s9 }
   0x3   :  { %5611 = sst [smem:[#allocation22_spill]] %s5596_s10 }
   0x4   :  { %5612 = sst [smem:[#allocation23_spill]] %s5598_s12 }
   0x5   :  { %5613 = sst [smem:[#allocation24_spill]] %s5599_s13 }
   0x6   :  { %18 = vsyncpa [#allocation3], 0 }
   0x7   :  { %20 = vsyncpa [#allocation3 + $0x1], 0 }
   0x8   :  { %21 = vsyncpa [#allocation6], 0 }
   0x9   :  { %22 = vsyncpa [#allocation9], 0 }
   0xa   :  { %23 = vsyncpa [#allocation12], 0 }
   0xb   :  { %24 = vsyncpa [#allocation4], 0 }
   0xc   :  { %26 = vsyncpa [#allocation4 + $0x1], 0  ;;  %s4322_s25 = smov 0   ;;  %s4324_s26 = smov 0  }
   0xd   :  { %s4326_s27 = smov 0   ;;  %s4328_s28 = smov 0  }
   0xe LB: > { %s4237_s29 = smov [#allocation5]   ;;  %s4343_s14 = sadd.s32 4294967295, %s4235_s28   ;;  %s4235_s28 = sphi %s4328_s28, %s5645_s28   ;;  %s4231_s27 = sphi %s4326_s27, %s5644_s27   ;;  %s4227_s26 = sphi %s4324_s26, %s5643_s26   ;;  %s4223_s25 = sphi %s4322_s25, %s5642_s25  }
   0xf   : > { %s357_s30 = sshll.u32 %s4237_s29, 4  ;;  %p3150_p0 = scmp.ge.s32.totalorder %s4235_s28, 1  ;;  %s4348_s30 = int_to_ptr.vmem [resolvable:$true] %s357_s30 }
  0x10   : > { %p5602_p1 = scmp.eq.s32.totalorder %s4343_s14, 0  ;;  %p341_p2 = scmp.lt.s32.totalorder %s4235_s28, 3 }
  0x11   : > { %s4238_s16 = smov [#allocation8]   ;;  %s4239_s18 = smov [#allocation11]  }
  0x12   : > { %p4350_p3 = pnand %p3150_p0, %p341_p2  ;;  %s381_s17 = sshll.u32 %s4238_s16, 4  ;;  %s4357_s17 = int_to_ptr.vmem [resolvable:$true] %s381_s17 }
  0x13   : > { %s411_s19 = sshll.u32 %s4239_s18, 4  ;;  %s4240_s21 = smov [#allocation7]   ;;  %s4365_s19 = int_to_ptr.vmem [resolvable:$true] %s411_s19 }
  0x14   : > { %s5614_s15 = scalar_select %p4350_p3, 1, 0 }
  0x15   : > { %p3641_p5 = pneg %p4350_p3  ;;  %s4367_s22 = sshll.u32 %s4240_s21, 4  ;;  %s368_s22 = int_to_ptr.vmem [resolvable:$true] %s4367_s22 }
  0x16   : > { %s5616_s2 = sld [smem:[#allocation20_spill]] }
  0x17   : > { %p4361_p6 = pnand %p3641_p5, %p5602_p1 }
  0x19   : > { %p4377_p8 = pneg %p4361_p6 }
  0x1c   : > { %s3959_s29 = scalar_lea.hbm %s5616_s2, 16 }
  0x1d   : > { %p3960_p7 = scmp.ne.s32.totalorder %s5616_s2, %s3959_s29  ;;  %p3966_p11 = scmp.lt.u32.totalorder %s3959_s29, %s5616_s2 }
  0x1f   : > { %p3962_p9 = pnand %p4377_p8, %p3960_p7 }
  0x21   : > { %p3963_p10 = pneg %p3962_p9 }
  0x23   : > { %p3968_p12 = pnand %p3966_p11, %p3963_p10 }
  0x25   : > { %3971 = shalt.err (!%p3968_p12)
}
  0x26   : > { %s3972_s13 = scalar_lea.vmem %s4348_s30, 16  ;;  %s3979_s23 = scalar_lea.vmem %s4348_s30, 32 }
  0x27   : > { %p3973_p13 = scmp.ne.s32.totalorder %s4348_s30, %s3972_s13  ;;  %p3980_p5 = scmp.lt.s32.totalorder %s4348_s30, %s4348_s30 }
  0x28   : > { %p3981_p7 = scmp.lt.s32.totalorder %s3979_s23, %s3972_s13 }
  0x29   : > { %p3975_p0 = pnand %p3973_p13, %p4377_p8 }
  0x2a   : > { %p3982_p9 = por %p3981_p7, %p3980_p5 }
  0x2b   : > { %p3976_p2 = pneg %p3975_p0 }
  0x2d   : > { %p3983_p4 = pnand %p3982_p9, %p3976_p2 }
  0x2f   : > { %3986 = shalt.err (!%p3983_p4)
}
  0x30   : > { %3644 = dma.hbm_to_vmem [thread:$0]  (!%p4361_p6), %s5616_s2, 16, %s4348_s30, [#allocation6]  }
  0x31   : > { %s3987_s21 = scalar_lea.hbm %s5590_s4, 16 }
  0x32   : > { %p3988_p10 = scmp.ne.s32.totalorder %s5590_s4, %s3987_s21  ;;  %p3994_p4 = scmp.lt.u32.totalorder %s3987_s21, %s5590_s4 }
  0x34   : > { %p3990_p11 = pnand %p3988_p10, %p4377_p8 }
  0x36   : > { %p3991_p12 = pneg %p3990_p11 }
  0x38   : > { %p3996_p13 = pnand %p3994_p4, %p3991_p12 }
  0x3a   : > { %3999 = shalt.err (!%p3996_p13)
}
  0x3b   : > { %s4000_s30 = scalar_lea.vmem %s4357_s17, 16  ;;  %s4007_s9 = scalar_lea.vmem %s4357_s17, 32 }
  0x3c   : > { %p4001_p0 = scmp.ne.s32.totalorder %s4357_s17, %s4000_s30  ;;  %p4008_p7 = scmp.lt.s32.totalorder %s4357_s17, %s4357_s17 }
  0x3d   : > { %p4009_p9 = scmp.lt.s32.totalorder %s4007_s9, %s4000_s30 }
  0x3e   : > { %p4003_p2 = pnand %p4001_p0, %p4377_p8 }
  0x3f   : > { %p4010_p10 = por %p4009_p9, %p4008_p7 }
  0x40   : > { %p4004_p5 = pneg %p4003_p2 }
  0x42   : > { %p4011_p11 = pnand %p4010_p10, %p4004_p5 }
  0x44   : > { %4014 = shalt.err (!%p4011_p11)
}
  0x45   : > { %3650 = dma.hbm_to_vmem [thread:$0]  (!%p4361_p6), %s5590_s4, 16, %s4357_s17, [#allocation9]  }
  0x46   : > { %s4015_s16 = scalar_lea.hbm %s5594_s8, 32 }
  0x47   : > { %p4016_p12 = scmp.ne.s32.totalorder %s5594_s8, %s4015_s16  ;;  %p4022_p0 = scmp.lt.u32.totalorder %s4015_s16, %s5594_s8 }
  0x49   : > { %p4018_p4 = pnand %p4016_p12, %p4377_p8 }
  0x4b   : > { %p4019_p13 = pneg %p4018_p4 }
  0x4d   : > { %p4024_p2 = pnand %p4022_p0, %p4019_p13 }
  0x4f   : > { %4027 = shalt.err (!%p4024_p2)
}
  0x50   : > { %s4028_s17 = scalar_lea.vmem %s4365_s19, 32  ;;  %p4036_p10 = scmp.lt.s32.totalorder %s4365_s19, %s4365_s19 }
  0x51   : > { %p4029_p5 = scmp.ne.s32.totalorder %s4365_s19, %s4028_s17  ;;  %p4037_p11 = scmp.lt.s32.totalorder %s4028_s17, %s4028_s17 }
  0x53   : > { %p4031_p7 = pnand %p4029_p5, %p4377_p8  ;;  %p4038_p12 = por %p4037_p11, %p4036_p10 }
  0x55   : > { %p4032_p9 = pneg %p4031_p7 }
  0x57   : > { %p4039_p4 = pnand %p4038_p12, %p4032_p9 }
  0x59   : > { %4042 = shalt.err (!%p4039_p4)
}
  0x5a   : > { %3656 = dma.hbm_to_vmem [thread:$0]  (!%p4361_p6), %s5594_s8, 32, %s4365_s19, [#allocation12]  }
  0x5b   : > { %s4043_s29 = scalar_lea.hbm %s5589_s3, 512 }
  0x5c   : > { %p4044_p13 = scmp.ne.s32.totalorder %s5589_s3, %s4043_s29  ;;  %p4050_p5 = scmp.lt.u32.totalorder %s4043_s29, %s5589_s3 }
  0x5e   : > { %p4046_p0 = pnand %p4044_p13, %p4377_p8 }
  0x60   : > { %p4047_p2 = pneg %p4046_p0 }
  0x62   : > { %p4052_p7 = pnand %p4050_p5, %p4047_p2 }
  0x64   : > { %4055 = shalt.err (!%p4052_p7)
}
  0x65   : > { %s4056_s30 = scalar_lea.vmem %s368_s22, 512  ;;  %p4064_p12 = scmp.lt.s32.totalorder %s368_s22, %s368_s22 }
  0x66   : > { %p4057_p9 = scmp.ne.s32.totalorder %s368_s22, %s4056_s30  ;;  %p4065_p4 = scmp.lt.s32.totalorder %s4056_s30, %s4056_s30 }
  0x68   : > { %p4059_p10 = pnand %p4057_p9, %p4377_p8  ;;  %p4066_p1 = por %p4065_p4, %p4064_p12 }
  0x6a   : > { %p4060_p11 = pneg %p4059_p10 }
  0x6c   : > { %p4067_p3 = pnand %p4066_p1, %p4060_p11 }
  0x6e   : > { %4070 = shalt.err (!%p4067_p3)
}
  0x6f   : > { %s5604_s19 = smov 64   ;;  %s5605_s17 = smov 4  }
  0x70   : > { %3647 = dma.hbm_to_vmem [thread:$0]  (!%p4361_p6), %s5589_s3, 512, %s368_s22, [#allocation6], %s5604_s19, %s5604_s19, %s5605_s17  }
  0x71   : > { %s4243_s12 = smov [#allocation10]   ;;  %s4071_s21 = scalar_lea.hbm %s5591_s5, 2048 }
  0x72   : > { %s391_s24 = sshll.u32 %s4243_s12, 4  ;;  %p4072_p1 = scmp.ne.s32.totalorder %s5591_s5, %s4071_s21  ;;  %s392_s24 = int_to_ptr.vmem [resolvable:$true] %s391_s24 }
  0x73   : > { %p4078_p0 = scmp.lt.u32.totalorder %s4071_s21, %s5591_s5 }
  0x74   : > { %p4074_p3 = pnand %p4072_p1, %p4377_p8 }
  0x76   : > { %p4075_p13 = pneg %p4074_p3 }
  0x78   : > { %p4080_p2 = pnand %p4078_p0, %p4075_p13 }
  0x7a   : > { %4083 = shalt.err (!%p4080_p2)
}
  0x7b   : > { %s4084_s22 = scalar_lea.vmem %s392_s24, 2048  ;;  %p4092_p10 = scmp.lt.s32.totalorder %s392_s24, %s392_s24 }
  0x7c   : > { %p4085_p5 = scmp.ne.s32.totalorder %s392_s24, %s4084_s22  ;;  %p4093_p11 = scmp.lt.s32.totalorder %s4084_s22, %s4084_s22 }
  0x7e   : > { %p4087_p7 = pnand %p4085_p5, %p4377_p8  ;;  %p4094_p12 = por %p4093_p11, %p4092_p10 }
  0x80   : > { %p4088_p9 = pneg %p4087_p7 }
  0x82   : > { %p4095_p4 = pnand %p4094_p12, %p4088_p9 }
  0x84   : > { %4098 = shalt.err (!%p4095_p4)
}
  0x85   : > { %s5606_s9 = smov 128   ;;  %s5607_s10 = smov 8  }
  0x86   : > { %3653 = dma.hbm_to_vmem [thread:$0]  (!%p4361_p6), %s5591_s5, 2048, %s392_s24, [#allocation9], %s5606_s9, %s5606_s9, %s5607_s10  }
  0x87   : > { %s4246_s29 = smov [#allocation13]   ;;  %s4099_s23 = scalar_lea.hbm %s5597_s11, 512 }
  0x88   : > { %s427_s16 = sshll.u32 %s4246_s29, 4  ;;  %p4100_p1 = scmp.ne.s32.totalorder %s5597_s11, %s4099_s23  ;;  %s428_s16 = int_to_ptr.vmem [resolvable:$true] %s427_s16 }
  0x89   : > { %p4106_p0 = scmp.lt.u32.totalorder %s4099_s23, %s5597_s11 }
  0x8a   : > { %p4102_p3 = pnand %p4100_p1, %p4377_p8 }
  0x8c   : > { %p4103_p13 = pneg %p4102_p3 }
  0x8e   : > { %p4108_p2 = pnand %p4106_p0, %p4103_p13 }
  0x90   : > { %4111 = shalt.err (!%p4108_p2)
}
  0x91   : > { %s4112_s24 = scalar_lea.vmem %s428_s16, 512  ;;  %p4120_p10 = scmp.lt.s32.totalorder %s428_s16, %s428_s16 }
  0x92   : > { %p4113_p5 = scmp.ne.s32.totalorder %s428_s16, %s4112_s24  ;;  %p4121_p11 = scmp.lt.s32.totalorder %s4112_s24, %s4112_s24 }
  0x94   : > { %p4115_p7 = pnand %p4113_p5, %p4377_p8  ;;  %p4122_p12 = por %p4121_p11, %p4120_p10 }
  0x96   : > { %p4116_p9 = pneg %p4115_p7 }
  0x98   : > { %p4123_p4 = pnand %p4122_p12, %p4116_p9 }
  0x9a   : > { %4126 = shalt.err (!%p4123_p4)
}
  0x9b   : > { %s5618_s2 = smov 4   ;;  %s5619_s12 = smov 64  }
  0x9c   : > { %3659 = dma.hbm_to_vmem [thread:$0]  (!%p4361_p6), %s5597_s11, 512, %s428_s16, [#allocation12], %s5619_s12, %s5619_s12, %s5618_s2  }
  0x9d   : > { %s3149_s20 = sadd.s32 4294967294, %s4235_s28   ;;  %s4512_s18 = sadd.s32 1, %s4235_s28  }
  0x9e   : > { %s36_s29 = ssub.s32 %s4235_s28, %s4512_s18  ;;  %s39_s21 = sadd.s32 1, %s4231_s27 }
  0x9f   : > { %p37_p8 = scmp.eq.s32.totalorder %s36_s29, 0  ;;  %p46_p1 = scmp.ne.s32.totalorder %s4231_s27, %s4227_s26 }
  0xa0   : > { %p47_p3 = scmp.eq.s32.totalorder %s4235_s28, 0  ;;  %p52_p13 = scmp.ne.s32.totalorder %s4227_s26, %s4223_s25 }
  0xa1   : > { %s4523_s13 = scalar_select %p37_p8, %s4231_s27, %s39_s21  }
  0xa2   : > { %p4525_p0 = por %p47_p3, %p46_p1  ;;  %p5621_p2 = scmp.eq.s32.totalorder %s4343_s14, 0 }
  0xa3   : > { %p328_p5 = scmp.eq.s32.totalorder %s4343_s14, 1  ;;  %p334_p7 = scmp.eq.s32.totalorder %s3149_s20, 1 }
  0xa4   : > { %p4531_p6 = por %p5621_p2, %p52_p13  ;;  %p3674_p9 = scmp.lt.s32.totalorder %s4235_s28, 2 }
  0xa5   : > { %s444_s30 = sand.u32 1, %s4231_s27   ;;  %p4538_p10 = por %p328_p5, %p46_p1 }
  0xa6   : > { %p4542_p11 = por %p334_p7, %p52_p13  ;;  %s3158_s2 = sshll.u32 %s444_s30, 8 }
  0xa7   : > { %s5623_s22 = scalar_select %p4538_p10, 1, 0 }
  0xa8   : > { %s5624_s24 = scalar_select %p4542_p11, 1, 0 }
  0xa9   : > { %s3291_s12 = sshll.u32 %s4235_s28, 12  ;;  %s448_s20 = scalar_lea.vmem [#allocation2], %s3158_s2 }
  0xaa   : > { %s4550_s29 = scalar_lea.hbm %s5586_s0, %s3291_s12  ;;  %s455_s21 = sshll.u32 %s448_s20, 4  ;;  %s4552_s21 = int_to_ptr.vmem [resolvable:$true] %s455_s21 }
  0xab   : > { %p4556_p12 = pnand %p3674_p9, %p4525_p0  ;;  %s4560_s10 = scalar_lea.sflag [#allocation3], %s444_s30 }
  0xac   : > { %s4127_s19 = scalar_lea.hbm %s4550_s29, 4096  ;;  %s4132_s23 = scalar_lea.hbm %s5586_s0, 8192 }
  0xad   : > { %p4128_p4 = scmp.ne.s32.totalorder %s4550_s29, %s4127_s19  ;;  %p4129_p8 = pneg %p4556_p12 }
  0xae   : > { %p4133_p13 = scmp.lt.u32.totalorder %s4550_s29, %s5586_s0  ;;  %p4134_p0 = scmp.lt.u32.totalorder %s4132_s23, %s4127_s19 }
  0xaf   : > { %p4130_p1 = pnand %p4129_p8, %p4128_p4  ;;  %p4136_p5 = scmp.lt.u32.totalorder %s4127_s19, %s4550_s29 }
  0xb0   : > { %p4135_p2 = por %p4134_p0, %p4133_p13 }
  0xb1   : > { %p4131_p3 = pneg %p4130_p1 }
  0xb2   : > { %p4137_p7 = por %p4136_p5, %p4135_p2 }
  0xb4   : > { %p4138_p9 = pnand %p4137_p7, %p4131_p3 }
  0xb6   : > { %4141 = shalt.err (!%p4138_p9)
}
  0xb7   : > { %s4142_s30 = scalar_lea.vmem %s4552_s21, 4096  ;;  %s4247_s2 = smov [#allocation2]  }
  0xb8   : > { %p4143_p4 = scmp.ne.s32.totalorder %s4552_s21, %s4142_s30  ;;  %s4147_s12 = sshll.u32 %s4247_s2, 4  ;;  %s4148_s12 = int_to_ptr.vmem [resolvable:$false] %s4147_s12 }
  0xb9   : > { %s4149_s17 = scalar_lea.vmem %s4148_s12, 8192  ;;  %p4150_p10 = scmp.lt.s32.totalorder %s4552_s21, %s4148_s12 }
  0xba   : > { %p4145_p1 = pnand %p4143_p4, %p4129_p8  ;;  %p4151_p13 = scmp.lt.s32.totalorder %s4149_s17, %s4142_s30 }
  0xbc   : > { %p4146_p11 = pneg %p4145_p1  ;;  %p4152_p0 = por %p4151_p13, %p4150_p10 }
  0xbe   : > { %p4153_p2 = pnand %p4152_p0, %p4146_p11 }
  0xc0   : > { %4156 = shalt.err (!%p4153_p2)
}
  0xc1   : > { %s5626_s19 = smov 8   ;;  %s5627_s23 = smov 128  }
  0xc2   : > { %3663 = dma.hbm_to_vmem [thread:$0]  (!%p4556_p12), %s4550_s29, 4096, %s4552_s21, %s4560_s10, %s5627_s23, %s5627_s23, %s5626_s19  }
  0xc3   : > { %p5628_p8 = scmp.ne.s32.totalorder %s5614_s15, 0 }
  0xc4   : > { %s4594_s20 = sand.u32 (!%p5628_p8), 1, %s4227_s26  }
  0xc5   : > { %467 = sbr.rel (%p5628_p8) target bundleno = 2027 (0x7eb), region = 72  ;;  %s3162_s30 = sshll.u32 (!%p5628_p8), %s4594_s20, 8 }
  0xc6   : > { %s470_s2 = scalar_lea.sflag (!%p5628_p8), [#allocation3], %s4594_s20  ;;  %s4600_s9 = scalar_lea.vmem (!%p5628_p8), [#allocation2], %s3162_s30 }
  0xcc   : > { %4202 = dma.done.wait (%p4531_p6), %s470_s2, 4096  }
  0xcd   : > { %4204 = vsyncadd (%p4531_p6), %s470_s2, 4294963200  ;;  %p5629_p10 = scmp.eq.s32.totalorder %s4343_s14, 0 }
  0xcf   : > { %4206 = dma.done.wait (%p5629_p10), [#allocation6], 528   ;;  %p5630_p11 = pmov %p5629_p10 }
  0xd0   : > { %p5631_p12 = pmov %p5629_p10 }
  0xd1   : > { %4208 = vsyncadd (%p5630_p11), [#allocation6], 4294966768 }
  0xd2   : > { %4210 = dma.done.wait (%p5631_p12), [#allocation9], 2064   ;;  %p5632_p3 = pmov %p5629_p10 }
  0xd4   : > { %4212 = vsyncadd (%p5632_p3), [#allocation9], 4294965232  ;;  %p5633_p5 = pmov %p5632_p3 }
  0xd5   : > { %p5634_p7 = pmov %p5632_p3 }
  0xd6   : > { %4214 = dma.done.wait (%p5633_p5), [#allocation12], 544  }
  0xd7   : > { %4216 = vsyncadd (%p5634_p7), [#allocation12], 4294966752  ;;  %v3727_v0 = vld [vmem:[%s5587_s1] sm:$0xff]   ;;  %v3728_v1 = vld [vmem:[%s5587_s1 + $0x8] sm:$0xff]   ;;  %vm910_vm0 = vcmask 523264   ;;  %s5635_s19 = sld [smem:[#allocation21_spill]] }
  0xd8   : > { %3469 = vmatprep.subr.bf16.mxu0 %v3727_v0  ;;  %v3729_v2 = vld [vmem:[%s5587_s1 + $0x10] sm:$0xff]   ;;  %v3730_v3 = vld [vmem:[%s5587_s1 + $0x18] sm:$0xff]   ;;  %v543_v4 = vld [vmem:[%s4600_s9] sm:$0xff]  ;;  %s5636_s15 = sld [smem:[#allocation22_spill]]  ;;  %s5637_s29 = sld [smem:[#allocation23_spill]] }
  0xd9   : > { %3470 = vmatpush3.bf16.msra.mxu0 %v3727_v0  ;;  %v544_v5 = vld [vmem:[%s4600_s9 + $0x8] sm:$0xff]  ;;  %v3731_v7 = vld [vmem:[%s5587_s1 + $0x20] sm:$0xff]   ;;  %v3733_v9 = vld [vmem:[%s5587_s1 + $0x30] sm:$0xff]   ;;  %s5470_s21 = scalar_lea.vmem [#allocation14], %s3162_s30  ;;  %s3292_s30 = sshll.u32 %s4343_s14, 12 }
  0xda   : > { %3471 = vmatprep.subr.bf16.mxu0 %v3728_v1  ;;  %v575_v6 = vpack.c.bf16 %v544_v5, %v543_v4  ;;  %v3732_v8 = vld [vmem:[%s5587_s1 + $0x28] sm:$0xff]   ;;  %v3734_v12 = vld [vmem:[%s5587_s1 + $0x38] sm:$0xff]   ;;  %v545_v13 = vld [vmem:[%s4600_s9 + $0x10] sm:$0xff]  ;;  %s3019_s12 = sshll.u32 %s5470_s21, 4  ;;  %s5638_s23 = sld [smem:[#allocation24_spill]]  ;;  %s5539_s12 = int_to_ptr.vmem [resolvable:$true] %s3019_s12 }
  0xdb   : > { %v3735_v10 = vld [vmem:[#allocation7] sm:$0xff]   ;;  %v3736_v11 = vld [vmem:[#allocation7 + $0x8] sm:$0xff]   ;;  %v546_v14 = vld [vmem:[%s4600_s9 + $0x18] sm:$0xff]  ;;  %s3006_s14 = scalar_lea.sflag [#allocation4], %s4594_s20  ;;  %p5639_p9 = scmp.ne.s32.totalorder %s5623_s22, 0 }
  0xdc   : > { %3485 = vmatprep.mubr.bf16.mxu0 %v575_v6  ;;  %3517 = vmatprep.subr.bf16.mxu1 %v3735_v10  ;;  %v547_v15 = vld [vmem:[%s4600_s9 + $0x20] sm:$0xff]  ;;  %v548_v16 = vld [vmem:[%s4600_s9 + $0x28] sm:$0xff]  ;;  %v576_v17 = vpack.c.bf16 %v546_v14, %v545_v13  ;;  %v549_v19 = vld [vmem:[%s4600_s9 + $0x30] sm:$0xff]  ;;  %s4249_s10 = smov [#allocation14]  }
  0xdd   : > { %3472 = vmatpush3.bf16.msra.mxu0 %v3728_v1  ;;  %3518 = vmatpush3.bf16.msra.mxu1 %v3735_v10  ;;  %v577_v18 = vpack.c.bf16 %v548_v16, %v547_v15  ;;  %v550_v20 = vld [vmem:[%s4600_s9 + $0x38] sm:$0xff]  ;;  %v551_v21 = vld [vmem:[%s4600_s9 + $0x40] sm:$0xff]  ;;  %v552_v22 = vld [vmem:[%s4600_s9 + $0x48] sm:$0xff]  ;;  %s4161_s16 = sshll.u32 %s4249_s10, 4  ;;  %s4162_s16 = int_to_ptr.vmem [resolvable:$false] %s4161_s16 }
  0xde   : > { %3473 = vmatprep.subr.bf16.mxu0 %v3729_v2  ;;  %3519 = vmatprep.subr.bf16.mxu1 %v3736_v11  ;;  %v578_v23 = vpack.c.bf16 %v550_v20, %v549_v19  ;;  %v579_v24 = vpack.c.bf16 %v552_v22, %v551_v21  ;;  %v553_v25 = vld [vmem:[%s4600_s9 + $0x50] sm:$0xff]  ;;  %v554_v26 = vld [vmem:[%s4600_s9 + $0x58] sm:$0xff]  ;;  %v555_v27 = vld [vmem:[%s4600_s9 + $0x60] sm:$0xff]  ;;  %p4164_p13 = scmp.lt.s32.totalorder %s5539_s12, %s4162_s16 }
  0xdf   : > { %v556_v28 = vld [vmem:[%s4600_s9 + $0x68] sm:$0xff]  ;;  %v580_v29 = vpack.c.bf16 %v554_v26, %v553_v25  ;;  %v557_v31 = vld [vmem:[%s4600_s9 + $0x70] sm:$0xff]  ;;  %v558_v32 = vld [vmem:[%s4600_s9 + $0x78] sm:$0xff] }
  0xe0   : > { %v581_v30 = vpack.c.bf16 %v556_v28, %v555_v27  ;;  %v559_v33 = vld [vmem:[%s4600_s9 + $0x80] sm:$0xff]  ;;  %v560_v34 = vld [vmem:[%s4600_s9 + $0x88] sm:$0xff]  ;;  %v582_v35 = vpack.c.bf16 %v558_v32, %v557_v31  ;;  %v561_v37 = vld [vmem:[%s4600_s9 + $0x90] sm:$0xff]  ;;  %s5537_s2 = scalar_lea.hbm %s5638_s23, %s3292_s30 }
  0xe1   : > { %3474 = vmatpush3.bf16.msra.mxu0 %v3729_v2  ;;  %3520 = vmatpush3.bf16.msra.mxu1 %v3736_v11  ;;  %v583_v36 = vpack.c.bf16 %v560_v34, %v559_v33  ;;  %v562_v38 = vld [vmem:[%s4600_s9 + $0x98] sm:$0xff]  ;;  %v563_v39 = vld [vmem:[%s4600_s9 + $0xa0] sm:$0xff]  ;;  %v564_v40 = vld [vmem:[%s4600_s9 + $0xa8] sm:$0xff] }
  0xe2   : > { %3475 = vmatprep.subr.bf16.mxu0 %v3730_v3  ;;  %v584_v41 = vpack.c.bf16 %v562_v38, %v561_v37  ;;  %v585_v42 = vpack.c.bf16 %v564_v40, %v563_v39  ;;  %v565_v43 = vld [vmem:[%s4600_s9 + $0xb0] sm:$0xff]  ;;  %v566_v44 = vld [vmem:[%s4600_s9 + $0xb8] sm:$0xff]  ;;  %v567_v45 = vld [vmem:[%s4600_s9 + $0xc0] sm:$0xff] }
  0xe3   : > { %v568_v46 = vld [vmem:[%s4600_s9 + $0xc8] sm:$0xff]  ;;  %v586_v47 = vpack.c.bf16 %v566_v44, %v565_v43  ;;  %v569_v49 = vld [vmem:[%s4600_s9 + $0xd0] sm:$0xff]  ;;  %v570_v50 = vld [vmem:[%s4600_s9 + $0xd8] sm:$0xff] }
  0xe4   : > { %v587_v48 = vpack.c.bf16 %v568_v46, %v567_v45  ;;  %v571_v51 = vld [vmem:[%s4600_s9 + $0xe0] sm:$0xff]  ;;  %v572_v52 = vld [vmem:[%s4600_s9 + $0xe8] sm:$0xff]  ;;  %v588_v53 = vpack.c.bf16 %v570_v50, %v569_v49  ;;  %v573_v55 = vld [vmem:[%s4600_s9 + $0xf0] sm:$0xff] }
  0xe5   : > { %3476 = vmatpush3.bf16.msra.mxu0 %v3730_v3  ;;  %v589_v54 = vpack.c.bf16 %v572_v52, %v571_v51  ;;  %v574_v56 = vld [vmem:[%s4600_s9 + $0xf8] sm:$0xff]  ;;  %v3741_v60 = vld [vmem:[#allocation10 + $0x4] ss:$8 sps:$4 sm:$0xff]   ;;  %v4674_v61 = vld [vmem:[#allocation5] ss:$0 sm:$0xff] }
  0xe6   : > { %3477 = vmatprep.subr.bf16.mxu0 %v3731_v7  ;;  %v590_v57 = vpack.c.bf16 %v574_v56, %v573_v55  ;;  %v3737_v58 = vld [vmem:[#allocation7 + $0x10] sm:$0xff]   ;;  %v3738_v59 = vld [vmem:[#allocation7 + $0x18] sm:$0xff]   ;;  %v3739_v13 = vld [vmem:[#allocation10] ss:$8 sps:$4 sm:$0xff]  }
  0xe7   : > { %3521 = vmatprep.subr.bf16.mxu1 %v3737_v58  ;;  %v3744_v16 = vld [vmem:[#allocation10 + $0x14] ss:$8 sps:$4 sm:$0xff]   ;;  %v3747_v26 = vld [vmem:[#allocation10 + $0x24] ss:$8 sps:$4 sm:$0xff]   ;;  %v3745_v31 = vld [vmem:[#allocation10 + $0x20] ss:$8 sps:$4 sm:$0xff]  }
  0xe8   : > { %3522 = vmatpush3.bf16.msra.mxu1 %v3737_v58  ;;  %v3750_v34 = vld [vmem:[#allocation10 + $0x34] ss:$8 sps:$4 sm:$0xff]   ;;  %v3753_v44 = vld [vmem:[#allocation10 + $0x44] ss:$8 sps:$4 sm:$0xff]   ;;  %v3751_v49 = vld [vmem:[#allocation10 + $0x40] ss:$8 sps:$4 sm:$0xff]  }
  0xe9   : > { %3478 = vmatpush3.bf16.msra.mxu0 %v3731_v7  ;;  %3523 = vmatprep.subr.bf16.mxu1 %v3738_v59  ;;  %v3756_v52 = vld [vmem:[#allocation10 + $0x54] ss:$8 sps:$4 sm:$0xff]  }
  0xea   : > { %3479 = vmatprep.subr.bf16.mxu0 %v3732_v8 }
  0xec   : > { %3524 = vmatpush3.bf16.msra.mxu1 %v3738_v59 }
  0xed   : > { %3480 = vmatpush3.bf16.msra.mxu0 %v3732_v8  ;;  %1276 = vmatprep.subr.bf16.mxu1 %v3741_v60  ;;  %v3754_v60 = vld [vmem:[#allocation10 + $0x50] ss:$8 sps:$4 sm:$0xff]  }
  0xee   : > { %3481 = vmatprep.subr.bf16.mxu0 %v3733_v9 }
  0xf1   : > { %3482 = vmatpush3.bf16.msra.mxu0 %v3733_v9 }
  0xf2   : > { %3483 = vmatprep.subr.bf16.mxu0 %v3734_v12 }
  0xf5   : > { %3484 = vmatpush3.bf16.msra.mxu0 %v3734_v12 }
  0xf8   : > { %3486 = vmatmul.mubr.bf16.vlgmr.msra.gmra.mrb[0].mxu0 %v576_v17 }
  0xf9   : > { %3489 = vmatprep.mubr.bf16.mxu0 %v577_v18 }
 0x100   : > { %3490 = vmatmul.mubr.bf16.gmra.mrb[4].mxu0 %v578_v23 }
 0x101   : > { %3493 = vmatprep.mubr.bf16.mxu0 %v579_v24  ;;  %v3742_v24 = vld [vmem:[#allocation10 + $0x10] ss:$8 sps:$4 sm:$0xff]  }
 0x108   : > { %3494 = vmatmul.mubr.bf16.gmra.mrb[8].mxu0 %v580_v29 }
 0x109   : > { %3497 = vmatprep.mubr.bf16.mxu0 %v581_v30 }
 0x110   : > { %3498 = vmatmul.mubr.bf16.gmra.mrb[12].mxu0 %v582_v35 }
 0x111   : > { %3501 = vmatprep.mubr.bf16.mxu0 %v583_v36 }
 0x118   : > { %3502 = vmatmul.mubr.bf16.gmra.mrb[16].mxu0 %v584_v41 }
 0x119   : > { %3505 = vmatprep.mubr.bf16.mxu0 %v585_v42  ;;  %v3748_v42 = vld [vmem:[#allocation10 + $0x30] ss:$8 sps:$4 sm:$0xff]  }
 0x120   : > { %3506 = vmatmul.mubr.bf16.gmra.mrb[20].mxu0 %v586_v47 }
 0x121   : > { %3509 = vmatprep.mubr.bf16.mxu0 %v587_v48 }
 0x128   : > { %3510 = vmatmul.mubr.bf16.gmra.mrb[24].mxu0 %v588_v53 }
 0x129   : > { %3513 = vmatprep.mubr.bf16.mxu0 %v589_v54 }
 0x130   : > { %3514 = vmatmul.mubr.bf16.gmra.mrb[28].mxu0 %v590_v57 }
 0x1cb   : > { %v3487_v62 = vpop.f32.mrb[0].mxu0 }
 0x1cc   : > { %v705_v63 = vadd.f32 %v3487_v62, %v4674_v61  ;;  %v696_v0 = vpop.f32.mrb[1].mxu0 }
 0x1cd   : > { %v697_v1 = vadd.f32 %v4674_v61, %v696_v0  ;;  %v3488_v2 = vpop.f32.mrb[2].mxu0 }
 0x1ce   : > { %v708_v3 = vadd.f32 %v3488_v2, %v4674_v61  ;;  %v699_v4 = vpop.f32.mrb[3].mxu0  ;;  %v825_v6 = vmax.f32 %v705_v63, 0.0  ;;  %v3759_v63 = vld [vmem:[#allocation10 + $0x64] ss:$8 sps:$4 sm:$0xff]  }
 0x1cf   : > { %v700_v5 = vadd.f32 %v4674_v61, %v699_v4  ;;  %v823_v8 = vmax.f32 %v697_v1, 0.0  ;;  %v3757_v4 = vld [vmem:[#allocation10 + $0x60] ss:$8 sps:$4 sm:$0xff]  }
 0x1d0   : > { %v826_v7 = vmax.f32 %v708_v3, 0.0 }
 0x1d1   : > { %v824_v9 = vmax.f32 %v700_v5, 0.0 }
 0x1d2   : > { %v856_v10 = vpack.c.bf16 %v826_v7, %v825_v6 }
 0x1d3   : > { %v3491_v11 = vpop.f32.mrb[4].mxu0  ;;  %v855_v12 = vpack.c.bf16 %v824_v9, %v823_v8 }
 0x1d4   : > { %v721_v14 = vadd.f32 %v3491_v11, %v4674_v61  ;;  %v712_v15 = vpop.f32.mrb[5].mxu0 }
 0x1d5   : > { %v713_v17 = vadd.f32 %v4674_v61, %v712_v15  ;;  %3525 = vmatprep.mubr.msk.bf16.mxu1 %vm910_vm0, %v855_v12  ;;  %v3492_v18 = vpop.f32.mrb[6].mxu0 }
 0x1d6   : > { %v829_v19 = vmax.f32 %v721_v14, 0.0  ;;  %v724_v20 = vadd.f32 %v3492_v18, %v4674_v61  ;;  %3526 = vmatmul.mubr.msk.bf16.vlgmr.msra.gmra.mrb[0].mxu1 %vm910_vm0, %v856_v10  ;;  %v715_v21 = vpop.f32.mrb[7].mxu0 }
 0x1d7   : > { %v827_v22 = vmax.f32 %v713_v17, 0.0  ;;  %v716_v23 = vadd.f32 %v4674_v61, %v715_v21  ;;  %1277 = vmatpush1.bf16.msra.mxu1 %v3739_v13 }
 0x1d8   : > { %v830_v25 = vmax.f32 %v724_v20, 0.0  ;;  %1278 = vmatprep.subr.bf16.mxu1 %v3744_v16 }
 0x1d9   : > { %v828_v27 = vmax.f32 %v716_v23, 0.0 }
 0x1da   : > { %v858_v28 = vpack.c.bf16 %v830_v25, %v829_v19 }
 0x1db   : > { %v857_v29 = vpack.c.bf16 %v828_v27, %v827_v22  ;;  %v3495_v30 = vpop.f32.mrb[8].mxu0  ;;  %1279 = vmatpush1.bf16.msra.mxu1 %v3742_v24 }
 0x1dc   : > { %v737_v32 = vadd.f32 %v3495_v30, %v4674_v61  ;;  %v728_v33 = vpop.f32.mrb[9].mxu0  ;;  %1280 = vmatprep.subr.bf16.mxu1 %v3747_v26 }
 0x1dd   : > { %3529 = vmatprep.mubr.msk.bf16.mxu1 %vm910_vm0, %v857_v29  ;;  %v729_v35 = vadd.f32 %v4674_v61, %v728_v33  ;;  %v3496_v36 = vpop.f32.mrb[10].mxu0 }
 0x1de   : > { %3530 = vmatmul.mubr.msk.bf16.gmra.mrb[4].mxu1 %vm910_vm0, %v858_v28  ;;  %v833_v37 = vmax.f32 %v737_v32, 0.0  ;;  %v740_v38 = vadd.f32 %v3496_v36, %v4674_v61  ;;  %v731_v39 = vpop.f32.mrb[11].mxu0 }
 0x1df   : > { %v831_v40 = vmax.f32 %v729_v35, 0.0  ;;  %v732_v41 = vadd.f32 %v4674_v61, %v731_v39  ;;  %1281 = vmatpush1.bf16.msra.mxu1 %v3745_v31 }
 0x1e0   : > { %v834_v43 = vmax.f32 %v740_v38, 0.0  ;;  %1282 = vmatprep.subr.bf16.mxu1 %v3750_v34 }
 0x1e1   : > { %v832_v45 = vmax.f32 %v732_v41, 0.0 }
 0x1e2   : > { %v860_v46 = vpack.c.bf16 %v834_v43, %v833_v37 }
 0x1e3   : > { %v859_v47 = vpack.c.bf16 %v832_v45, %v831_v40  ;;  %v3499_v48 = vpop.f32.mrb[12].mxu0  ;;  %1283 = vmatpush1.bf16.msra.mxu1 %v3748_v42 }
 0x1e4   : > { %v753_v50 = vadd.f32 %v3499_v48, %v4674_v61  ;;  %v744_v51 = vpop.f32.mrb[13].mxu0  ;;  %1284 = vmatprep.subr.bf16.mxu1 %v3753_v44 }
 0x1e5   : > { %3533 = vmatprep.mubr.msk.bf16.mxu1 %vm910_vm0, %v859_v47  ;;  %v745_v53 = vadd.f32 %v4674_v61, %v744_v51  ;;  %v3500_v54 = vpop.f32.mrb[14].mxu0 }
 0x1e6   : > { %3534 = vmatmul.mubr.msk.bf16.gmra.mrb[8].mxu1 %vm910_vm0, %v860_v46  ;;  %v837_v55 = vmax.f32 %v753_v50, 0.0  ;;  %v756_v56 = vadd.f32 %v3500_v54, %v4674_v61  ;;  %v747_v57 = vpop.f32.mrb[15].mxu0 }
 0x1e7   : > { %v835_v58 = vmax.f32 %v745_v53, 0.0  ;;  %v748_v59 = vadd.f32 %v4674_v61, %v747_v57  ;;  %1285 = vmatpush1.bf16.msra.mxu1 %v3751_v49 }
 0x1e8   : > { %v838_v62 = vmax.f32 %v756_v56, 0.0  ;;  %1286 = vmatprep.subr.bf16.mxu1 %v3756_v52 }
 0x1e9   : > { %v836_v0 = vmax.f32 %v748_v59, 0.0 }
 0x1ea   : > { %v862_v1 = vpack.c.bf16 %v838_v62, %v837_v55  ;;  %v3762_v62 = vld [vmem:[#allocation10 + $0x74] ss:$8 sps:$4 sm:$0xff]  }
 0x1eb   : > { %v861_v2 = vpack.c.bf16 %v836_v0, %v835_v58  ;;  %v3503_v3 = vpop.f32.mrb[16].mxu0  ;;  %1287 = vmatpush1.bf16.msra.mxu1 %v3754_v60  ;;  %v3760_v60 = vld [vmem:[#allocation10 + $0x70] ss:$8 sps:$4 sm:$0xff]   ;;  %v4725_v0 = vld [vmem:[#allocation8] ss:$0 sm:$0xff] }
 0x1ec   : > { %v769_v5 = vadd.f32 %v3503_v3, %v4674_v61  ;;  %v760_v6 = vpop.f32.mrb[17].mxu0  ;;  %1288 = vmatprep.subr.bf16.mxu1 %v3759_v63  ;;  %v4248_v63 = vmov 0  }
 0x1ed   : > { %3537 = vmatprep.mubr.msk.bf16.mxu1 %vm910_vm0, %v861_v2  ;;  %v761_v7 = vadd.f32 %v4674_v61, %v760_v6  ;;  %v3504_v8 = vpop.f32.mrb[18].mxu0  ;;  %v3765_v6 = vld [vmem:[%s5593_s7 + $0x4] ss:$8 sps:$4 sm:$0xff]  }
 0x1ee   : > { %3538 = vmatmul.mubr.msk.bf16.gmra.mrb[12].mxu1 %vm910_vm0, %v862_v1  ;;  %v841_v9 = vmax.f32 %v769_v5, 0.0  ;;  %v772_v10 = vadd.f32 %v3504_v8, %v4674_v61  ;;  %v763_v11 = vpop.f32.mrb[19].mxu0  ;;  %v3763_v5 = vld [vmem:[%s5593_s7] ss:$8 sps:$4 sm:$0xff]   ;;  %1769 = vmatprep.subr.bf16.mxu0 %v3765_v6  ;;  %v3784_v6 = vld [vmem:[%s5593_s7 + $0x70] ss:$8 sps:$4 sm:$0xff]  }
 0x1ef   : > { %v839_v12 = vmax.f32 %v761_v7, 0.0  ;;  %v764_v13 = vadd.f32 %v4674_v61, %v763_v11  ;;  %1289 = vmatpush1.bf16.msra.mxu1 %v3757_v4  ;;  %1770 = vmatpush1.bf16.msra.mxu0 %v3763_v5 }
 0x1f0   : > { %v842_v14 = vmax.f32 %v772_v10, 0.0  ;;  %1290 = vmatprep.subr.bf16.mxu1 %v3762_v62  ;;  %v3786_v62 = vld [vmem:[%s5593_s7 + $0x74] ss:$8 sps:$4 sm:$0xff]  }
 0x1f1   : > { %v840_v15 = vmax.f32 %v764_v13, 0.0  ;;  %v3766_v13 = vld [vmem:[%s5593_s7 + $0x10] ss:$8 sps:$4 sm:$0xff]  }
 0x1f2   : > { %v864_v16 = vpack.c.bf16 %v842_v14, %v841_v9  ;;  %v3768_v9 = vld [vmem:[%s5593_s7 + $0x14] ss:$8 sps:$4 sm:$0xff]  }
 0x1f3   : > { %v863_v17 = vpack.c.bf16 %v840_v15, %v839_v12  ;;  %v3507_v18 = vpop.f32.mrb[20].mxu0  ;;  %1291 = vmatpush1.bf16.msra.mxu1 %v3760_v60  ;;  %1771 = vmatprep.subr.bf16.mxu0 %v3768_v9 }
 0x1f4   : > { %v785_v19 = vadd.f32 %v3507_v18, %v4674_v61  ;;  %v776_v20 = vpop.f32.mrb[21].mxu0  ;;  %1772 = vmatpush1.bf16.msra.mxu0 %v3766_v13 }
 0x1f5   : > { %3541 = vmatprep.mubr.msk.bf16.mxu1 %vm910_vm0, %v863_v17  ;;  %v777_v21 = vadd.f32 %v4674_v61, %v776_v20  ;;  %v3508_v22 = vpop.f32.mrb[22].mxu0 }
 0x1f6   : > { %3542 = vmatmul.mubr.msk.bf16.gmra.mrb[16].mxu1 %vm910_vm0, %v864_v16  ;;  %v845_v23 = vmax.f32 %v785_v19, 0.0  ;;  %v788_v24 = vadd.f32 %v3508_v22, %v4674_v61  ;;  %v779_v25 = vpop.f32.mrb[23].mxu0  ;;  %v3771_v16 = vld [vmem:[%s5593_s7 + $0x24] ss:$8 sps:$4 sm:$0xff]   ;;  %v3769_v22 = vld [vmem:[%s5593_s7 + $0x20] ss:$8 sps:$4 sm:$0xff]  }
 0x1f7   : > { %v843_v26 = vmax.f32 %v777_v21, 0.0  ;;  %v780_v27 = vadd.f32 %v4674_v61, %v779_v25  ;;  %1773 = vmatprep.subr.bf16.mxu0 %v3771_v16  ;;  %v3774_v25 = vld [vmem:[%s5593_s7 + $0x34] ss:$8 sps:$4 sm:$0xff]  }
 0x1f8   : > { %v846_v28 = vmax.f32 %v788_v24, 0.0  ;;  %1774 = vmatpush1.bf16.msra.mxu0 %v3769_v22 }
 0x1f9   : > { %v844_v29 = vmax.f32 %v780_v27, 0.0  ;;  %1775 = vmatprep.subr.bf16.mxu0 %v3774_v25 }
 0x1fa   : > { %v866_v30 = vpack.c.bf16 %v846_v28, %v845_v23 }
 0x1fb   : > { %v865_v31 = vpack.c.bf16 %v844_v29, %v843_v26  ;;  %v3511_v32 = vpop.f32.mrb[24].mxu0 }
 0x1fc   : > { %v801_v33 = vadd.f32 %v3511_v32, %v4674_v61  ;;  %v792_v34 = vpop.f32.mrb[25].mxu0  ;;  %v3772_v32 = vld [vmem:[%s5593_s7 + $0x30] ss:$8 sps:$4 sm:$0xff]  }
 0x1fd   : > { %3545 = vmatprep.mubr.msk.bf16.mxu1 %vm910_vm0, %v865_v31  ;;  %v793_v35 = vadd.f32 %v4674_v61, %v792_v34  ;;  %v3512_v36 = vpop.f32.mrb[26].mxu0  ;;  %v3777_v34 = vld [vmem:[%s5593_s7 + $0x44] ss:$8 sps:$4 sm:$0xff]   ;;  %1776 = vmatpush1.bf16.msra.mxu0 %v3772_v32  ;;  %v3793_v32 = vld [vmem:[%s5593_s7 + $0xa0] ss:$8 sps:$4 sm:$0xff]  }
 0x1fe   : > { %3546 = vmatmul.mubr.msk.bf16.gmra.mrb[20].mxu1 %vm910_vm0, %v866_v30  ;;  %v849_v37 = vmax.f32 %v801_v33, 0.0  ;;  %v804_v38 = vadd.f32 %v3512_v36, %v4674_v61  ;;  %v795_v39 = vpop.f32.mrb[27].mxu0  ;;  %1777 = vmatprep.subr.bf16.mxu0 %v3777_v34 }
 0x1ff   : > { %v847_v40 = vmax.f32 %v793_v35, 0.0  ;;  %v796_v41 = vadd.f32 %v4674_v61, %v795_v39 }
 0x200   : > { %v850_v42 = vmax.f32 %v804_v38, 0.0 }
 0x201   : > { %v848_v43 = vmax.f32 %v796_v41, 0.0 }
 0x202   : > { %v868_v44 = vpack.c.bf16 %v850_v42, %v849_v37 }
 0x203   : > { %v867_v45 = vpack.c.bf16 %v848_v43, %v847_v40  ;;  %v3515_v46 = vpop.f32.mrb[28].mxu0  ;;  %v3775_v40 = vld [vmem:[%s5593_s7 + $0x40] ss:$8 sps:$4 sm:$0xff]   ;;  %v3780_v43 = vld [vmem:[%s5593_s7 + $0x54] ss:$8 sps:$4 sm:$0xff]  }
 0x204   : > { %v817_v47 = vadd.f32 %v3515_v46, %v4674_v61  ;;  %v808_v48 = vpop.f32.mrb[29].mxu0  ;;  %1778 = vmatpush1.bf16.msra.mxu0 %v3775_v40 }
 0x205   : > { %3549 = vmatprep.mubr.msk.bf16.mxu1 %vm910_vm0, %v867_v45  ;;  %v809_v49 = vadd.f32 %v4674_v61, %v808_v48  ;;  %v3516_v50 = vpop.f32.mrb[30].mxu0  ;;  %1779 = vmatprep.subr.bf16.mxu0 %v3780_v43 }
 0x206   : > { %3550 = vmatmul.mubr.msk.bf16.gmra.mrb[24].mxu1 %vm910_vm0, %v868_v44  ;;  %v853_v51 = vmax.f32 %v817_v47, 0.0  ;;  %v820_v52 = vadd.f32 %v3516_v50, %v4674_v61  ;;  %v811_v53 = vpop.f32.mrb[31].mxu0  ;;  %v3778_v50 = vld [vmem:[%s5593_s7 + $0x50] ss:$8 sps:$4 sm:$0xff]  }
 0x207   : > { %v851_v54 = vmax.f32 %v809_v49, 0.0  ;;  %v812_v55 = vadd.f32 %v4674_v61, %v811_v53 }
 0x208   : > { %v854_v56 = vmax.f32 %v820_v52, 0.0  ;;  %v3783_v52 = vld [vmem:[%s5593_s7 + $0x64] ss:$8 sps:$4 sm:$0xff]   ;;  %1780 = vmatpush1.bf16.msra.mxu0 %v3778_v50  ;;  %v3799_v50 = vld [vmem:[%s5593_s7 + $0xc0] ss:$8 sps:$4 sm:$0xff]  }
 0x209   : > { %v852_v57 = vmax.f32 %v812_v55, 0.0  ;;  %1781 = vmatprep.subr.bf16.mxu0 %v3783_v52 }
 0x20a   : > { %v870_v58 = vpack.c.bf16 %v854_v56, %v853_v51 }
 0x20b   : > { %v869_v59 = vpack.c.bf16 %v852_v57, %v851_v54 }
 0x20d   : > { %3553 = vmatprep.mubr.msk.bf16.mxu1 %vm910_vm0, %v869_v59 }
 0x20e   : > { %3554 = vmatmul.mubr.msk.bf16.gmra.mrb[28].mxu1 %vm910_vm0, %v870_v58  ;;  %v3781_v58 = vld [vmem:[%s5593_s7 + $0x60] ss:$8 sps:$4 sm:$0xff]  }
 0x20f   : > { %1308 = vmatprep.mubr.bf16.mxu1 %v4248_v63  ;;  %1782 = vmatpush1.bf16.msra.mxu0 %v3781_v58 }
 0x210   : > { %1783 = vmatprep.subr.bf16.mxu0 %v3786_v62 }
 0x213   : > { %1784 = vmatpush1.bf16.msra.mxu0 %v3784_v6 }
 0x2a9   : > { %v3527_v1 = vpop.f32.mrb[0].mxu1 }
 0x2aa   : > { %v1002_v61 = vadd.f32 %v3527_v1, %v4725_v0  ;;  %v993_v2 = vpop.f32.mrb[1].mxu1 }
 0x2ab   : > { %v994_v3 = vadd.f32 %v4725_v0, %v993_v2  ;;  %v3528_v4 = vpop.f32.mrb[2].mxu1 }
 0x2ac   : > { %v1005_v7 = vadd.f32 %v3528_v4, %v4725_v0  ;;  %v996_v8 = vpop.f32.mrb[3].mxu1  ;;  %v1122_v11 = vmax.f32 %v1002_v61, 0.0 }
 0x2ad   : > { %v997_v10 = vadd.f32 %v4725_v0, %v996_v8  ;;  %v1120_v14 = vmax.f32 %v994_v3, 0.0  ;;  %v3789_v8 = vld [vmem:[%s5593_s7 + $0x84] ss:$8 sps:$4 sm:$0xff]  }
 0x2ae   : > { %v1123_v12 = vmax.f32 %v1005_v7, 0.0  ;;  %1785 = vmatprep.subr.bf16.mxu0 %v3789_v8 }
 0x2af   : > { %v1121_v15 = vmax.f32 %v997_v10, 0.0 }
 0x2b0   : > { %v1153_v17 = vpack.c.bf16 %v1123_v12, %v1122_v11 }
 0x2b1   : > { %v1152_v18 = vpack.c.bf16 %v1121_v15, %v1120_v14  ;;  %v3531_v19 = vpop.f32.mrb[4].mxu1  ;;  %v3787_v14 = vld [vmem:[%s5593_s7 + $0x80] ss:$8 sps:$4 sm:$0xff]  }
 0x2b2   : > { %v1018_v20 = vadd.f32 %v3531_v19, %v4725_v0  ;;  %v1009_v21 = vpop.f32.mrb[5].mxu1  ;;  %1786 = vmatpush1.bf16.msra.mxu0 %v3787_v14 }
 0x2b3   : > { %v1010_v23 = vadd.f32 %v4725_v0, %v1009_v21  ;;  %1309 = vmatmul.mubr.bf16.vlgmr.msra.gmra.mrb[32].mxu1 %v1152_v18  ;;  %v3532_v24 = vpop.f32.mrb[6].mxu1 }
 0x2b4   : > { %v1126_v26 = vmax.f32 %v1018_v20, 0.0  ;;  %v1021_v27 = vadd.f32 %v3532_v24, %v4725_v0  ;;  %v1012_v28 = vpop.f32.mrb[7].mxu1  ;;  %1318 = vmatprep.mubr.bf16.mxu1 %v4248_v63  ;;  %v3790_v24 = vld [vmem:[%s5593_s7 + $0x90] ss:$8 sps:$4 sm:$0xff]  }
 0x2b5   : > { %v1124_v29 = vmax.f32 %v1010_v23, 0.0  ;;  %v1013_v30 = vadd.f32 %v4725_v0, %v1012_v28 }
 0x2b6   : > { %v1127_v31 = vmax.f32 %v1021_v27, 0.0 }
 0x2b7   : > { %v1125_v33 = vmax.f32 %v1013_v30, 0.0 }
 0x2b8   : > { %v1155_v35 = vpack.c.bf16 %v1127_v31, %v1126_v26  ;;  %v3795_v26 = vld [vmem:[%s5593_s7 + $0xa4] ss:$8 sps:$4 sm:$0xff]  }
 0x2b9   : > { %v1154_v36 = vpack.c.bf16 %v1125_v33, %v1124_v29  ;;  %v3535_v37 = vpop.f32.mrb[8].mxu1 }
 0x2ba   : > { %v1034_v38 = vadd.f32 %v3535_v37, %v4725_v0  ;;  %v1025_v39 = vpop.f32.mrb[9].mxu1 }
 0x2bb   : > { %1319 = vmatmul.mubr.bf16.gmra.mrb[36].mxu1 %v1153_v17  ;;  %v1026_v41 = vadd.f32 %v4725_v0, %v1025_v39  ;;  %v3536_v42 = vpop.f32.mrb[10].mxu1  ;;  %v3792_v17 = vld [vmem:[%s5593_s7 + $0x94] ss:$8 sps:$4 sm:$0xff]  }
 0x2bc   : > { %v1130_v44 = vmax.f32 %v1034_v38, 0.0  ;;  %1328 = vmatprep.mubr.bf16.mxu1 %v4248_v63  ;;  %v1037_v45 = vadd.f32 %v3536_v42, %v4725_v0  ;;  %v1028_v46 = vpop.f32.mrb[11].mxu1  ;;  %1787 = vmatprep.subr.bf16.mxu0 %v3792_v17  ;;  %v3796_v42 = vld [vmem:[%s5593_s7 + $0xb0] ss:$8 sps:$4 sm:$0xff]  }
 0x2bd   : > { %v1128_v47 = vmax.f32 %v1026_v41, 0.0  ;;  %v1029_v48 = vadd.f32 %v4725_v0, %v1028_v46  ;;  %1788 = vmatpush1.bf16.msra.mxu0 %v3790_v24 }
 0x2be   : > { %v1131_v49 = vmax.f32 %v1037_v45, 0.0  ;;  %1789 = vmatprep.subr.bf16.mxu0 %v3795_v26  ;;  %v3811_v26 = vld [vmem:[%s5635_s19 + $0x40] sm:$0xff]  }
 0x2bf   : > { %v1129_v51 = vmax.f32 %v1029_v48, 0.0  ;;  %3597 = vmatprep.subr.bf16.mxu1 %v3811_v26 }
 0x2c0   : > { %v4780_v53 = vpack.c.bf16 %v1131_v49, %v1130_v44  ;;  %v3801_v44 = vld [vmem:[%s5593_s7 + $0xc4] ss:$8 sps:$4 sm:$0xff]  }
 0x2c1   : > { %v1156_v54 = vpack.c.bf16 %v1129_v51, %v1128_v47  ;;  %v3539_v55 = vpop.f32.mrb[12].mxu1  ;;  %1790 = vmatpush1.bf16.msra.mxu0 %v3793_v32 }
 0x2c2   : > { %v1050_v56 = vadd.f32 %v3539_v55, %v4725_v0  ;;  %v1041_v57 = vpop.f32.mrb[13].mxu1 }
 0x2c3   : > { %1329 = vmatmul.mubr.bf16.gmra.mrb[40].mxu1 %v1154_v36  ;;  %v1042_v59 = vadd.f32 %v4725_v0, %v1041_v57  ;;  %v3540_v60 = vpop.f32.mrb[14].mxu1 }
 0x2c4   : > { %1338 = vmatprep.mubr.bf16.mxu1 %v4248_v63  ;;  %v1134_v1 = vmax.f32 %v1050_v56, 0.0  ;;  %v1053_v61 = vadd.f32 %v3540_v60, %v4725_v0  ;;  %v1044_v2 = vpop.f32.mrb[15].mxu1 }
 0x2c5   : > { %v1132_v3 = vmax.f32 %v1042_v59, 0.0  ;;  %v1045_v4 = vadd.f32 %v4725_v0, %v1044_v2 }
 0x2c6   : > { %v1135_v5 = vmax.f32 %v1053_v61, 0.0 }
 0x2c7   : > { %v1133_v7 = vmax.f32 %v1045_v4, 0.0 }
 0x2c8   : > { %v4799_v9 = vpack.c.bf16 %v1135_v5, %v1134_v1 }
 0x2c9   : > { %v4801_v10 = vpack.c.bf16 %v1133_v7, %v1132_v3  ;;  %v3543_v11 = vpop.f32.mrb[16].mxu1 }
 0x2ca   : > { %v1066_v12 = vadd.f32 %v3543_v11, %v4725_v0  ;;  %v1057_v13 = vpop.f32.mrb[17].mxu1 }
 0x2cb   : > { %1339 = vmatmul.mubr.bf16.gmra.mrb[44].mxu1 %v1155_v35  ;;  %v1058_v15 = vadd.f32 %v4725_v0, %v1057_v13  ;;  %v3544_v16 = vpop.f32.mrb[18].mxu1  ;;  %v3798_v35 = vld [vmem:[%s5593_s7 + $0xb4] ss:$8 sps:$4 sm:$0xff]  }
 0x2cc   : > { %1348 = vmatprep.mubr.bf16.mxu1 %v4248_v63  ;;  %v1138_v18 = vmax.f32 %v1066_v12, 0.0  ;;  %v1069_v19 = vadd.f32 %v3544_v16, %v4725_v0  ;;  %v1060_v20 = vpop.f32.mrb[19].mxu1  ;;  %1791 = vmatprep.subr.bf16.mxu0 %v3798_v35 }
 0x2cd   : > { %v1136_v21 = vmax.f32 %v1058_v15, 0.0  ;;  %v1061_v22 = vadd.f32 %v4725_v0, %v1060_v20  ;;  %1792 = vmatpush1.bf16.msra.mxu0 %v3796_v42 }
 0x2ce   : > { %v1139_v23 = vmax.f32 %v1069_v19, 0.0  ;;  %1793 = vmatprep.subr.bf16.mxu0 %v3801_v44  ;;  %v1186_v19 = vlaneseq }
 0x2cf   : > { %v1137_v25 = vmax.f32 %v1061_v22, 0.0  ;;  %v1184_v22 = vld [vmem:[%s5592_s6] sm:$0x3] }
 0x2d0   : > { %v4820_v27 = vpack.c.bf16 %v1139_v23, %v1138_v18  ;;  %v3808_v18 = vld [vmem:[%s5593_s7 + $0xf0] ss:$8 sps:$4 sm:$0xff]   ;;  %v4886_v20 = vshrl.u32 %v1186_v19, 7 }
 0x2d1   : > { %v4822_v28 = vpack.c.bf16 %v1137_v25, %v1136_v21  ;;  %v3547_v29 = vpop.f32.mrb[20].mxu1  ;;  %1794 = vmatpush1.bf16.msra.mxu0 %v3799_v50  ;;  %v3817_v50 = vld [vmem:[%s5635_s19 + $0x58] sm:$0xff]  }
 0x2d2   : > { %v1082_v30 = vadd.f32 %v3547_v29, %v4725_v0  ;;  %v1073_v31 = vpop.f32.mrb[21].mxu1  ;;  %v1188_v21 = vsub.s32 0, %v4886_v20  ;;  %v1192_v23 = vsub.s32 1, %v4886_v20  ;;  %v3812_v29 = vld [vmem:[%s5635_s19] sm:$0xff]  }
 0x2d3   : > { %1349 = vmatmul.mubr.bf16.gmra.mrb[48].mxu1 %v1156_v54  ;;  %v1074_v33 = vadd.f32 %v4725_v0, %v1073_v31  ;;  %v3548_v34 = vpop.f32.mrb[22].mxu1  ;;  %v3804_v54 = vld [vmem:[%s5593_s7 + $0xd4] ss:$8 sps:$4 sm:$0xff]  }
 0x2d4   : > { %1358 = vmatprep.mubr.bf16.mxu1 %v4248_v63  ;;  %v1142_v36 = vmax.f32 %v1082_v30, 0.0  ;;  %v1085_v37 = vadd.f32 %v3548_v34, %v4725_v0  ;;  %v1076_v38 = vpop.f32.mrb[23].mxu1  ;;  %1795 = vmatprep.subr.bf16.mxu0 %v3804_v54  ;;  %v4895_v24 = vrot.slane %v1184_v22, %v1188_v21  ;;  %v3813_v34 = vld [vmem:[%s5635_s19 + $0x48] sm:$0xff]  }
 0x2d5   : > { %v1140_v39 = vmax.f32 %v1074_v33, 0.0  ;;  %v1077_v40 = vadd.f32 %v4725_v0, %v1076_v38  ;;  %3605 = vmatpush3.bf16.msra.mxu1 %v3812_v29  ;;  %v3814_v38 = vld [vmem:[%s5635_s19 + $0x8] sm:$0xff]  }
 0x2d6   : > { %v1143_v41 = vmax.f32 %v1085_v37, 0.0  ;;  %3598 = vmatprep.subr.bf16.mxu1 %v3813_v34 }
 0x2d7   : > { %v1141_v43 = vmax.f32 %v1077_v40, 0.0 }
 0x2d8   : > { %v1163_v45 = vpack.c.bf16 %v1143_v41, %v1142_v36  ;;  %v3815_v41 = vld [vmem:[%s5635_s19 + $0x50] sm:$0xff]  }
 0x2d9   : > { %v1162_v46 = vpack.c.bf16 %v1141_v43, %v1140_v39  ;;  %v3551_v47 = vpop.f32.mrb[24].mxu1  ;;  %3606 = vmatpush3.bf16.msra.mxu1 %v3814_v38 }
 0x2da   : > { %v1098_v48 = vadd.f32 %v3551_v47, %v4725_v0  ;;  %v1089_v49 = vpop.f32.mrb[25].mxu1  ;;  %3599 = vmatprep.subr.bf16.mxu1 %v3815_v41  ;;  %v3816_v47 = vld [vmem:[%s5635_s19 + $0x10] sm:$0xff]  }
 0x2db   : > { %1359 = vmatmul.mubr.bf16.gmra.mrb[52].mxu1 %v4780_v53  ;;  %v1090_v51 = vadd.f32 %v4725_v0, %v1089_v49  ;;  %v3552_v52 = vpop.f32.mrb[26].mxu1  ;;  %v3802_v53 = vld [vmem:[%s5593_s7 + $0xd0] ss:$8 sps:$4 sm:$0xff]  }
 0x2dc   : > { %1368 = vmatprep.mubr.bf16.mxu1 %v4248_v63  ;;  %v1146_v55 = vmax.f32 %v1098_v48, 0.0  ;;  %v1101_v56 = vadd.f32 %v3552_v52, %v4725_v0  ;;  %v1092_v57 = vpop.f32.mrb[27].mxu1  ;;  %1796 = vmatpush1.bf16.msra.mxu0 %v3802_v53 }
 0x2dd   : > { %v1144_v58 = vmax.f32 %v1090_v51, 0.0  ;;  %v1093_v59 = vadd.f32 %v4725_v0, %v1092_v57  ;;  %3607 = vmatpush3.bf16.msra.mxu1 %v3816_v47  ;;  %v3818_v57 = vld [vmem:[%s5635_s19 + $0x18] sm:$0xff]  }
 0x2de   : > { %v1147_v60 = vmax.f32 %v1101_v56, 0.0  ;;  %3600 = vmatprep.subr.bf16.mxu1 %v3817_v50 }
 0x2df   : > { %v1145_v62 = vmax.f32 %v1093_v59, 0.0 }
 0x2e0   : > { %v1165_v1 = vpack.c.bf16 %v1147_v60, %v1146_v55  ;;  %v3819_v60 = vld [vmem:[%s5635_s19 + $0x60] sm:$0xff]  }
 0x2e1   : > { %v1164_v61 = vpack.c.bf16 %v1145_v62, %v1144_v58  ;;  %v3555_v2 = vpop.f32.mrb[28].mxu1  ;;  %3608 = vmatpush3.bf16.msra.mxu1 %v3818_v57 }
 0x2e2   : > { %v1114_v3 = vadd.f32 %v3555_v2, %v4725_v0  ;;  %v1105_v4 = vpop.f32.mrb[29].mxu1  ;;  %3601 = vmatprep.subr.bf16.mxu1 %v3819_v60 }
 0x2e3   : > { %1369 = vmatmul.mubr.bf16.gmra.mrb[56].mxu1 %v4801_v10  ;;  %v1106_v5 = vadd.f32 %v4725_v0, %v1105_v4  ;;  %v3556_v6 = vpop.f32.mrb[30].mxu1  ;;  %v3810_v10 = vld [vmem:[%s5593_s7 + $0xf4] ss:$8 sps:$4 sm:$0xff]  }
 0x2e4   : > { %1378 = vmatprep.mubr.bf16.mxu1 %v4248_v63  ;;  %v1150_v7 = vmax.f32 %v1114_v3, 0.0  ;;  %v1117_v8 = vadd.f32 %v3556_v6, %v4725_v0  ;;  %v1108_v11 = vpop.f32.mrb[31].mxu1  ;;  %v3820_v3 = vld [vmem:[%s5635_s19 + $0x20] sm:$0xff]   ;;  %v3821_v6 = vld [vmem:[%s5635_s19 + $0x68] sm:$0xff]  }
 0x2e5   : > { %v1148_v12 = vmax.f32 %v1106_v5, 0.0  ;;  %v1109_v13 = vadd.f32 %v4725_v0, %v1108_v11  ;;  %v3807_v0 = vld [vmem:[%s5593_s7 + $0xe4] ss:$8 sps:$4 sm:$0xff]   ;;  %3609 = vmatpush3.bf16.msra.mxu1 %v3820_v3 }
 0x2e6   : > { %v1151_v14 = vmax.f32 %v1117_v8, 0.0  ;;  %1797 = vmatprep.subr.bf16.mxu0 %v3807_v0  ;;  %3602 = vmatprep.subr.bf16.mxu1 %v3821_v6 }
 0x2e7   : > { %v1149_v15 = vmax.f32 %v1109_v13, 0.0 }
 0x2e8   : > { %v1167_v16 = vpack.c.bf16 %v1151_v14, %v1150_v7  ;;  %v3822_v14 = vld [vmem:[%s5635_s19 + $0x28] sm:$0xff]  }
 0x2e9   : > { %v1166_v17 = vpack.c.bf16 %v1149_v15, %v1148_v12  ;;  %3610 = vmatpush3.bf16.msra.mxu1 %v3822_v14 }
 0x2eb   : > { %1379 = vmatmul.mubr.bf16.gmra.mrb[60].mxu1 %v4799_v9  ;;  %v3805_v9 = vld [vmem:[%s5593_s7 + $0xe0] ss:$8 sps:$4 sm:$0xff]  }
 0x2ec   : > { %1388 = vmatprep.mubr.bf16.mxu1 %v4248_v63  ;;  %1798 = vmatpush1.bf16.msra.mxu0 %v3805_v9 }
 0x2ed   : > { %1799 = vmatprep.subr.bf16.mxu0 %v3810_v10 }
 0x2f0   : > { %1800 = vmatpush1.bf16.msra.mxu0 %v3808_v18 }
 0x2f1   : > { %3337 = vmatprep.subr.bf16.mxu0 %v3811_v26 }
 0x2f3   : > { %1389 = vmatmul.mubr.bf16.gmra.mrb[64].mxu1 %v4822_v28 }
 0x2f4   : > { %1398 = vmatprep.mubr.bf16.mxu1 %v4248_v63 }
 0x2fb   : > { %1399 = vmatmul.mubr.bf16.gmra.mrb[68].mxu1 %v4820_v27 }
 0x2fc   : > { %1408 = vmatprep.mubr.bf16.mxu1 %v4248_v63 }
 0x303   : > { %1409 = vmatmul.mubr.bf16.gmra.mrb[72].mxu1 %v1162_v46 }
 0x304   : > { %1418 = vmatprep.mubr.bf16.mxu1 %v4248_v63 }
 0x30b   : > { %1419 = vmatmul.mubr.bf16.gmra.mrb[76].mxu1 %v1163_v45 }
 0x30c   : > { %1428 = vmatprep.mubr.bf16.mxu1 %v4248_v63 }
 0x313   : > { %1429 = vmatmul.mubr.bf16.gmra.mrb[80].mxu1 %v1164_v61 }
 0x314   : > { %1438 = vmatprep.mubr.bf16.mxu1 %v4248_v63 }
 0x31b   : > { %1439 = vmatmul.mubr.bf16.gmra.mrb[84].mxu1 %v1165_v1 }
 0x31c   : > { %1448 = vmatprep.mubr.bf16.mxu1 %v4248_v63 }
 0x323   : > { %1449 = vmatmul.mubr.bf16.gmra.mrb[88].mxu1 %v1166_v17 }
 0x324   : > { %1458 = vmatprep.mubr.bf16.mxu1 %v4248_v63  ;;  %v4899_v63 = vrot.slane %v1184_v22, %v1192_v23 }
 0x32b   : > { %1459 = vmatmul.mubr.bf16.gmra.mrb[92].mxu1 %v1167_v16 }
 0x386   : > { %v1310_v25 = vpop.f32.mrb[32].mxu1 }
 0x387   : > { %v1311_v27 = vadd.f32 %v1310_v25, %v4895_v24  ;;  %v1312_v28 = vpop.f32.mrb[33].mxu1 }
 0x388   : > { %v1313_v30 = vadd.f32 %v1312_v28, %v4899_v63  ;;  %v1314_v31 = vpop.f32.mrb[34].mxu1 }
 0x389   : > { %v1315_v32 = vadd.f32 %v1314_v31, %v4895_v24  ;;  %v1316_v33 = vpop.f32.mrb[35].mxu1  ;;  %v1469_v36 = vmax.f32 %v1311_v27, 0.0 }
 0x38a   : > { %v1317_v35 = vadd.f32 %v1316_v33, %v4899_v63  ;;  %v1470_v39 = vmax.f32 %v1313_v30, 0.0 }
 0x38b   : > { %v1471_v37 = vmax.f32 %v1315_v32, 0.0 }
 0x38c   : > { %v1472_v40 = vmax.f32 %v1317_v35, 0.0 }
 0x38d   : > { %v1533_v42 = vpack.c.bf16 %v1471_v37, %v1469_v36 }
 0x38e   : > { %v1534_v43 = vpack.c.bf16 %v1472_v40, %v1470_v39  ;;  %v1320_v44 = vpop.f32.mrb[36].mxu1 }
 0x38f   : > { %v1321_v45 = vadd.f32 %v1320_v44, %v4895_v24  ;;  %v1322_v46 = vpop.f32.mrb[37].mxu1 }
 0x390   : > { %v1323_v48 = vadd.f32 %v1322_v46, %v4899_v63  ;;  %v1324_v49 = vpop.f32.mrb[38].mxu1  ;;  %1801 = vmatprep.mubr.bf16.mxu0 %v1534_v43 }
 0x391   : > { %v1325_v51 = vadd.f32 %v1324_v49, %v4895_v24  ;;  %v1326_v52 = vpop.f32.mrb[39].mxu1  ;;  %1802 = vmatmul.mubr.bf16.vlgmr.msra.gmra.mrb[32].mxu0 %v1533_v42  ;;  %v1473_v55 = vmax.f32 %v1321_v45, 0.0 }
 0x392   : > { %v1327_v54 = vadd.f32 %v1326_v52, %v4899_v63  ;;  %3338 = vmatpush3.bf16.msra.mxu0 %v3812_v29  ;;  %v1474_v58 = vmax.f32 %v1323_v48, 0.0 }
 0x393   : > { %v1475_v56 = vmax.f32 %v1325_v51, 0.0  ;;  %3339 = vmatprep.subr.bf16.mxu0 %v3813_v34 }
 0x394   : > { %v1476_v59 = vmax.f32 %v1327_v54, 0.0 }
 0x395   : > { %v1535_v53 = vpack.c.bf16 %v1475_v56, %v1473_v55 }
 0x396   : > { %v1536_v62 = vpack.c.bf16 %v1476_v59, %v1474_v58  ;;  %v1330_v1 = vpop.f32.mrb[40].mxu1  ;;  %3340 = vmatpush3.bf16.msra.mxu0 %v3814_v38 }
 0x397   : > { %v1331_v61 = vadd.f32 %v1330_v1, %v4895_v24  ;;  %v1332_v2 = vpop.f32.mrb[41].mxu1  ;;  %3341 = vmatprep.subr.bf16.mxu0 %v3815_v41 }
 0x398   : > { %v1333_v4 = vadd.f32 %v1332_v2, %v4899_v63  ;;  %v1334_v5 = vpop.f32.mrb[42].mxu1  ;;  %1811 = vmatprep.mubr.bf16.mxu0 %v1536_v62 }
 0x399   : > { %v1335_v7 = vadd.f32 %v1334_v5, %v4895_v24  ;;  %v1336_v8 = vpop.f32.mrb[43].mxu1  ;;  %1812 = vmatmul.mubr.bf16.gmra.mrb[36].mxu0 %v1535_v53  ;;  %v1477_v12 = vmax.f32 %v1331_v61, 0.0 }
 0x39a   : > { %v1337_v11 = vadd.f32 %v1336_v8, %v4899_v63  ;;  %3342 = vmatpush3.bf16.msra.mxu0 %v3816_v47  ;;  %v1478_v15 = vmax.f32 %v1333_v4, 0.0 }
 0x39b   : > { %v1479_v13 = vmax.f32 %v1335_v7, 0.0  ;;  %3343 = vmatprep.subr.bf16.mxu0 %v3817_v50 }
 0x39c   : > { %v1480_v16 = vmax.f32 %v1337_v11, 0.0 }
 0x39d   : > { %v1537_v17 = vpack.c.bf16 %v1479_v13, %v1477_v12 }
 0x39e   : > { %v1538_v0 = vpack.c.bf16 %v1480_v16, %v1478_v15  ;;  %v1340_v9 = vpop.f32.mrb[44].mxu1  ;;  %3344 = vmatpush3.bf16.msra.mxu0 %v3818_v57 }
 0x39f   : > { %v1341_v10 = vadd.f32 %v1340_v9, %v4895_v24  ;;  %v1342_v18 = vpop.f32.mrb[45].mxu1  ;;  %3345 = vmatprep.subr.bf16.mxu0 %v3819_v60 }
 0x3a0   : > { %v1343_v22 = vadd.f32 %v1342_v18, %v4899_v63  ;;  %v1344_v25 = vpop.f32.mrb[46].mxu1  ;;  %1821 = vmatprep.mubr.bf16.mxu0 %v1538_v0 }
 0x3a1   : > { %v1345_v26 = vadd.f32 %v1344_v25, %v4895_v24  ;;  %v1346_v27 = vpop.f32.mrb[47].mxu1  ;;  %1822 = vmatmul.mubr.bf16.gmra.mrb[40].mxu0 %v1537_v17  ;;  %v1481_v29 = vmax.f32 %v1341_v10, 0.0 }
 0x3a2   : > { %v1347_v28 = vadd.f32 %v1346_v27, %v4899_v63  ;;  %3346 = vmatpush3.bf16.msra.mxu0 %v3820_v3  ;;  %v1482_v31 = vmax.f32 %v1343_v22, 0.0 }
 0x3a3   : > { %v1483_v30 = vmax.f32 %v1345_v26, 0.0  ;;  %3347 = vmatprep.subr.bf16.mxu0 %v3821_v6 }
 0x3a4   : > { %v1484_v32 = vmax.f32 %v1347_v28, 0.0 }
 0x3a5   : > { %v1539_v33 = vpack.c.bf16 %v1483_v30, %v1481_v29 }
 0x3a6   : > { %v1540_v34 = vpack.c.bf16 %v1484_v32, %v1482_v31  ;;  %v1350_v35 = vpop.f32.mrb[48].mxu1  ;;  %3348 = vmatpush3.bf16.msra.mxu0 %v3822_v14 }
 0x3a7   : > { %v1351_v36 = vadd.f32 %v1350_v35, %v4895_v24  ;;  %v1352_v37 = vpop.f32.mrb[49].mxu1 }
 0x3a8   : > { %v1353_v38 = vadd.f32 %v1352_v37, %v4899_v63  ;;  %v1354_v39 = vpop.f32.mrb[50].mxu1  ;;  %1831 = vmatprep.mubr.bf16.mxu0 %v1540_v34 }
 0x3a9   : > { %v1355_v40 = vadd.f32 %v1354_v39, %v4895_v24  ;;  %v1356_v41 = vpop.f32.mrb[51].mxu1  ;;  %1832 = vmatmul.mubr.bf16.gmra.mrb[44].mxu0 %v1539_v33  ;;  %v1485_v43 = vmax.f32 %v1351_v36, 0.0 }
 0x3aa   : > { %v1357_v42 = vadd.f32 %v1356_v41, %v4899_v63  ;;  %v1486_v45 = vmax.f32 %v1353_v38, 0.0 }
 0x3ab   : > { %v1487_v44 = vmax.f32 %v1355_v40, 0.0 }
 0x3ac   : > { %v1488_v46 = vmax.f32 %v1357_v42, 0.0 }
 0x3ad   : > { %v1541_v47 = vpack.c.bf16 %v1487_v44, %v1485_v43 }
 0x3ae   : > { %v1542_v48 = vpack.c.bf16 %v1488_v46, %v1486_v45  ;;  %v1360_v49 = vpop.f32.mrb[52].mxu1 }
 0x3af   : > { %v1361_v50 = vadd.f32 %v1360_v49, %v4895_v24  ;;  %v1362_v51 = vpop.f32.mrb[53].mxu1 }
 0x3b0   : > { %v1363_v52 = vadd.f32 %v1362_v51, %v4899_v63  ;;  %v1364_v54 = vpop.f32.mrb[54].mxu1  ;;  %1841 = vmatprep.mubr.bf16.mxu0 %v1542_v48 }
 0x3b1   : > { %v1365_v55 = vadd.f32 %v1364_v54, %v4895_v24  ;;  %v1366_v56 = vpop.f32.mrb[55].mxu1  ;;  %1842 = vmatmul.mubr.bf16.gmra.mrb[48].mxu0 %v1541_v47  ;;  %v1489_v58 = vmax.f32 %v1361_v50, 0.0 }
 0x3b2   : > { %v1367_v57 = vadd.f32 %v1366_v56, %v4899_v63  ;;  %v1490_v60 = vmax.f32 %v1363_v52, 0.0 }
 0x3b3   : > { %v1491_v59 = vmax.f32 %v1365_v55, 0.0 }
 0x3b4   : > { %v1492_v53 = vmax.f32 %v1367_v57, 0.0 }
 0x3b5   : > { %v1543_v62 = vpack.c.bf16 %v1491_v59, %v1489_v58 }
 0x3b6   : > { %v1544_v1 = vpack.c.bf16 %v1492_v53, %v1490_v60  ;;  %v1370_v61 = vpop.f32.mrb[56].mxu1 }
 0x3b7   : > { %v1371_v2 = vadd.f32 %v1370_v61, %v4895_v24  ;;  %v1372_v3 = vpop.f32.mrb[57].mxu1 }
 0x3b8   : > { %v1373_v4 = vadd.f32 %v1372_v3, %v4899_v63  ;;  %v1374_v5 = vpop.f32.mrb[58].mxu1  ;;  %1851 = vmatprep.mubr.bf16.mxu0 %v1544_v1 }
 0x3b9   : > { %v1375_v6 = vadd.f32 %v1374_v5, %v4895_v24  ;;  %v1376_v7 = vpop.f32.mrb[59].mxu1  ;;  %1852 = vmatmul.mubr.bf16.gmra.mrb[52].mxu0 %v1543_v62  ;;  %v1493_v11 = vmax.f32 %v1371_v2, 0.0 }
 0x3ba   : > { %v1377_v8 = vadd.f32 %v1376_v7, %v4899_v63  ;;  %v1494_v13 = vmax.f32 %v1373_v4, 0.0 }
 0x3bb   : > { %v1495_v12 = vmax.f32 %v1375_v6, 0.0 }
 0x3bc   : > { %v1496_v14 = vmax.f32 %v1377_v8, 0.0 }
 0x3bd   : > { %v1545_v15 = vpack.c.bf16 %v1495_v12, %v1493_v11 }
 0x3be   : > { %v1546_v16 = vpack.c.bf16 %v1496_v14, %v1494_v13  ;;  %v1380_v17 = vpop.f32.mrb[60].mxu1 }
 0x3bf   : > { %v1381_v0 = vadd.f32 %v1380_v17, %v4895_v24  ;;  %v1382_v9 = vpop.f32.mrb[61].mxu1 }
 0x3c0   : > { %v1383_v10 = vadd.f32 %v1382_v9, %v4899_v63  ;;  %v1384_v18 = vpop.f32.mrb[62].mxu1  ;;  %1861 = vmatprep.mubr.bf16.mxu0 %v1546_v16 }
 0x3c1   : > { %v1385_v22 = vadd.f32 %v1384_v18, %v4895_v24  ;;  %v1386_v25 = vpop.f32.mrb[63].mxu1  ;;  %1862 = vmatmul.mubr.bf16.gmra.mrb[56].mxu0 %v1545_v15  ;;  %v1497_v27 = vmax.f32 %v1381_v0, 0.0 }
 0x3c2   : > { %v1387_v26 = vadd.f32 %v1386_v25, %v4899_v63  ;;  %v1498_v29 = vmax.f32 %v1383_v10, 0.0 }
 0x3c3   : > { %v1499_v28 = vmax.f32 %v1385_v22, 0.0 }
 0x3c4   : > { %v1500_v30 = vmax.f32 %v1387_v26, 0.0 }
 0x3c5   : > { %v1547_v31 = vpack.c.bf16 %v1499_v28, %v1497_v27 }
 0x3c6   : > { %v1548_v32 = vpack.c.bf16 %v1500_v30, %v1498_v29  ;;  %v1390_v33 = vpop.f32.mrb[64].mxu1  ;;  %v3823_v30 = vld [vmem:[%s5635_s19 + $0x70] sm:$0xff]  }
 0x3c7   : > { %v1391_v34 = vadd.f32 %v1390_v33, %v4895_v24  ;;  %v1392_v35 = vpop.f32.mrb[65].mxu1  ;;  %v3824_v33 = vld [vmem:[%s5635_s19 + $0x30] sm:$0xff]   ;;  %3603 = vmatprep.subr.bf16.mxu1 %v3823_v30  ;;  %3349 = vmatprep.subr.bf16.mxu0 %v3823_v30 }
 0x3c8   : > { %v1393_v36 = vadd.f32 %v1392_v35, %v4899_v63  ;;  %v1394_v37 = vpop.f32.mrb[66].mxu1  ;;  %1871 = vmatprep.mubr.bf16.mxu0 %v1548_v32  ;;  %3611 = vmatpush3.bf16.msra.mxu1 %v3824_v33 }
 0x3c9   : > { %v1395_v38 = vadd.f32 %v1394_v37, %v4895_v24  ;;  %v1396_v39 = vpop.f32.mrb[67].mxu1  ;;  %1872 = vmatmul.mubr.bf16.gmra.mrb[60].mxu0 %v1547_v31  ;;  %v1501_v41 = vmax.f32 %v1391_v34, 0.0 }
 0x3ca   : > { %v1397_v40 = vadd.f32 %v1396_v39, %v4899_v63  ;;  %v1502_v43 = vmax.f32 %v1393_v36, 0.0  ;;  %3350 = vmatpush3.bf16.msra.mxu0 %v3824_v33  ;;  %v1597_v33 = vld [vmem:[#allocation11] sm:$0x3] }
 0x3cb   : > { %v1503_v42 = vmax.f32 %v1395_v38, 0.0 }
 0x3cc   : > { %v1504_v44 = vmax.f32 %v1397_v40, 0.0  ;;  %v3825_v40 = vld [vmem:[%s5635_s19 + $0x78] sm:$0xff]  }
 0x3cd   : > { %v1549_v45 = vpack.c.bf16 %v1503_v42, %v1501_v41  ;;  %v3826_v42 = vld [vmem:[%s5635_s19 + $0x38] sm:$0xff]   ;;  %3351 = vmatprep.subr.bf16.mxu0 %v3825_v40  ;;  %3604 = vmatprep.subr.bf16.mxu1 %v3825_v40 }
 0x3ce   : > { %v1550_v46 = vpack.c.bf16 %v1504_v44, %v1502_v43  ;;  %v1400_v47 = vpop.f32.mrb[68].mxu1  ;;  %3612 = vmatpush3.bf16.msra.mxu1 %v3826_v42  ;;  %3352 = vmatpush3.bf16.msra.mxu0 %v3826_v42 }
 0x3cf   : > { %v1401_v48 = vadd.f32 %v1400_v47, %v4895_v24  ;;  %v1402_v49 = vpop.f32.mrb[69].mxu1 }
 0x3d0   : > { %v1403_v50 = vadd.f32 %v1402_v49, %v4899_v63  ;;  %v1404_v51 = vpop.f32.mrb[70].mxu1  ;;  %1881 = vmatprep.mubr.bf16.mxu0 %v1550_v46 }
 0x3d1   : > { %v1405_v52 = vadd.f32 %v1404_v51, %v4895_v24  ;;  %v1406_v54 = vpop.f32.mrb[71].mxu1  ;;  %1882 = vmatmul.mubr.bf16.gmra.mrb[64].mxu0 %v1549_v45  ;;  %v1505_v56 = vmax.f32 %v1401_v48, 0.0 }
 0x3d2   : > { %v1407_v55 = vadd.f32 %v1406_v54, %v4899_v63  ;;  %v1506_v58 = vmax.f32 %v1403_v50, 0.0 }
 0x3d3   : > { %v1507_v57 = vmax.f32 %v1405_v52, 0.0 }
 0x3d4   : > { %v1508_v59 = vmax.f32 %v1407_v55, 0.0 }
 0x3d5   : > { %v1551_v60 = vpack.c.bf16 %v1507_v57, %v1505_v56 }
 0x3d6   : > { %v1552_v53 = vpack.c.bf16 %v1508_v59, %v1506_v58  ;;  %v1410_v62 = vpop.f32.mrb[72].mxu1 }
 0x3d7   : > { %v1411_v1 = vadd.f32 %v1410_v62, %v4895_v24  ;;  %v1412_v61 = vpop.f32.mrb[73].mxu1 }
 0x3d8   : > { %v1413_v2 = vadd.f32 %v1412_v61, %v4899_v63  ;;  %v1414_v3 = vpop.f32.mrb[74].mxu1  ;;  %1891 = vmatprep.mubr.bf16.mxu0 %v1552_v53 }
 0x3d9   : > { %v1415_v4 = vadd.f32 %v1414_v3, %v4895_v24  ;;  %v1416_v5 = vpop.f32.mrb[75].mxu1  ;;  %1892 = vmatmul.mubr.bf16.gmra.mrb[68].mxu0 %v1551_v60  ;;  %v1509_v7 = vmax.f32 %v1411_v1, 0.0 }
 0x3da   : > { %v1417_v6 = vadd.f32 %v1416_v5, %v4899_v63  ;;  %v1510_v11 = vmax.f32 %v1413_v2, 0.0 }
 0x3db   : > { %v1511_v8 = vmax.f32 %v1415_v4, 0.0 }
 0x3dc   : > { %v1512_v12 = vmax.f32 %v1417_v6, 0.0 }
 0x3dd   : > { %v1553_v13 = vpack.c.bf16 %v1511_v8, %v1509_v7 }
 0x3de   : > { %v1554_v14 = vpack.c.bf16 %v1512_v12, %v1510_v11  ;;  %v1420_v15 = vpop.f32.mrb[76].mxu1 }
 0x3df   : > { %v1421_v16 = vadd.f32 %v1420_v15, %v4895_v24  ;;  %v1422_v17 = vpop.f32.mrb[77].mxu1 }
 0x3e0   : > { %v1423_v0 = vadd.f32 %v1422_v17, %v4899_v63  ;;  %v1424_v9 = vpop.f32.mrb[78].mxu1  ;;  %1901 = vmatprep.mubr.bf16.mxu0 %v1554_v14 }
 0x3e1   : > { %v1425_v10 = vadd.f32 %v1424_v9, %v4895_v24  ;;  %v1426_v18 = vpop.f32.mrb[79].mxu1  ;;  %1902 = vmatmul.mubr.bf16.gmra.mrb[72].mxu0 %v1553_v13  ;;  %v1513_v25 = vmax.f32 %v1421_v16, 0.0 }
 0x3e2   : > { %v1427_v22 = vadd.f32 %v1426_v18, %v4899_v63  ;;  %v1514_v27 = vmax.f32 %v1423_v0, 0.0 }
 0x3e3   : > { %v1515_v26 = vmax.f32 %v1425_v10, 0.0 }
 0x3e4   : > { %v1516_v28 = vmax.f32 %v1427_v22, 0.0 }
 0x3e5   : > { %v1555_v29 = vpack.c.bf16 %v1515_v26, %v1513_v25 }
 0x3e6   : > { %v1556_v31 = vpack.c.bf16 %v1516_v28, %v1514_v27  ;;  %v1430_v32 = vpop.f32.mrb[80].mxu1 }
 0x3e7   : > { %v1431_v34 = vadd.f32 %v1430_v32, %v4895_v24  ;;  %v1432_v35 = vpop.f32.mrb[81].mxu1 }
 0x3e8   : > { %v1433_v36 = vadd.f32 %v1432_v35, %v4899_v63  ;;  %v1434_v37 = vpop.f32.mrb[82].mxu1  ;;  %1911 = vmatprep.mubr.bf16.mxu0 %v1556_v31 }
 0x3e9   : > { %v1435_v38 = vadd.f32 %v1434_v37, %v4895_v24  ;;  %v1436_v39 = vpop.f32.mrb[83].mxu1  ;;  %1912 = vmatmul.mubr.bf16.gmra.mrb[76].mxu0 %v1555_v29  ;;  %v1517_v43 = vmax.f32 %v1431_v34, 0.0  ;;  %v5015_v34 = vrot.slane %v1597_v33, %v1188_v21 }
 0x3ea   : > { %v1437_v41 = vadd.f32 %v1436_v39, %v4899_v63  ;;  %v1518_v45 = vmax.f32 %v1433_v36, 0.0 }
 0x3eb   : > { %v1519_v44 = vmax.f32 %v1435_v38, 0.0 }
 0x3ec   : > { %v1520_v46 = vmax.f32 %v1437_v41, 0.0 }
 0x3ed   : > { %v1557_v47 = vpack.c.bf16 %v1519_v44, %v1517_v43 }
 0x3ee   : > { %v1558_v48 = vpack.c.bf16 %v1520_v46, %v1518_v45  ;;  %v1440_v49 = vpop.f32.mrb[84].mxu1 }
 0x3ef   : > { %v1441_v50 = vadd.f32 %v1440_v49, %v4895_v24  ;;  %v1442_v51 = vpop.f32.mrb[85].mxu1 }
 0x3f0   : > { %v1443_v52 = vadd.f32 %v1442_v51, %v4899_v63  ;;  %v1444_v54 = vpop.f32.mrb[86].mxu1  ;;  %1921 = vmatprep.mubr.bf16.mxu0 %v1558_v48 }
 0x3f1   : > { %v1445_v55 = vadd.f32 %v1444_v54, %v4895_v24  ;;  %v1446_v56 = vpop.f32.mrb[87].mxu1  ;;  %1922 = vmatmul.mubr.bf16.gmra.mrb[80].mxu0 %v1557_v47  ;;  %v1521_v58 = vmax.f32 %v1441_v50, 0.0 }
 0x3f2   : > { %v1447_v57 = vadd.f32 %v1446_v56, %v4899_v63  ;;  %v1522_v60 = vmax.f32 %v1443_v52, 0.0 }
 0x3f3   : > { %v1523_v59 = vmax.f32 %v1445_v55, 0.0 }
 0x3f4   : > { %v1524_v53 = vmax.f32 %v1447_v57, 0.0 }
 0x3f5   : > { %v1559_v62 = vpack.c.bf16 %v1523_v59, %v1521_v58 }
 0x3f6   : > { %v1560_v1 = vpack.c.bf16 %v1524_v53, %v1522_v60  ;;  %v1450_v61 = vpop.f32.mrb[88].mxu1 }
 0x3f7   : > { %v1451_v2 = vadd.f32 %v1450_v61, %v4895_v24  ;;  %v1452_v3 = vpop.f32.mrb[89].mxu1 }
 0x3f8   : > { %v1453_v4 = vadd.f32 %v1452_v3, %v4899_v63  ;;  %v1454_v5 = vpop.f32.mrb[90].mxu1  ;;  %1931 = vmatprep.mubr.bf16.mxu0 %v1560_v1 }
 0x3f9   : > { %v1455_v6 = vadd.f32 %v1454_v5, %v4895_v24  ;;  %v1456_v7 = vpop.f32.mrb[91].mxu1  ;;  %1932 = vmatmul.mubr.bf16.gmra.mrb[84].mxu0 %v1559_v62  ;;  %v1525_v11 = vmax.f32 %v1451_v2, 0.0 }
 0x3fa   : > { %v1457_v8 = vadd.f32 %v1456_v7, %v4899_v63  ;;  %v1526_v13 = vmax.f32 %v1453_v4, 0.0 }
 0x3fb   : > { %v1527_v12 = vmax.f32 %v1455_v6, 0.0 }
 0x3fc   : > { %v1528_v14 = vmax.f32 %v1457_v8, 0.0 }
 0x3fd   : > { %v1561_v15 = vpack.c.bf16 %v1527_v12, %v1525_v11 }
 0x3fe   : > { %v1562_v16 = vpack.c.bf16 %v1528_v14, %v1526_v13  ;;  %v1460_v17 = vpop.f32.mrb[92].mxu1 }
 0x3ff   : > { %v1461_v0 = vadd.f32 %v1460_v17, %v4895_v24  ;;  %v1462_v9 = vpop.f32.mrb[93].mxu1 }
 0x400   : > { %v1463_v10 = vadd.f32 %v1462_v9, %v4899_v63  ;;  %v1464_v18 = vpop.f32.mrb[94].mxu1  ;;  %1941 = vmatprep.mubr.bf16.mxu0 %v1562_v16 }
 0x401   : > { %v1465_v22 = vadd.f32 %v1464_v18, %v4895_v24  ;;  %v1466_v25 = vpop.f32.mrb[95].mxu1  ;;  %1942 = vmatmul.mubr.bf16.gmra.mrb[88].mxu0 %v1561_v15  ;;  %v1529_v27 = vmax.f32 %v1461_v0, 0.0  ;;  %v5019_v24 = vrot.slane %v1597_v33, %v1192_v23 }
 0x402   : > { %v1467_v26 = vadd.f32 %v1466_v25, %v4899_v63  ;;  %v1530_v29 = vmax.f32 %v1463_v10, 0.0 }
 0x403   : > { %v1531_v28 = vmax.f32 %v1465_v22, 0.0 }
 0x404   : > { %v1532_v30 = vmax.f32 %v1467_v26, 0.0 }
 0x405   : > { %v1563_v31 = vpack.c.bf16 %v1531_v28, %v1529_v27 }
 0x406   : > { %v1564_v32 = vpack.c.bf16 %v1532_v30, %v1530_v29 }
 0x408   : > { %1951 = vmatprep.mubr.bf16.mxu0 %v1564_v32 }
 0x409   : > { %1952 = vmatmul.mubr.bf16.gmra.mrb[92].mxu0 %v1563_v31 }
 0x464   : > { %v1803_v35 = vpop.f32.mrb[32].mxu0 }
 0x465   : > { %v1804_v63 = vadd.f32 %v1803_v35, %v5015_v34  ;;  %v1805_v36 = vpop.f32.mrb[33].mxu0 }
 0x466   : > { %v1806_v37 = vadd.f32 %v1805_v36, %v5019_v24  ;;  %v1807_v38 = vpop.f32.mrb[34].mxu0 }
 0x467   : > { %v1808_v39 = vadd.f32 %v1807_v38, %v5015_v34  ;;  %v1809_v40 = vpop.f32.mrb[35].mxu0  ;;  %v1962_v42 = vmax.f32 %v1804_v63, 0.0 }
 0x468   : > { %v1810_v41 = vadd.f32 %v1809_v40, %v5019_v24  ;;  %v1963_v21 = vmax.f32 %v1806_v37, 0.0 }
 0x469   : > { %v1964_v43 = vmax.f32 %v1808_v39, 0.0 }
 0x46a   : > { %v1965_v44 = vmax.f32 %v1810_v41, 0.0 }
 0x46b   : > { %v2026_v45 = vpack.c.bf16 %v1964_v43, %v1962_v42 }
 0x46c   : > { %v2027_v20 = vpack.c.bf16 %v1965_v44, %v1963_v21  ;;  %v1813_v23 = vpop.f32.mrb[36].mxu0 }
 0x46d   : > { %v1814_v46 = vadd.f32 %v1813_v23, %v5015_v34  ;;  %v1815_v47 = vpop.f32.mrb[37].mxu0 }
 0x46e   : > { %v1816_v48 = vadd.f32 %v1815_v47, %v5019_v24  ;;  %v1817_v49 = vpop.f32.mrb[38].mxu0  ;;  %2225 = vmatprep.mubr.bf16.mxu0 %v2027_v20 }
 0x46f   : > { %v1818_v50 = vadd.f32 %v1817_v49, %v5015_v34  ;;  %v1819_v51 = vpop.f32.mrb[39].mxu0  ;;  %2226 = vmatmul.mubr.bf16.vlgmr.msra.gmra.mrb[96].mxu0 %v2026_v45  ;;  %v1966_v54 = vmax.f32 %v1814_v46, 0.0 }
 0x470   : > { %v1820_v52 = vadd.f32 %v1819_v51, %v5019_v24  ;;  %v1967_v56 = vmax.f32 %v1816_v48, 0.0 }
 0x471   : > { %v1968_v55 = vmax.f32 %v1818_v50, 0.0 }
 0x472   : > { %v1969_v57 = vmax.f32 %v1820_v52, 0.0 }
 0x473   : > { %v2028_v58 = vpack.c.bf16 %v1968_v55, %v1966_v54 }
 0x474   : > { %v2029_v59 = vpack.c.bf16 %v1969_v57, %v1967_v56  ;;  %v1823_v60 = vpop.f32.mrb[40].mxu0 }
 0x475   : > { %v1824_v53 = vadd.f32 %v1823_v60, %v5015_v34  ;;  %v1825_v62 = vpop.f32.mrb[41].mxu0 }
 0x476   : > { %v1826_v1 = vadd.f32 %v1825_v62, %v5019_v24  ;;  %v1827_v61 = vpop.f32.mrb[42].mxu0  ;;  %2233 = vmatprep.mubr.bf16.mxu0 %v2029_v59 }
 0x477   : > { %v1828_v2 = vadd.f32 %v1827_v61, %v5015_v34  ;;  %v1829_v3 = vpop.f32.mrb[43].mxu0  ;;  %2234 = vmatmul.mubr.bf16.gmra.mrb[100].mxu0 %v2028_v58  ;;  %v1970_v5 = vmax.f32 %v1824_v53, 0.0 }
 0x478   : > { %v1830_v4 = vadd.f32 %v1829_v3, %v5019_v24  ;;  %v1971_v7 = vmax.f32 %v1826_v1, 0.0 }
 0x479   : > { %v1972_v6 = vmax.f32 %v1828_v2, 0.0 }
 0x47a   : > { %v1973_v8 = vmax.f32 %v1830_v4, 0.0 }
 0x47b   : > { %v2030_v11 = vpack.c.bf16 %v1972_v6, %v1970_v5 }
 0x47c   : > { %v2031_v12 = vpack.c.bf16 %v1973_v8, %v1971_v7  ;;  %v1833_v13 = vpop.f32.mrb[44].mxu0 }
 0x47d   : > { %v1834_v14 = vadd.f32 %v1833_v13, %v5015_v34  ;;  %v1835_v15 = vpop.f32.mrb[45].mxu0 }
 0x47e   : > { %v1836_v16 = vadd.f32 %v1835_v15, %v5019_v24  ;;  %v1837_v17 = vpop.f32.mrb[46].mxu0  ;;  %2241 = vmatprep.mubr.bf16.mxu0 %v2031_v12 }
 0x47f   : > { %v1838_v0 = vadd.f32 %v1837_v17, %v5015_v34  ;;  %v1839_v9 = vpop.f32.mrb[47].mxu0  ;;  %2242 = vmatmul.mubr.bf16.gmra.mrb[104].mxu0 %v2030_v11  ;;  %v1974_v18 = vmax.f32 %v1834_v14, 0.0 }
 0x480   : > { %v1840_v10 = vadd.f32 %v1839_v9, %v5019_v24  ;;  %v1975_v25 = vmax.f32 %v1836_v16, 0.0 }
 0x481   : > { %v1976_v22 = vmax.f32 %v1838_v0, 0.0 }
 0x482   : > { %v1977_v26 = vmax.f32 %v1840_v10, 0.0 }
 0x483   : > { %v2032_v27 = vpack.c.bf16 %v1976_v22, %v1974_v18 }
 0x484   : > { %v2033_v28 = vpack.c.bf16 %v1977_v26, %v1975_v25  ;;  %v1843_v29 = vpop.f32.mrb[48].mxu0 }
 0x485   : > { %v1844_v30 = vadd.f32 %v1843_v29, %v5015_v34  ;;  %v1845_v31 = vpop.f32.mrb[49].mxu0 }
 0x486   : > { %v1846_v32 = vadd.f32 %v1845_v31, %v5019_v24  ;;  %v1847_v33 = vpop.f32.mrb[50].mxu0  ;;  %2249 = vmatprep.mubr.bf16.mxu1 %v2033_v28 }
 0x487   : > { %v1848_v35 = vadd.f32 %v1847_v33, %v5015_v34  ;;  %v1849_v63 = vpop.f32.mrb[51].mxu0  ;;  %2250 = vmatmul.mubr.bf16.vlgmr.msra.gmra.mrb[96].mxu1 %v2032_v27  ;;  %v1978_v37 = vmax.f32 %v1844_v30, 0.0 }
 0x488   : > { %v1850_v36 = vadd.f32 %v1849_v63, %v5019_v24  ;;  %v1979_v39 = vmax.f32 %v1846_v32, 0.0 }
 0x489   : > { %v1980_v38 = vmax.f32 %v1848_v35, 0.0 }
 0x48a   : > { %v1981_v40 = vmax.f32 %v1850_v36, 0.0 }
 0x48b   : > { %v2034_v41 = vpack.c.bf16 %v1980_v38, %v1978_v37 }
 0x48c   : > { %v2035_v42 = vpack.c.bf16 %v1981_v40, %v1979_v39  ;;  %v1853_v43 = vpop.f32.mrb[52].mxu0 }
 0x48d   : > { %v1854_v21 = vadd.f32 %v1853_v43, %v5015_v34  ;;  %v1855_v44 = vpop.f32.mrb[53].mxu0 }
 0x48e   : > { %v1856_v45 = vadd.f32 %v1855_v44, %v5019_v24  ;;  %v1857_v20 = vpop.f32.mrb[54].mxu0  ;;  %2257 = vmatprep.mubr.bf16.mxu1 %v2035_v42 }
 0x48f   : > { %v1858_v23 = vadd.f32 %v1857_v20, %v5015_v34  ;;  %v1859_v46 = vpop.f32.mrb[55].mxu0  ;;  %2258 = vmatmul.mubr.bf16.gmra.mrb[100].mxu1 %v2034_v41  ;;  %v1982_v48 = vmax.f32 %v1854_v21, 0.0 }
 0x490   : > { %v1860_v47 = vadd.f32 %v1859_v46, %v5019_v24  ;;  %v1983_v50 = vmax.f32 %v1856_v45, 0.0 }
 0x491   : > { %v1984_v49 = vmax.f32 %v1858_v23, 0.0 }
 0x492   : > { %v1985_v51 = vmax.f32 %v1860_v47, 0.0 }
 0x493   : > { %v2036_v52 = vpack.c.bf16 %v1984_v49, %v1982_v48 }
 0x494   : > { %v2037_v54 = vpack.c.bf16 %v1985_v51, %v1983_v50  ;;  %v1863_v55 = vpop.f32.mrb[56].mxu0 }
 0x495   : > { %v1864_v56 = vadd.f32 %v1863_v55, %v5015_v34  ;;  %v1865_v57 = vpop.f32.mrb[57].mxu0 }
 0x496   : > { %v1866_v58 = vadd.f32 %v1865_v57, %v5019_v24  ;;  %v1867_v59 = vpop.f32.mrb[58].mxu0  ;;  %2265 = vmatprep.mubr.bf16.mxu1 %v2037_v54 }
 0x497   : > { %v1868_v60 = vadd.f32 %v1867_v59, %v5015_v34  ;;  %v1869_v53 = vpop.f32.mrb[59].mxu0  ;;  %2266 = vmatmul.mubr.bf16.gmra.mrb[104].mxu1 %v2036_v52  ;;  %v1986_v1 = vmax.f32 %v1864_v56, 0.0 }
 0x498   : > { %v1870_v62 = vadd.f32 %v1869_v53, %v5019_v24  ;;  %v1987_v2 = vmax.f32 %v1866_v58, 0.0 }
 0x499   : > { %v1988_v61 = vmax.f32 %v1868_v60, 0.0 }
 0x49a   : > { %v1989_v3 = vmax.f32 %v1870_v62, 0.0 }
 0x49b   : > { %v2038_v4 = vpack.c.bf16 %v1988_v61, %v1986_v1 }
 0x49c   : > { %v2039_v5 = vpack.c.bf16 %v1989_v3, %v1987_v2  ;;  %v1873_v6 = vpop.f32.mrb[60].mxu0 }
 0x49d   : > { %v1874_v7 = vadd.f32 %v1873_v6, %v5015_v34  ;;  %v1875_v8 = vpop.f32.mrb[61].mxu0 }
 0x49e   : > { %v1876_v11 = vadd.f32 %v1875_v8, %v5019_v24  ;;  %v1877_v12 = vpop.f32.mrb[62].mxu0  ;;  %2273 = vmatprep.mubr.bf16.mxu1 %v2039_v5 }
 0x49f   : > { %v1878_v13 = vadd.f32 %v1877_v12, %v5015_v34  ;;  %v1879_v14 = vpop.f32.mrb[63].mxu0  ;;  %2274 = vmatmul.mubr.bf16.gmra.mrb[108].mxu1 %v2038_v4  ;;  %v1990_v16 = vmax.f32 %v1874_v7, 0.0 }
 0x4a0   : > { %v1880_v15 = vadd.f32 %v1879_v14, %v5019_v24  ;;  %v1991_v0 = vmax.f32 %v1876_v11, 0.0 }
 0x4a1   : > { %v1992_v17 = vmax.f32 %v1878_v13, 0.0 }
 0x4a2   : > { %v1993_v9 = vmax.f32 %v1880_v15, 0.0 }
 0x4a3   : > { %v2040_v10 = vpack.c.bf16 %v1992_v17, %v1990_v16 }
 0x4a4   : > { %v2041_v18 = vpack.c.bf16 %v1993_v9, %v1991_v0  ;;  %v1883_v22 = vpop.f32.mrb[64].mxu0  ;;  %v3827_v0 = vld [vmem:[#allocation13] sm:$0xff]  }
 0x4a5   : > { %v1884_v25 = vadd.f32 %v1883_v22, %v5015_v34  ;;  %v1885_v26 = vpop.f32.mrb[65].mxu0  ;;  %3557 = vmatprep.subr.bf16.mxu0 %v3827_v0 }
 0x4a6   : > { %v1886_v27 = vadd.f32 %v1885_v26, %v5019_v24  ;;  %v1887_v28 = vpop.f32.mrb[66].mxu0  ;;  %2281 = vmatprep.mubr.bf16.mxu1 %v2041_v18  ;;  %3558 = vmatpush3.bf16.msra.mxu0 %v3827_v0 }
 0x4a7   : > { %v1888_v29 = vadd.f32 %v1887_v28, %v5015_v34  ;;  %v1889_v30 = vpop.f32.mrb[67].mxu0  ;;  %2282 = vmatmul.mubr.bf16.gmra.mrb[112].mxu1 %v2040_v10  ;;  %v1994_v32 = vmax.f32 %v1884_v25, 0.0  ;;  %v3828_v28 = vld [vmem:[#allocation13 + $0x8] sm:$0xff]  }
 0x4a8   : > { %v1890_v31 = vadd.f32 %v1889_v30, %v5019_v24  ;;  %v1995_v35 = vmax.f32 %v1886_v27, 0.0  ;;  %3559 = vmatprep.subr.bf16.mxu0 %v3828_v28 }
 0x4a9   : > { %v1996_v33 = vmax.f32 %v1888_v29, 0.0 }
 0x4aa   : > { %v1997_v63 = vmax.f32 %v1890_v31, 0.0  ;;  %3560 = vmatpush3.bf16.msra.mxu0 %v3828_v28 }
 0x4ab   : > { %v2042_v36 = vpack.c.bf16 %v1996_v33, %v1994_v32 }
 0x4ac   : > { %v2043_v37 = vpack.c.bf16 %v1997_v63, %v1995_v35  ;;  %v1893_v38 = vpop.f32.mrb[68].mxu0 }
 0x4ad   : > { %v1894_v39 = vadd.f32 %v1893_v38, %v5015_v34  ;;  %v1895_v40 = vpop.f32.mrb[69].mxu0 }
 0x4ae   : > { %v1896_v41 = vadd.f32 %v1895_v40, %v5019_v24  ;;  %v1897_v42 = vpop.f32.mrb[70].mxu0  ;;  %2289 = vmatprep.mubr.bf16.mxu1 %v2043_v37 }
 0x4af   : > { %v1898_v43 = vadd.f32 %v1897_v42, %v5015_v34  ;;  %v1899_v21 = vpop.f32.mrb[71].mxu0  ;;  %2290 = vmatmul.mubr.bf16.gmra.mrb[116].mxu1 %v2042_v36  ;;  %v1998_v45 = vmax.f32 %v1894_v39, 0.0  ;;  %v3829_v36 = vld [vmem:[#allocation13 + $0x10] sm:$0xff]  }
 0x4b0   : > { %v1900_v44 = vadd.f32 %v1899_v21, %v5019_v24  ;;  %v1999_v23 = vmax.f32 %v1896_v41, 0.0  ;;  %3561 = vmatprep.subr.bf16.mxu0 %v3829_v36  ;;  %v3830_v21 = vld [vmem:[#allocation13 + $0x18] sm:$0xff]  }
 0x4b1   : > { %v2000_v20 = vmax.f32 %v1898_v43, 0.0  ;;  %3562 = vmatpush3.bf16.msra.mxu0 %v3829_v36 }
 0x4b2   : > { %v2001_v46 = vmax.f32 %v1900_v44, 0.0  ;;  %3563 = vmatprep.subr.bf16.mxu0 %v3830_v21 }
 0x4b3   : > { %v2044_v47 = vpack.c.bf16 %v2000_v20, %v1998_v45 }
 0x4b4   : > { %v2045_v48 = vpack.c.bf16 %v2001_v46, %v1999_v23  ;;  %v1903_v49 = vpop.f32.mrb[72].mxu0 }
 0x4b5   : > { %v1904_v50 = vadd.f32 %v1903_v49, %v5015_v34  ;;  %v1905_v51 = vpop.f32.mrb[73].mxu0  ;;  %3564 = vmatpush3.bf16.msra.mxu0 %v3830_v21 }
 0x4b6   : > { %v1906_v52 = vadd.f32 %v1905_v51, %v5019_v24  ;;  %v1907_v54 = vpop.f32.mrb[74].mxu0  ;;  %2297 = vmatprep.mubr.bf16.mxu1 %v2045_v48 }
 0x4b7   : > { %v1908_v55 = vadd.f32 %v1907_v54, %v5015_v34  ;;  %v1909_v56 = vpop.f32.mrb[75].mxu0  ;;  %2298 = vmatmul.mubr.bf16.gmra.mrb[120].mxu1 %v2044_v47  ;;  %v2002_v58 = vmax.f32 %v1904_v50, 0.0 }
 0x4b8   : > { %v1910_v57 = vadd.f32 %v1909_v56, %v5019_v24  ;;  %v2003_v60 = vmax.f32 %v1906_v52, 0.0 }
 0x4b9   : > { %v2004_v59 = vmax.f32 %v1908_v55, 0.0 }
 0x4ba   : > { %v2005_v53 = vmax.f32 %v1910_v57, 0.0 }
 0x4bb   : > { %v2046_v62 = vpack.c.bf16 %v2004_v59, %v2002_v58 }
 0x4bc   : > { %v2047_v1 = vpack.c.bf16 %v2005_v53, %v2003_v60  ;;  %v1913_v61 = vpop.f32.mrb[76].mxu0 }
 0x4bd   : > { %v1914_v2 = vadd.f32 %v1913_v61, %v5015_v34  ;;  %v1915_v3 = vpop.f32.mrb[77].mxu0 }
 0x4be   : > { %v1916_v4 = vadd.f32 %v1915_v3, %v5019_v24  ;;  %v1917_v5 = vpop.f32.mrb[78].mxu0  ;;  %2305 = vmatprep.mubr.bf16.mxu1 %v2047_v1 }
 0x4bf   : > { %v1918_v6 = vadd.f32 %v1917_v5, %v5015_v34  ;;  %v1919_v7 = vpop.f32.mrb[79].mxu0  ;;  %2306 = vmatmul.mubr.bf16.gmra.mrb[124].mxu1 %v2046_v62  ;;  %v2006_v11 = vmax.f32 %v1914_v2, 0.0 }
 0x4c0   : > { %v1920_v8 = vadd.f32 %v1919_v7, %v5019_v24  ;;  %v2007_v13 = vmax.f32 %v1916_v4, 0.0 }
 0x4c1   : > { %v2008_v12 = vmax.f32 %v1918_v6, 0.0 }
 0x4c2   : > { %v2009_v14 = vmax.f32 %v1920_v8, 0.0 }
 0x4c3   : > { %v2048_v15 = vpack.c.bf16 %v2008_v12, %v2006_v11 }
 0x4c4   : > { %v2049_v16 = vpack.c.bf16 %v2009_v14, %v2007_v13  ;;  %v1923_v17 = vpop.f32.mrb[80].mxu0 }
 0x4c5   : > { %v1924_v9 = vadd.f32 %v1923_v17, %v5015_v34  ;;  %v1925_v10 = vpop.f32.mrb[81].mxu0  ;;  %v5088_v17 = vld [vmem:[%s5636_s15] ss:$0 sm:$0xff]  ;;  %s4157_s15 = scalar_lea.vmem %s5539_s12, 4096 }
 0x4c6   : > { %v1926_v18 = vadd.f32 %v1925_v10, %v5019_v24  ;;  %v1927_v22 = vpop.f32.mrb[82].mxu0  ;;  %2313 = vmatprep.mubr.bf16.mxu1 %v2049_v16  ;;  %p4158_p6 = scmp.ne.s32.totalorder %s5539_s12, %s4157_s15 }
 0x4c7   : > { %v1928_v25 = vadd.f32 %v1927_v22, %v5015_v34  ;;  %v1929_v26 = vpop.f32.mrb[83].mxu0  ;;  %2314 = vmatmul.mubr.bf16.gmra.mrb[128].mxu1 %v2048_v15  ;;  %v2010_v29 = vmax.f32 %v1924_v9, 0.0 }
 0x4c8   : > { %v1930_v27 = vadd.f32 %v1929_v26, %v5019_v24  ;;  %v2011_v31 = vmax.f32 %v1926_v18, 0.0  ;;  %p4159_p4 = pnand %p4158_p6, %p5639_p9 }
 0x4c9   : > { %v2012_v30 = vmax.f32 %v1928_v25, 0.0 }
 0x4ca   : > { %v2013_v32 = vmax.f32 %v1930_v27, 0.0  ;;  %p4160_p1 = pneg %p4159_p4 }
 0x4cb   : > { %v2050_v33 = vpack.c.bf16 %v2012_v30, %v2010_v29 }
 0x4cc   : > { %v2051_v35 = vpack.c.bf16 %v2013_v32, %v2011_v31  ;;  %v1933_v63 = vpop.f32.mrb[84].mxu0 }
 0x4cd   : > { %v1934_v37 = vadd.f32 %v1933_v63, %v5015_v34  ;;  %v1935_v38 = vpop.f32.mrb[85].mxu0 }
 0x4ce   : > { %v1936_v39 = vadd.f32 %v1935_v38, %v5019_v24  ;;  %v1937_v40 = vpop.f32.mrb[86].mxu0  ;;  %2321 = vmatprep.mubr.bf16.mxu1 %v2051_v35 }
 0x4cf   : > { %v1938_v41 = vadd.f32 %v1937_v40, %v5015_v34  ;;  %v1939_v42 = vpop.f32.mrb[87].mxu0  ;;  %2322 = vmatmul.mubr.bf16.gmra.mrb[132].mxu1 %v2050_v33  ;;  %v2014_v44 = vmax.f32 %v1934_v37, 0.0 }
 0x4d0   : > { %v1940_v43 = vadd.f32 %v1939_v42, %v5019_v24  ;;  %v2015_v20 = vmax.f32 %v1936_v39, 0.0 }
 0x4d1   : > { %v2016_v45 = vmax.f32 %v1938_v41, 0.0 }
 0x4d2   : > { %v2017_v23 = vmax.f32 %v1940_v43, 0.0 }
 0x4d3   : > { %v2052_v46 = vpack.c.bf16 %v2016_v45, %v2014_v44 }
 0x4d4   : > { %v2053_v47 = vpack.c.bf16 %v2017_v23, %v2015_v20  ;;  %v1943_v48 = vpop.f32.mrb[88].mxu0 }
 0x4d5   : > { %v1944_v49 = vadd.f32 %v1943_v48, %v5015_v34  ;;  %v1945_v50 = vpop.f32.mrb[89].mxu0 }
 0x4d6   : > { %v1946_v51 = vadd.f32 %v1945_v50, %v5019_v24  ;;  %v1947_v52 = vpop.f32.mrb[90].mxu0  ;;  %2329 = vmatprep.mubr.bf16.mxu1 %v2053_v47 }
 0x4d7   : > { %v1948_v54 = vadd.f32 %v1947_v52, %v5015_v34  ;;  %v1949_v55 = vpop.f32.mrb[91].mxu0  ;;  %2330 = vmatmul.mubr.bf16.gmra.mrb[136].mxu1 %v2052_v46  ;;  %v2018_v57 = vmax.f32 %v1944_v49, 0.0 }
 0x4d8   : > { %v1950_v56 = vadd.f32 %v1949_v55, %v5019_v24  ;;  %v2019_v59 = vmax.f32 %v1946_v51, 0.0 }
 0x4d9   : > { %v2020_v58 = vmax.f32 %v1948_v54, 0.0 }
 0x4da   : > { %v2021_v60 = vmax.f32 %v1950_v56, 0.0 }
 0x4db   : > { %v2054_v53 = vpack.c.bf16 %v2020_v58, %v2018_v57 }
 0x4dc   : > { %v2055_v62 = vpack.c.bf16 %v2021_v60, %v2019_v59  ;;  %v1953_v1 = vpop.f32.mrb[92].mxu0 }
 0x4dd   : > { %v1954_v61 = vadd.f32 %v1953_v1, %v5015_v34  ;;  %v1955_v2 = vpop.f32.mrb[93].mxu0 }
 0x4de   : > { %v1956_v3 = vadd.f32 %v1955_v2, %v5019_v24  ;;  %v1957_v4 = vpop.f32.mrb[94].mxu0  ;;  %2337 = vmatprep.mubr.bf16.mxu1 %v2055_v62 }
 0x4df   : > { %v1958_v5 = vadd.f32 %v1957_v4, %v5015_v34  ;;  %v1959_v6 = vpop.f32.mrb[95].mxu0  ;;  %2338 = vmatmul.mubr.bf16.gmra.mrb[140].mxu1 %v2054_v53  ;;  %v2022_v8 = vmax.f32 %v1954_v61, 0.0 }
 0x4e0   : > { %v1960_v7 = vadd.f32 %v1959_v6, %v5019_v24  ;;  %v2023_v12 = vmax.f32 %v1956_v3, 0.0 }
 0x4e1   : > { %v2024_v11 = vmax.f32 %v1958_v5, 0.0 }
 0x4e2   : > { %v2025_v13 = vmax.f32 %v1960_v7, 0.0 }
 0x4e3   : > { %v2056_v14 = vpack.c.bf16 %v2024_v11, %v2022_v8 }
 0x4e4   : > { %v2057_v15 = vpack.c.bf16 %v2025_v13, %v2023_v12 }
 0x4e6   : > { %2345 = vmatprep.mubr.bf16.mxu1 %v2057_v15 }
 0x4e7   : > { %2346 = vmatmul.mubr.bf16.gmra.mrb[144].mxu1 %v2056_v14 }
 0x542   : > { %v3353_v16 = vpop.f32.mrb[96].mxu0 }
 0x543   : > { %v3354_v0 = vpop.f32.mrb[97].mxu0 }
 0x544   : > { %v3355_v34 = vadd.f32 %v3354_v0, %v3353_v16  ;;  %v3356_v9 = vpop.f32.mrb[98].mxu0 }
 0x545   : > { %v3357_v10 = vpop.f32.mrb[99].mxu0 }
 0x546   : > { %v2228_v24 = vadd.f32 %v3355_v34, %v5088_v17  ;;  %v3358_v18 = vadd.f32 %v3357_v10, %v3356_v9 }
 0x548   : > { %v2231_v22 = vadd.f32 %v3358_v18, %v5088_v17  ;;  %v2354_v25 = vmax.f32 %v2228_v24, 0.0 }
 0x54a   : > { %v2355_v26 = vmax.f32 %v2231_v22, 0.0  ;;  %v3359_v27 = vpop.f32.mrb[100].mxu0 }
 0x54b   : > { %v3360_v28 = vpop.f32.mrb[101].mxu0 }
 0x54c   : > { %v2386_v29 = vpack.c.bf16 %v2355_v26, %v2354_v25  ;;  %v3361_v30 = vadd.f32 %v3360_v28, %v3359_v27  ;;  %v3362_v31 = vpop.f32.mrb[102].mxu0 }
 0x54d   : > { %v3363_v32 = vpop.f32.mrb[103].mxu0 }
 0x54e   : > { %v2236_v33 = vadd.f32 %v3361_v30, %v5088_v17  ;;  %v3364_v35 = vadd.f32 %v3363_v32, %v3362_v31  ;;  %3565 = vmatprep.mubr.msk.bf16.mxu0 %vm910_vm0, %v2386_v29 }
 0x550   : > { %v2239_v63 = vadd.f32 %v3364_v35, %v5088_v17  ;;  %v2356_v36 = vmax.f32 %v2236_v33, 0.0 }
 0x552   : > { %v2357_v37 = vmax.f32 %v2239_v63, 0.0  ;;  %v3365_v38 = vpop.f32.mrb[104].mxu0 }
 0x553   : > { %v3366_v39 = vpop.f32.mrb[105].mxu0 }
 0x554   : > { %v2387_v40 = vpack.c.bf16 %v2357_v37, %v2356_v36  ;;  %v3367_v41 = vadd.f32 %v3366_v39, %v3365_v38  ;;  %v3368_v42 = vpop.f32.mrb[106].mxu0 }
 0x555   : > { %v3369_v43 = vpop.f32.mrb[107].mxu0 }
 0x556   : > { %v2244_v21 = vadd.f32 %v3367_v41, %v5088_v17  ;;  %v3370_v44 = vadd.f32 %v3369_v43, %v3368_v42  ;;  %3566 = vmatmul.mubr.msk.bf16.vlgmr.msra.gmra.mrb[108].mxu0 %vm910_vm0, %v2387_v40 }
 0x558   : > { %v2247_v45 = vadd.f32 %v3370_v44, %v5088_v17  ;;  %v2358_v20 = vmax.f32 %v2244_v21, 0.0 }
 0x55a   : > { %v2359_v23 = vmax.f32 %v2247_v45, 0.0  ;;  %v3371_v46 = vpop.f32.mrb[96].mxu1 }
 0x55b   : > { %v3372_v47 = vpop.f32.mrb[97].mxu1 }
 0x55c   : > { %v2388_v48 = vpack.c.bf16 %v2359_v23, %v2358_v20  ;;  %v3373_v49 = vadd.f32 %v3372_v47, %v3371_v46  ;;  %v3374_v50 = vpop.f32.mrb[98].mxu1 }
 0x55d   : > { %v3375_v51 = vpop.f32.mrb[99].mxu1 }
 0x55e   : > { %v2252_v52 = vadd.f32 %v3373_v49, %v5088_v17  ;;  %v3376_v54 = vadd.f32 %v3375_v51, %v3374_v50  ;;  %3569 = vmatprep.mubr.msk.bf16.mxu0 %vm910_vm0, %v2388_v48 }
 0x560   : > { %v2255_v55 = vadd.f32 %v3376_v54, %v5088_v17  ;;  %v2360_v56 = vmax.f32 %v2252_v52, 0.0 }
 0x562   : > { %v2361_v57 = vmax.f32 %v2255_v55, 0.0  ;;  %v3377_v58 = vpop.f32.mrb[100].mxu1 }
 0x563   : > { %v3378_v59 = vpop.f32.mrb[101].mxu1 }
 0x564   : > { %v2389_v60 = vpack.c.bf16 %v2361_v57, %v2360_v56  ;;  %v3379_v53 = vadd.f32 %v3378_v59, %v3377_v58  ;;  %v3380_v62 = vpop.f32.mrb[102].mxu1 }
 0x565   : > { %v3381_v1 = vpop.f32.mrb[103].mxu1 }
 0x566   : > { %v2260_v61 = vadd.f32 %v3379_v53, %v5088_v17  ;;  %v3382_v2 = vadd.f32 %v3381_v1, %v3380_v62  ;;  %3570 = vmatmul.mubr.msk.bf16.gmra.mrb[112].mxu0 %vm910_vm0, %v2389_v60 }
 0x568   : > { %v2263_v3 = vadd.f32 %v3382_v2, %v5088_v17  ;;  %v2362_v4 = vmax.f32 %v2260_v61, 0.0 }
 0x56a   : > { %v2363_v5 = vmax.f32 %v2263_v3, 0.0  ;;  %v3383_v6 = vpop.f32.mrb[104].mxu1 }
 0x56b   : > { %v3384_v7 = vpop.f32.mrb[105].mxu1 }
 0x56c   : > { %v2390_v8 = vpack.c.bf16 %v2363_v5, %v2362_v4  ;;  %v3385_v11 = vadd.f32 %v3384_v7, %v3383_v6  ;;  %v3386_v12 = vpop.f32.mrb[106].mxu1 }
 0x56d   : > { %v3387_v13 = vpop.f32.mrb[107].mxu1 }
 0x56e   : > { %v2268_v14 = vadd.f32 %v3385_v11, %v5088_v17  ;;  %v3388_v15 = vadd.f32 %v3387_v13, %v3386_v12  ;;  %3573 = vmatprep.mubr.msk.bf16.mxu0 %vm910_vm0, %v2390_v8 }
 0x570   : > { %v2271_v16 = vadd.f32 %v3388_v15, %v5088_v17  ;;  %v2364_v0 = vmax.f32 %v2268_v14, 0.0 }
 0x572   : > { %v2365_v34 = vmax.f32 %v2271_v16, 0.0  ;;  %v3389_v9 = vpop.f32.mrb[108].mxu1 }
 0x573   : > { %v3390_v10 = vpop.f32.mrb[109].mxu1 }
 0x574   : > { %v2391_v24 = vpack.c.bf16 %v2365_v34, %v2364_v0  ;;  %v3391_v18 = vadd.f32 %v3390_v10, %v3389_v9  ;;  %v3392_v22 = vpop.f32.mrb[110].mxu1 }
 0x575   : > { %v3393_v25 = vpop.f32.mrb[111].mxu1 }
 0x576   : > { %v2276_v26 = vadd.f32 %v3391_v18, %v5088_v17  ;;  %v3394_v27 = vadd.f32 %v3393_v25, %v3392_v22  ;;  %3574 = vmatmul.mubr.msk.bf16.gmra.mrb[116].mxu0 %vm910_vm0, %v2391_v24 }
 0x578   : > { %v2279_v28 = vadd.f32 %v3394_v27, %v5088_v17  ;;  %v2366_v29 = vmax.f32 %v2276_v26, 0.0 }
 0x57a   : > { %v2367_v30 = vmax.f32 %v2279_v28, 0.0  ;;  %v3395_v31 = vpop.f32.mrb[112].mxu1 }
 0x57b   : > { %v3396_v32 = vpop.f32.mrb[113].mxu1 }
 0x57c   : > { %v2392_v33 = vpack.c.bf16 %v2367_v30, %v2366_v29  ;;  %v3397_v35 = vadd.f32 %v3396_v32, %v3395_v31  ;;  %v3398_v63 = vpop.f32.mrb[114].mxu1 }
 0x57d   : > { %v3399_v36 = vpop.f32.mrb[115].mxu1 }
 0x57e   : > { %v2284_v37 = vadd.f32 %v3397_v35, %v5088_v17  ;;  %v3400_v38 = vadd.f32 %v3399_v36, %v3398_v63  ;;  %3577 = vmatprep.mubr.msk.bf16.mxu0 %vm910_vm0, %v2392_v33 }
 0x580   : > { %v2287_v39 = vadd.f32 %v3400_v38, %v5088_v17  ;;  %v2368_v40 = vmax.f32 %v2284_v37, 0.0 }
 0x582   : > { %v2369_v41 = vmax.f32 %v2287_v39, 0.0  ;;  %v3401_v42 = vpop.f32.mrb[116].mxu1 }
 0x583   : > { %v3402_v43 = vpop.f32.mrb[117].mxu1 }
 0x584   : > { %v2393_v21 = vpack.c.bf16 %v2369_v41, %v2368_v40  ;;  %v3403_v44 = vadd.f32 %v3402_v43, %v3401_v42  ;;  %v3404_v45 = vpop.f32.mrb[118].mxu1 }
 0x585   : > { %v3405_v20 = vpop.f32.mrb[119].mxu1 }
 0x586   : > { %v2292_v23 = vadd.f32 %v3403_v44, %v5088_v17  ;;  %v3406_v46 = vadd.f32 %v3405_v20, %v3404_v45  ;;  %3578 = vmatmul.mubr.msk.bf16.gmra.mrb[120].mxu0 %vm910_vm0, %v2393_v21 }
 0x588   : > { %v2295_v47 = vadd.f32 %v3406_v46, %v5088_v17  ;;  %v2370_v48 = vmax.f32 %v2292_v23, 0.0 }
 0x58a   : > { %v2371_v49 = vmax.f32 %v2295_v47, 0.0  ;;  %v3407_v50 = vpop.f32.mrb[120].mxu1 }
 0x58b   : > { %v3408_v51 = vpop.f32.mrb[121].mxu1 }
 0x58c   : > { %v2394_v52 = vpack.c.bf16 %v2371_v49, %v2370_v48  ;;  %v3409_v54 = vadd.f32 %v3408_v51, %v3407_v50  ;;  %v3410_v55 = vpop.f32.mrb[122].mxu1 }
 0x58d   : > { %v3411_v56 = vpop.f32.mrb[123].mxu1 }
 0x58e   : > { %v2300_v57 = vadd.f32 %v3409_v54, %v5088_v17  ;;  %v3412_v58 = vadd.f32 %v3411_v56, %v3410_v55  ;;  %3581 = vmatprep.mubr.msk.bf16.mxu0 %vm910_vm0, %v2394_v52 }
 0x590   : > { %v2303_v59 = vadd.f32 %v3412_v58, %v5088_v17  ;;  %v2372_v60 = vmax.f32 %v2300_v57, 0.0 }
 0x592   : > { %v2373_v53 = vmax.f32 %v2303_v59, 0.0  ;;  %v3413_v62 = vpop.f32.mrb[124].mxu1 }
 0x593   : > { %v3414_v1 = vpop.f32.mrb[125].mxu1 }
 0x594   : > { %v2395_v61 = vpack.c.bf16 %v2373_v53, %v2372_v60  ;;  %v3415_v2 = vadd.f32 %v3414_v1, %v3413_v62  ;;  %v3416_v3 = vpop.f32.mrb[126].mxu1 }
 0x595   : > { %v3417_v4 = vpop.f32.mrb[127].mxu1 }
 0x596   : > { %v2308_v5 = vadd.f32 %v3415_v2, %v5088_v17  ;;  %v3418_v6 = vadd.f32 %v3417_v4, %v3416_v3  ;;  %3582 = vmatmul.mubr.msk.bf16.gmra.mrb[124].mxu0 %vm910_vm0, %v2395_v61  ;;  %v5139_v4 = vand.u32 127, %v1186_v19 }
 0x598   : > { %v2311_v7 = vadd.f32 %v3418_v6, %v5088_v17  ;;  %v2374_v8 = vmax.f32 %v2308_v5, 0.0  ;;  %v5144_v5 = vld [vmem:[%s5637_s29] ss:$0 sm:$0xff]  ;;  %vm2652_vm1 = vcmp.lt.s32.totalorder %v5139_v4, 16  ;;  %s4163_s29 = scalar_lea.vmem %s4162_s16, 8192 }
 0x599   : > { %p4165_p0 = scmp.lt.s32.totalorder %s4163_s29, %s4157_s15 }
 0x59a   : > { %v2375_v11 = vmax.f32 %v2311_v7, 0.0  ;;  %v3419_v12 = vpop.f32.mrb[128].mxu1 }
 0x59b   : > { %v3420_v13 = vpop.f32.mrb[129].mxu1  ;;  %p4166_p2 = por %p4165_p0, %p4164_p13 }
 0x59c   : > { %v2396_v14 = vpack.c.bf16 %v2375_v11, %v2374_v8  ;;  %v3421_v15 = vadd.f32 %v3420_v13, %v3419_v12  ;;  %v3422_v16 = vpop.f32.mrb[130].mxu1 }
 0x59d   : > { %v3423_v0 = vpop.f32.mrb[131].mxu1  ;;  %p4167_p8 = pnand %p4166_p2, %p4160_p1 }
 0x59e   : > { %v2316_v34 = vadd.f32 %v3421_v15, %v5088_v17  ;;  %v3424_v9 = vadd.f32 %v3423_v0, %v3422_v16  ;;  %3585 = vmatprep.mubr.msk.bf16.mxu0 %vm910_vm0, %v2396_v14 }
 0x5a0   : > { %v2319_v10 = vadd.f32 %v3424_v9, %v5088_v17  ;;  %v2376_v24 = vmax.f32 %v2316_v34, 0.0 }
 0x5a2   : > { %v2377_v18 = vmax.f32 %v2319_v10, 0.0  ;;  %v3425_v22 = vpop.f32.mrb[132].mxu1 }
 0x5a3   : > { %v3426_v25 = vpop.f32.mrb[133].mxu1 }
 0x5a4   : > { %v2397_v26 = vpack.c.bf16 %v2377_v18, %v2376_v24  ;;  %v3427_v27 = vadd.f32 %v3426_v25, %v3425_v22  ;;  %v3428_v28 = vpop.f32.mrb[134].mxu1 }
 0x5a5   : > { %v3429_v29 = vpop.f32.mrb[135].mxu1 }
 0x5a6   : > { %v2324_v30 = vadd.f32 %v3427_v27, %v5088_v17  ;;  %v3430_v31 = vadd.f32 %v3429_v29, %v3428_v28  ;;  %3586 = vmatmul.mubr.msk.bf16.gmra.mrb[128].mxu0 %vm910_vm0, %v2397_v26 }
 0x5a8   : > { %v2327_v32 = vadd.f32 %v3430_v31, %v5088_v17  ;;  %v2378_v33 = vmax.f32 %v2324_v30, 0.0 }
 0x5aa   : > { %v2379_v35 = vmax.f32 %v2327_v32, 0.0  ;;  %v3431_v63 = vpop.f32.mrb[136].mxu1 }
 0x5ab   : > { %v3432_v36 = vpop.f32.mrb[137].mxu1 }
 0x5ac   : > { %v2398_v37 = vpack.c.bf16 %v2379_v35, %v2378_v33  ;;  %v3433_v38 = vadd.f32 %v3432_v36, %v3431_v63  ;;  %v3434_v39 = vpop.f32.mrb[138].mxu1 }
 0x5ad   : > { %v3435_v40 = vpop.f32.mrb[139].mxu1 }
 0x5ae   : > { %v2332_v41 = vadd.f32 %v3433_v38, %v5088_v17  ;;  %v3436_v42 = vadd.f32 %v3435_v40, %v3434_v39  ;;  %3589 = vmatprep.mubr.msk.bf16.mxu0 %vm910_vm0, %v2398_v37 }
 0x5b0   : > { %v2335_v43 = vadd.f32 %v3436_v42, %v5088_v17  ;;  %v2380_v21 = vmax.f32 %v2332_v41, 0.0 }
 0x5b2   : > { %v2381_v44 = vmax.f32 %v2335_v43, 0.0  ;;  %v3437_v45 = vpop.f32.mrb[140].mxu1 }
 0x5b3   : > { %v3438_v20 = vpop.f32.mrb[141].mxu1 }
 0x5b4   : > { %v2399_v23 = vpack.c.bf16 %v2381_v44, %v2380_v21  ;;  %v3439_v46 = vadd.f32 %v3438_v20, %v3437_v45  ;;  %v3440_v47 = vpop.f32.mrb[142].mxu1 }
 0x5b5   : > { %v3441_v48 = vpop.f32.mrb[143].mxu1 }
 0x5b6   : > { %v2340_v49 = vadd.f32 %v3439_v46, %v5088_v17  ;;  %v3442_v50 = vadd.f32 %v3441_v48, %v3440_v47  ;;  %3590 = vmatmul.mubr.msk.bf16.gmra.mrb[132].mxu0 %vm910_vm0, %v2399_v23 }
 0x5b8   : > { %v2343_v51 = vadd.f32 %v3442_v50, %v5088_v17  ;;  %v2382_v52 = vmax.f32 %v2340_v49, 0.0 }
 0x5ba   : > { %v2383_v54 = vmax.f32 %v2343_v51, 0.0  ;;  %v3443_v55 = vpop.f32.mrb[144].mxu1 }
 0x5bb   : > { %v3444_v56 = vpop.f32.mrb[145].mxu1 }
 0x5bc   : > { %v2400_v57 = vpack.c.bf16 %v2383_v54, %v2382_v52  ;;  %v3445_v58 = vadd.f32 %v3444_v56, %v3443_v55  ;;  %v3446_v59 = vpop.f32.mrb[146].mxu1 }
 0x5bd   : > { %v3447_v60 = vpop.f32.mrb[147].mxu1 }
 0x5be   : > { %v2348_v53 = vadd.f32 %v3445_v58, %v5088_v17  ;;  %v3448_v62 = vadd.f32 %v3447_v60, %v3446_v59  ;;  %3593 = vmatprep.mubr.msk.bf16.mxu0 %vm910_vm0, %v2400_v57 }
 0x5c0   : > { %v2351_v1 = vadd.f32 %v3448_v62, %v5088_v17  ;;  %v2384_v61 = vmax.f32 %v2348_v53, 0.0 }
 0x5c2   : > { %v2385_v2 = vmax.f32 %v2351_v1, 0.0 }
 0x5c4   : > { %v2401_v3 = vpack.c.bf16 %v2385_v2, %v2384_v61 }
 0x5c6   : > { %3594 = vmatmul.mubr.msk.bf16.gmra.mrb[136].mxu0 %vm910_vm0, %v2401_v3 }
 0x629   : > { %v3567_v6 = vpop.f32.mrb[108].mxu0 }
 0x62a   : > { %v2532_v7 = vadd.f32 %v3567_v6, %v5144_v5  ;;  %v2523_v8 = vpop.f32.mrb[109].mxu0 }
 0x62b   : > { %v2524_v17 = vadd.f32 %v5144_v5, %v2523_v8  ;;  %v3568_v11 = vpop.f32.mrb[110].mxu0 }
 0x62c   : > { %v2535_v12 = vadd.f32 %v3568_v11, %v5144_v5  ;;  %v2526_v13 = vpop.f32.mrb[111].mxu0  ;;  %v5152_v19 = vsel %vm2652_vm1, %v2532_v7, -inf }
 0x62d   : > { %v2527_v14 = vadd.f32 %v5144_v5, %v2526_v13  ;;  %2689 = vmax.xlane.f32.xlu1 %v5152_v19  ;;  %v5158_v15 = vsel %vm2652_vm1, %v2524_v17, -inf }
 0x62e   : > { %2685 = vmax.xlane.f32.xlu0 %v5158_v15  ;;  %v5163_v16 = vsel %vm2652_vm1, %v2535_v12, -inf }
 0x62f   : > { %v5168_v0 = vsel %vm2652_vm1, %v2527_v14, -inf }
 0x631   : > { %2691 = vmax.xlane.f32.xlu1 %v5163_v16 }
 0x632   : > { %2687 = vmax.xlane.f32.xlu0 %v5168_v0 }
 0x639   : > { %v3571_v34 = vpop.f32.mrb[112].mxu0 }
 0x63a   : > { %v2548_v9 = vadd.f32 %v3571_v34, %v5144_v5  ;;  %v2539_v10 = vpop.f32.mrb[113].mxu0 }
 0x63b   : > { %v3572_v24 = vpop.f32.mrb[114].mxu0  ;;  %v2540_v18 = vadd.f32 %v5144_v5, %v2539_v10 }
 0x63c   : > { %v2551_v22 = vadd.f32 %v3572_v24, %v5144_v5  ;;  %v2542_v25 = vpop.f32.mrb[115].mxu0  ;;  %v5176_v26 = vsel %vm2652_vm1, %v2548_v9, -inf }
 0x63d   : > { %2697 = vmax.xlane.f32.xlu0 %v5176_v26  ;;  %v2543_v27 = vadd.f32 %v5144_v5, %v2542_v25  ;;  %v5187_v29 = vsel %vm2652_vm1, %v2540_v18, -inf }
 0x63e   : > { %v5182_v28 = vsel %vm2652_vm1, %v2551_v22, -inf }
 0x63f   : > { %2699 = vmax.xlane.f32.xlu1 %v5182_v28  ;;  %v5192_v30 = vsel %vm2652_vm1, %v2543_v27, -inf }
 0x641   : > { %2693 = vmax.xlane.f32.xlu0 %v5187_v29 }
 0x643   : > { %2695 = vmax.xlane.f32.xlu1 %v5192_v30 }
 0x649   : > { %v3575_v31 = vpop.f32.mrb[116].mxu0 }
 0x64a   : > { %v2564_v32 = vadd.f32 %v3575_v31, %v5144_v5  ;;  %v2555_v33 = vpop.f32.mrb[117].mxu0 }
 0x64b   : > { %v3576_v35 = vpop.f32.mrb[118].mxu0  ;;  %v2556_v63 = vadd.f32 %v5144_v5, %v2555_v33 }
 0x64c   : > { %v2567_v36 = vadd.f32 %v3576_v35, %v5144_v5  ;;  %v2558_v37 = vpop.f32.mrb[119].mxu0  ;;  %v5200_v38 = vsel %vm2652_vm1, %v2564_v32, -inf }
 0x64d   : > { %2705 = vmax.xlane.f32.xlu0 %v5200_v38  ;;  %v2559_v39 = vadd.f32 %v5144_v5, %v2558_v37  ;;  %v5211_v41 = vsel %vm2652_vm1, %v2556_v63, -inf }
 0x64e   : > { %v5206_v40 = vsel %vm2652_vm1, %v2567_v36, -inf }
 0x64f   : > { %2707 = vmax.xlane.f32.xlu1 %v5206_v40  ;;  %v5216_v42 = vsel %vm2652_vm1, %v2559_v39, -inf }
 0x651   : > { %2701 = vmax.xlane.f32.xlu0 %v5211_v41 }
 0x653   : > { %2703 = vmax.xlane.f32.xlu1 %v5216_v42 }
 0x659   : > { %v3579_v43 = vpop.f32.mrb[120].mxu0 }
 0x65a   : > { %v2580_v21 = vadd.f32 %v3579_v43, %v5144_v5  ;;  %v2571_v44 = vpop.f32.mrb[121].mxu0 }
 0x65b   : > { %v3580_v45 = vpop.f32.mrb[122].mxu0  ;;  %v2572_v20 = vadd.f32 %v5144_v5, %v2571_v44 }
 0x65c   : > { %v2583_v23 = vadd.f32 %v3580_v45, %v5144_v5  ;;  %v2574_v46 = vpop.f32.mrb[123].mxu0  ;;  %v5224_v47 = vsel %vm2652_vm1, %v2580_v21, -inf }
 0x65d   : > { %2713 = vmax.xlane.f32.xlu0 %v5224_v47  ;;  %v2575_v48 = vadd.f32 %v5144_v5, %v2574_v46  ;;  %v5235_v50 = vsel %vm2652_vm1, %v2572_v20, -inf }
 0x65e   : > { %v5230_v49 = vsel %vm2652_vm1, %v2583_v23, -inf }
 0x65f   : > { %2715 = vmax.xlane.f32.xlu1 %v5230_v49  ;;  %v5240_v51 = vsel %vm2652_vm1, %v2575_v48, -inf }
 0x661   : > { %2709 = vmax.xlane.f32.xlu0 %v5235_v50 }
 0x663   : > { %2711 = vmax.xlane.f32.xlu1 %v5240_v51 }
 0x669   : > { %v3583_v52 = vpop.f32.mrb[124].mxu0 }
 0x66a   : > { %v2596_v54 = vadd.f32 %v3583_v52, %v5144_v5  ;;  %v2587_v55 = vpop.f32.mrb[125].mxu0 }
 0x66b   : > { %v3584_v56 = vpop.f32.mrb[126].mxu0  ;;  %v2588_v57 = vadd.f32 %v5144_v5, %v2587_v55 }
 0x66c   : > { %v2599_v58 = vadd.f32 %v3584_v56, %v5144_v5  ;;  %v2590_v59 = vpop.f32.mrb[127].mxu0  ;;  %v5248_v60 = vsel %vm2652_vm1, %v2596_v54, -inf }
 0x66d   : > { %2721 = vmax.xlane.f32.xlu0 %v5248_v60  ;;  %v2591_v53 = vadd.f32 %v5144_v5, %v2590_v59  ;;  %v5259_v1 = vsel %vm2652_vm1, %v2588_v57, -inf }
 0x66e   : > { %v5254_v62 = vsel %vm2652_vm1, %v2599_v58, -inf }
 0x66f   : > { %2723 = vmax.xlane.f32.xlu1 %v5254_v62  ;;  %v5264_v61 = vsel %vm2652_vm1, %v2591_v53, -inf }
 0x671   : > { %2717 = vmax.xlane.f32.xlu0 %v5259_v1 }
 0x673   : > { %2719 = vmax.xlane.f32.xlu1 %v5264_v61 }
 0x679   : > { %v3587_v2 = vpop.f32.mrb[128].mxu0 }
 0x67a   : > { %v2612_v3 = vadd.f32 %v3587_v2, %v5144_v5  ;;  %v2603_v6 = vpop.f32.mrb[129].mxu0 }
 0x67b   : > { %v3588_v7 = vpop.f32.mrb[130].mxu0  ;;  %v2604_v8 = vadd.f32 %v5144_v5, %v2603_v6 }
 0x67c   : > { %v2615_v17 = vadd.f32 %v3588_v7, %v5144_v5  ;;  %v2606_v11 = vpop.f32.mrb[131].mxu0  ;;  %v5272_v12 = vsel %vm2652_vm1, %v2612_v3, -inf }
 0x67d   : > { %2729 = vmax.xlane.f32.xlu0 %v5272_v12  ;;  %v2607_v13 = vadd.f32 %v5144_v5, %v2606_v11  ;;  %v5283_v34 = vsel %vm2652_vm1, %v2604_v8, -inf }
 0x67e   : > { %v5278_v14 = vsel %vm2652_vm1, %v2615_v17, -inf }
 0x67f   : > { %2731 = vmax.xlane.f32.xlu1 %v5278_v14  ;;  %v5288_v9 = vsel %vm2652_vm1, %v2607_v13, -inf }
 0x681   : > { %2725 = vmax.xlane.f32.xlu0 %v5283_v34 }
 0x683   : > { %2727 = vmax.xlane.f32.xlu1 %v5288_v9 }
 0x689   : > { %v3591_v10 = vpop.f32.mrb[132].mxu0 }
 0x68a   : > { %v2628_v24 = vadd.f32 %v3591_v10, %v5144_v5  ;;  %v2619_v18 = vpop.f32.mrb[133].mxu0 }
 0x68b   : > { %v3592_v22 = vpop.f32.mrb[134].mxu0  ;;  %v2620_v25 = vadd.f32 %v5144_v5, %v2619_v18 }
 0x68c   : > { %v2631_v27 = vadd.f32 %v3592_v22, %v5144_v5  ;;  %v2622_v31 = vpop.f32.mrb[135].mxu0  ;;  %v5296_v32 = vsel %vm2652_vm1, %v2628_v24, -inf }
 0x68d   : > { %2737 = vmax.xlane.f32.xlu0 %v5296_v32  ;;  %v2623_v33 = vadd.f32 %v5144_v5, %v2622_v31  ;;  %v5307_v63 = vsel %vm2652_vm1, %v2620_v25, -inf }
 0x68e   : > { %v5302_v35 = vsel %vm2652_vm1, %v2631_v27, -inf }
 0x68f   : > { %2739 = vmax.xlane.f32.xlu1 %v5302_v35  ;;  %v5312_v36 = vsel %vm2652_vm1, %v2623_v33, -inf }
 0x691   : > { %2733 = vmax.xlane.f32.xlu0 %v5307_v63 }
 0x693   : > { %2735 = vmax.xlane.f32.xlu1 %v5312_v36 }
 0x699   : > { %v3595_v37 = vpop.f32.mrb[136].mxu0 }
 0x69a   : > { %v2635_v39 = vpop.f32.mrb[137].mxu0  ;;  %v2644_v45 = vadd.f32 %v3595_v37, %v5144_v5 }
 0x69b   : > { %v2636_v43 = vadd.f32 %v5144_v5, %v2635_v39  ;;  %v3596_v21 = vpop.f32.mrb[138].mxu0 }
 0x69c   : > { %v2638_v44 = vpop.f32.mrb[139].mxu0  ;;  %v2647_v46 = vadd.f32 %v3596_v21, %v5144_v5  ;;  %v5331_v52 = vsel %vm2652_vm1, %v2644_v45, -inf }
 0x69d   : > { %v2639_v20 = vadd.f32 %v5144_v5, %v2638_v44  ;;  %v5320_v23 = vsel %vm2652_vm1, %v2636_v43, -inf }
 0x69e   : > { %2741 = vmax.xlane.f32.xlu0 %v5320_v23  ;;  %v5336_v54 = vsel %vm2652_vm1, %v2647_v46, -inf }
 0x69f   : > { %v5326_v48 = vsel %vm2652_vm1, %v2639_v20, -inf }
 0x6a0   : > { %2743 = vmax.xlane.f32.xlu1 %v5326_v48 }
 0x6a2   : > { %2745 = vmax.xlane.f32.xlu0 %v5331_v52 }
 0x6a4   : > { %2747 = vmax.xlane.f32.xlu1 %v5336_v54 }
 0x6ba   : > { %v2690_v55 = vpop.xlane.xlu1 %2689 }
 0x6bb   : > { %v2751_v5 = vsub.f32 %v5152_v19, %v2690_v55  ;;  %v2686_v56 = vpop.xlane.xlu0 %2685 }
 0x6bc   : > { %v2749_v57 = vsub.f32 %v5158_v15, %v2686_v56 }
 0x6bd   : > { %v2785_v58 = vmul.f32 1.442695, %v2751_v5 }
 0x6be   : > { %v2781_v59 = vmul.f32 1.442695, %v2749_v57  ;;  %v2692_v53 = vpop.xlane.xlu1 %2691 }
 0x6bf   : > { %3831 = vpow2.f32 %v2785_v58  ;;  %v2752_v2 = vsub.f32 %v5163_v16, %v2692_v53  ;;  %v2688_v3 = vpop.xlane.xlu0 %2687 }
 0x6c0   : > { %v2750_v6 = vsub.f32 %v5168_v0, %v2688_v3  ;;  %3833 = vpow2.f32 %v2781_v59 }
 0x6c1   : > { %v2787_v4 = vmul.f32 1.442695, %v2752_v2 }
 0x6c2   : > { %v2783_v7 = vmul.f32 1.442695, %v2750_v6 }
 0x6c3   : > { %3835 = vpow2.f32 %v2787_v4 }
 0x6c4   : > { %3837 = vpow2.f32 %v2783_v7 }
 0x6c9   : > { %v5343_v8 = vpop.eup %3831 }
 0x6ca   : > { %2849 = vadd.xlane.f32.xlu0 %v5343_v8  ;;  %v2698_v19 = vpop.xlane.xlu0 %2697  ;;  %v5347_v17 = vpop.eup %3833 }
 0x6cb   : > { %v2755_v15 = vsub.f32 %v5176_v26, %v2698_v19 }
 0x6cc   : > { %v2700_v11 = vpop.xlane.xlu1 %2699 }
 0x6cd   : > { %v5349_v13 = vpop.eup %3835  ;;  %v2793_v16 = vmul.f32 1.442695, %v2755_v15  ;;  %v2756_v0 = vsub.f32 %v5182_v28, %v2700_v11 }
 0x6ce   : > { %2851 = vadd.xlane.f32.xlu1 %v5349_v13  ;;  %2845 = vadd.xlane.f32.xlu0 %v5347_v17  ;;  %v2694_v10 = vpop.xlane.xlu0 %2693  ;;  %v5355_v25 = vpop.eup %3837 }
 0x6cf   : > { %3839 = vpow2.f32 %v2793_v16  ;;  %v2795_v24 = vmul.f32 1.442695, %v2756_v0  ;;  %v2753_v18 = vsub.f32 %v5187_v29, %v2694_v10 }
 0x6d0   : > { %v2696_v22 = vpop.xlane.xlu1 %2695 }
 0x6d1   : > { %3841 = vpow2.f32 %v2795_v24  ;;  %v2789_v26 = vmul.f32 1.442695, %v2753_v18  ;;  %v2754_v27 = vsub.f32 %v5192_v30, %v2696_v22 }
 0x6d2   : > { %2847 = vadd.xlane.f32.xlu1 %v5355_v25 }
 0x6d3   : > { %3843 = vpow2.f32 %v2789_v26  ;;  %v2791_v28 = vmul.f32 1.442695, %v2754_v27 }
 0x6d5   : > { %3845 = vpow2.f32 %v2791_v28 }
 0x6d9   : > { %v5359_v31 = vpop.eup %3839 }
 0x6da   : > { %2857 = vadd.xlane.f32.xlu0 %v5359_v31  ;;  %v2706_v33 = vpop.xlane.xlu0 %2705 }
 0x6db   : > { %v5362_v37 = vpop.eup %3841  ;;  %v2759_v29 = vsub.f32 %v5200_v38, %v2706_v33 }
 0x6dc   : > { %v2708_v39 = vpop.xlane.xlu1 %2707  ;;  %2859 = vadd.xlane.f32.xlu1 %v5362_v37 }
 0x6dd   : > { %v5366_v43 = vpop.eup %3843  ;;  %v2801_v30 = vmul.f32 1.442695, %v2759_v29  ;;  %v2760_v21 = vsub.f32 %v5206_v40, %v2708_v39 }
 0x6de   : > { %2853 = vadd.xlane.f32.xlu0 %v5366_v43  ;;  %v2702_v44 = vpop.xlane.xlu0 %2701 }
 0x6df   : > { %v5370_v45 = vpop.eup %3845  ;;  %3847 = vpow2.f32 %v2801_v30  ;;  %v2803_v20 = vmul.f32 1.442695, %v2760_v21  ;;  %v2757_v46 = vsub.f32 %v5211_v41, %v2702_v44 }
 0x6e0   : > { %v2704_v55 = vpop.xlane.xlu1 %2703  ;;  %2855 = vadd.xlane.f32.xlu1 %v5370_v45 }
 0x6e1   : > { %3849 = vpow2.f32 %v2803_v20  ;;  %v2797_v38 = vmul.f32 1.442695, %v2757_v46  ;;  %v2758_v5 = vsub.f32 %v5216_v42, %v2704_v55 }
 0x6e3   : > { %3851 = vpow2.f32 %v2797_v38  ;;  %v2799_v56 = vmul.f32 1.442695, %v2758_v5 }
 0x6e5   : > { %3853 = vpow2.f32 %v2799_v56 }
 0x6e9   : > { %v5375_v40 = vpop.eup %3847 }
 0x6ea   : > { %2865 = vadd.xlane.f32.xlu0 %v5375_v40  ;;  %v2714_v57 = vpop.xlane.xlu0 %2713 }
 0x6eb   : > { %v5378_v58 = vpop.eup %3849  ;;  %v2763_v59 = vsub.f32 %v5224_v47, %v2714_v57 }
 0x6ec   : > { %v2716_v41 = vpop.xlane.xlu1 %2715  ;;  %2867 = vadd.xlane.f32.xlu1 %v5378_v58 }
 0x6ed   : > { %v5382_v53 = vpop.eup %3851  ;;  %v2809_v2 = vmul.f32 1.442695, %v2763_v59  ;;  %v2764_v42 = vsub.f32 %v5230_v49, %v2716_v41 }
 0x6ee   : > { %2861 = vadd.xlane.f32.xlu0 %v5382_v53  ;;  %v2710_v3 = vpop.xlane.xlu0 %2709 }
 0x6ef   : > { %v5386_v6 = vpop.eup %3853  ;;  %3855 = vpow2.f32 %v2809_v2  ;;  %v2811_v4 = vmul.f32 1.442695, %v2764_v42  ;;  %v2761_v7 = vsub.f32 %v5235_v50, %v2710_v3 }
 0x6f0   : > { %v2712_v19 = vpop.xlane.xlu1 %2711  ;;  %2863 = vadd.xlane.f32.xlu1 %v5386_v6 }
 0x6f1   : > { %3857 = vpow2.f32 %v2811_v4  ;;  %v2805_v47 = vmul.f32 1.442695, %v2761_v7  ;;  %v2762_v15 = vsub.f32 %v5240_v51, %v2712_v19 }
 0x6f3   : > { %3859 = vpow2.f32 %v2805_v47  ;;  %v2807_v11 = vmul.f32 1.442695, %v2762_v15 }
 0x6f5   : > { %3861 = vpow2.f32 %v2807_v11 }
 0x6f9   : > { %v5391_v49 = vpop.eup %3855 }
 0x6fa   : > { %2873 = vadd.xlane.f32.xlu0 %v5391_v49  ;;  %v2722_v16 = vpop.xlane.xlu0 %2721 }
 0x6fb   : > { %v5394_v0 = vpop.eup %3857  ;;  %v2767_v10 = vsub.f32 %v5248_v60, %v2722_v16 }
 0x6fc   : > { %v2724_v50 = vpop.xlane.xlu1 %2723  ;;  %2875 = vadd.xlane.f32.xlu1 %v5394_v0 }
 0x6fd   : > { %v5398_v24 = vpop.eup %3859  ;;  %v2817_v18 = vmul.f32 1.442695, %v2767_v10  ;;  %v2768_v51 = vsub.f32 %v5254_v62, %v2724_v50 }
 0x6fe   : > { %2869 = vadd.xlane.f32.xlu0 %v5398_v24  ;;  %v2718_v22 = vpop.xlane.xlu0 %2717 }
 0x6ff   : > { %v5402_v26 = vpop.eup %3861  ;;  %3863 = vpow2.f32 %v2817_v18  ;;  %v2819_v27 = vmul.f32 1.442695, %v2768_v51  ;;  %v2765_v28 = vsub.f32 %v5259_v1, %v2718_v22 }
 0x700   : > { %v2720_v33 = vpop.xlane.xlu1 %2719  ;;  %2871 = vadd.xlane.f32.xlu1 %v5402_v26 }
 0x701   : > { %3865 = vpow2.f32 %v2819_v27  ;;  %v2813_v60 = vmul.f32 1.442695, %v2765_v28  ;;  %v2766_v29 = vsub.f32 %v5264_v61, %v2720_v33 }
 0x703   : > { %3867 = vpow2.f32 %v2813_v60  ;;  %v2815_v39 = vmul.f32 1.442695, %v2766_v29 }
 0x705   : > { %3869 = vpow2.f32 %v2815_v39 }
 0x709   : > { %v5407_v62 = vpop.eup %3863 }
 0x70a   : > { %2881 = vadd.xlane.f32.xlu0 %v5407_v62  ;;  %v2730_v30 = vpop.xlane.xlu0 %2729 }
 0x70b   : > { %v5410_v21 = vpop.eup %3865  ;;  %v2771_v44 = vsub.f32 %v5272_v12, %v2730_v30 }
 0x70c   : > { %v2732_v1 = vpop.xlane.xlu1 %2731  ;;  %2883 = vadd.xlane.f32.xlu1 %v5410_v21 }
 0x70d   : > { %v5414_v20 = vpop.eup %3867  ;;  %v2825_v46 = vmul.f32 1.442695, %v2771_v44  ;;  %v2772_v61 = vsub.f32 %v5278_v14, %v2732_v1 }
 0x70e   : > { %2877 = vadd.xlane.f32.xlu0 %v5414_v20  ;;  %v2726_v55 = vpop.xlane.xlu0 %2725 }
 0x70f   : > { %v5418_v38 = vpop.eup %3869  ;;  %3871 = vpow2.f32 %v2825_v46  ;;  %v2827_v5 = vmul.f32 1.442695, %v2772_v61  ;;  %v2769_v56 = vsub.f32 %v5283_v34, %v2726_v55 }
 0x710   : > { %v2728_v57 = vpop.xlane.xlu1 %2727  ;;  %2879 = vadd.xlane.f32.xlu1 %v5418_v38 }
 0x711   : > { %3873 = vpow2.f32 %v2827_v5  ;;  %v2821_v12 = vmul.f32 1.442695, %v2769_v56  ;;  %v2770_v59 = vsub.f32 %v5288_v9, %v2728_v57 }
 0x713   : > { %3875 = vpow2.f32 %v2821_v12  ;;  %v2823_v41 = vmul.f32 1.442695, %v2770_v59 }
 0x715   : > { %3877 = vpow2.f32 %v2823_v41 }
 0x719   : > { %v5423_v14 = vpop.eup %3871 }
 0x71a   : > { %2889 = vadd.xlane.f32.xlu0 %v5423_v14  ;;  %v2738_v2 = vpop.xlane.xlu0 %2737 }
 0x71b   : > { %v5426_v42 = vpop.eup %3873  ;;  %v2775_v3 = vsub.f32 %v5296_v32, %v2738_v2 }
 0x71c   : > { %v2740_v34 = vpop.xlane.xlu1 %2739  ;;  %2891 = vadd.xlane.f32.xlu1 %v5426_v42 }
 0x71d   : > { %v5430_v4 = vpop.eup %3875  ;;  %v2833_v7 = vmul.f32 1.442695, %v2775_v3  ;;  %v2776_v9 = vsub.f32 %v5302_v35, %v2740_v34 }
 0x71e   : > { %2885 = vadd.xlane.f32.xlu0 %v5430_v4  ;;  %v2734_v19 = vpop.xlane.xlu0 %2733 }
 0x71f   : > { %v5434_v47 = vpop.eup %3877  ;;  %3879 = vpow2.f32 %v2833_v7  ;;  %v2835_v15 = vmul.f32 1.442695, %v2776_v9  ;;  %v2773_v11 = vsub.f32 %v5307_v63, %v2734_v19 }
 0x720   : > { %v2736_v16 = vpop.xlane.xlu1 %2735  ;;  %2887 = vadd.xlane.f32.xlu1 %v5434_v47 }
 0x721   : > { %3881 = vpow2.f32 %v2835_v15  ;;  %v2829_v32 = vmul.f32 1.442695, %v2773_v11  ;;  %v2774_v10 = vsub.f32 %v5312_v36, %v2736_v16 }
 0x723   : > { %3883 = vpow2.f32 %v2829_v32  ;;  %v2831_v50 = vmul.f32 1.442695, %v2774_v10 }
 0x725   : > { %3885 = vpow2.f32 %v2831_v50 }
 0x729   : > { %v5439_v35 = vpop.eup %3879 }
 0x72a   : > { %2897 = vadd.xlane.f32.xlu0 %v5439_v35 }
 0x72b   : > { %v5442_v18 = vpop.eup %3881  ;;  %v2742_v51 = vpop.xlane.xlu0 %2741 }
 0x72c   : > { %v2777_v22 = vsub.f32 %v5320_v23, %v2742_v51  ;;  %2899 = vadd.xlane.f32.xlu1 %v5442_v18 }
 0x72d   : > { %v5446_v63 = vpop.eup %3883  ;;  %v2744_v27 = vpop.xlane.xlu1 %2743 }
 0x72e   : > { %v2837_v28 = vmul.f32 1.442695, %v2777_v22  ;;  %v2778_v36 = vsub.f32 %v5326_v48, %v2744_v27  ;;  %2893 = vadd.xlane.f32.xlu0 %v5446_v63 }
 0x72f   : > { %v5450_v33 = vpop.eup %3885  ;;  %v2746_v60 = vpop.xlane.xlu0 %2745 }
 0x730   : > { %3887 = vpow2.f32 %v2837_v28  ;;  %v2839_v29 = vmul.f32 1.442695, %v2778_v36  ;;  %v2779_v39 = vsub.f32 %v5331_v52, %v2746_v60  ;;  %2895 = vadd.xlane.f32.xlu1 %v5450_v33 }
 0x731   : > { %v2748_v23 = vpop.xlane.xlu1 %2747 }
 0x732   : > { %3889 = vpow2.f32 %v2839_v29  ;;  %v2841_v30 = vmul.f32 1.442695, %v2779_v39  ;;  %v2780_v44 = vsub.f32 %v5336_v54, %v2748_v23 }
 0x734   : > { %3891 = vpow2.f32 %v2841_v30  ;;  %v2843_v1 = vmul.f32 1.442695, %v2780_v44 }
 0x736   : > { %3893 = vpow2.f32 %v2843_v1 }
 0x73a   : > { %v5455_v48 = vpop.eup %3887 }
 0x73b   : > { %2901 = vadd.xlane.f32.xlu0 %v5455_v48 }
 0x73c   : > { %v5458_v46 = vpop.eup %3889 }
 0x73d   : > { %2903 = vadd.xlane.f32.xlu1 %v5458_v46 }
 0x73e   : > { %v5461_v52 = vpop.eup %3891 }
 0x73f   : > { %2905 = vadd.xlane.f32.xlu0 %v5461_v52 }
 0x740   : > { %v5464_v61 = vpop.eup %3893 }
 0x741   : > { %2907 = vadd.xlane.f32.xlu1 %v5464_v61 }
 0x757   : > { %v2850_v54 = vpop.xlane.xlu0 %2849 }
 0x758   : > { %3895 = vrcp.f32 %v2850_v54 }
 0x75b   : > { %v2852_v55 = vpop.xlane.xlu1 %2851  ;;  %v2846_v5 = vpop.xlane.xlu0 %2845 }
 0x75c   : > { %3897 = vrcp.f32 %v2852_v55 }
 0x75d   : > { %3899 = vrcp.f32 %v2846_v5 }
 0x75f   : > { %v2848_v56 = vpop.xlane.xlu1 %2847 }
 0x760   : > { %3901 = vrcp.f32 %v2848_v56 }
 0x762   : > { %v3896_v57 = vpop.eup %3895 }
 0x763   : > { %v2943_v12 = vmul.f32 %v3896_v57, %v5343_v8 }
 0x765   : > { %2975 = vst [vmem:[%s5470_s21 + $0x10] sm:$0xff] %v2943_v12 }
 0x766   : > { %v3898_v59 = vpop.eup %3897 }
 0x767   : > { %v3900_v41 = vpop.eup %3899  ;;  %v2944_v2 = vmul.f32 %v3898_v59, %v5349_v13  ;;  %v2858_v3 = vpop.xlane.xlu0 %2857 }
 0x768   : > { %v2941_v34 = vmul.f32 %v3900_v41, %v5347_v17  ;;  %3903 = vrcp.f32 %v2858_v3 }
 0x769   : > { %2976 = vst [vmem:[%s5470_s21 + $0x18] sm:$0xff] %v2944_v2  ;;  %v2860_v7 = vpop.xlane.xlu1 %2859 }
 0x76a   : > { %v3902_v8 = vpop.eup %3901  ;;  %2973 = vst [vmem:[%s5470_s21] sm:$0xff] %v2941_v34  ;;  %3905 = vrcp.f32 %v2860_v7 }
 0x76b   : > { %v2942_v9 = vmul.f32 %v3902_v8, %v5355_v25  ;;  %v2854_v19 = vpop.xlane.xlu0 %2853 }
 0x76c   : > { %3907 = vrcp.f32 %v2854_v19 }
 0x76d   : > { %2974 = vst [vmem:[%s5470_s21 + $0x8] sm:$0xff] %v2942_v9  ;;  %v2856_v15 = vpop.xlane.xlu1 %2855 }
 0x76e   : > { %3909 = vrcp.f32 %v2856_v15 }
 0x772   : > { %v3904_v13 = vpop.eup %3903 }
 0x773   : > { %v2947_v17 = vmul.f32 %v3904_v13, %v5359_v31 }
 0x774   : > { %v3906_v11 = vpop.eup %3905 }
 0x775   : > { %2979 = vst [vmem:[%s5470_s21 + $0x30] sm:$0xff] %v2947_v17  ;;  %v2948_v16 = vmul.f32 %v3906_v11, %v5362_v37 }
 0x776   : > { %v3908_v32 = vpop.eup %3907 }
 0x777   : > { %2980 = vst [vmem:[%s5470_s21 + $0x38] sm:$0xff] %v2948_v16  ;;  %v2945_v10 = vmul.f32 %v3908_v32, %v5366_v43  ;;  %v2866_v25 = vpop.xlane.xlu0 %2865 }
 0x778   : > { %v3910_v50 = vpop.eup %3909  ;;  %3911 = vrcp.f32 %v2866_v25 }
 0x779   : > { %2977 = vst [vmem:[%s5470_s21 + $0x20] sm:$0xff] %v2945_v10  ;;  %v2946_v51 = vmul.f32 %v3910_v50, %v5370_v45  ;;  %v2868_v22 = vpop.xlane.xlu1 %2867 }
 0x77a   : > { %3913 = vrcp.f32 %v2868_v22 }
 0x77b   : > { %2978 = vst [vmem:[%s5470_s21 + $0x28] sm:$0xff] %v2946_v51  ;;  %v2862_v31 = vpop.xlane.xlu0 %2861 }
 0x77c   : > { %3915 = vrcp.f32 %v2862_v31 }
 0x77d   : > { %v2864_v27 = vpop.xlane.xlu1 %2863 }
 0x77e   : > { %3917 = vrcp.f32 %v2864_v27 }
 0x782   : > { %v3912_v37 = vpop.eup %3911 }
 0x783   : > { %v2951_v43 = vmul.f32 %v3912_v37, %v5375_v40 }
 0x784   : > { %v3914_v28 = vpop.eup %3913 }
 0x785   : > { %2983 = vst [vmem:[%s5470_s21 + $0x50] sm:$0xff] %v2951_v43  ;;  %v2952_v36 = vmul.f32 %v3914_v28, %v5378_v58 }
 0x786   : > { %v3916_v60 = vpop.eup %3915 }
 0x787   : > { %2984 = vst [vmem:[%s5470_s21 + $0x58] sm:$0xff] %v2952_v36  ;;  %v2949_v45 = vmul.f32 %v3916_v60, %v5382_v53  ;;  %v2874_v29 = vpop.xlane.xlu0 %2873 }
 0x788   : > { %v3918_v39 = vpop.eup %3917  ;;  %3919 = vrcp.f32 %v2874_v29 }
 0x789   : > { %2981 = vst [vmem:[%s5470_s21 + $0x40] sm:$0xff] %v2949_v45  ;;  %v2950_v23 = vmul.f32 %v3918_v39, %v5386_v6  ;;  %v2876_v30 = vpop.xlane.xlu1 %2875 }
 0x78a   : > { %3921 = vrcp.f32 %v2876_v30 }
 0x78b   : > { %2982 = vst [vmem:[%s5470_s21 + $0x48] sm:$0xff] %v2950_v23  ;;  %v2870_v40 = vpop.xlane.xlu0 %2869 }
 0x78c   : > { %3923 = vrcp.f32 %v2870_v40 }
 0x78d   : > { %v2872_v44 = vpop.xlane.xlu1 %2871 }
 0x78e   : > { %3925 = vrcp.f32 %v2872_v44 }
 0x792   : > { %v3920_v58 = vpop.eup %3919 }
 0x793   : > { %v2955_v53 = vmul.f32 %v3920_v58, %v5391_v49 }
 0x794   : > { %v3922_v1 = vpop.eup %3921 }
 0x795   : > { %2987 = vst [vmem:[%s5470_s21 + $0x70] sm:$0xff] %v2955_v53  ;;  %v2956_v54 = vmul.f32 %v3922_v1, %v5394_v0 }
 0x796   : > { %v3924_v55 = vpop.eup %3923 }
 0x797   : > { %2988 = vst [vmem:[%s5470_s21 + $0x78] sm:$0xff] %v2956_v54  ;;  %v2953_v6 = vmul.f32 %v3924_v55, %v5398_v24  ;;  %v2882_v5 = vpop.xlane.xlu0 %2881 }
 0x798   : > { %v3926_v56 = vpop.eup %3925  ;;  %3927 = vrcp.f32 %v2882_v5 }
 0x799   : > { %2985 = vst [vmem:[%s5470_s21 + $0x60] sm:$0xff] %v2953_v6  ;;  %v2954_v57 = vmul.f32 %v3926_v56, %v5402_v26  ;;  %v2884_v12 = vpop.xlane.xlu1 %2883 }
 0x79a   : > { %3929 = vrcp.f32 %v2884_v12 }
 0x79b   : > { %2986 = vst [vmem:[%s5470_s21 + $0x68] sm:$0xff] %v2954_v57  ;;  %v2878_v49 = vpop.xlane.xlu0 %2877 }
 0x79c   : > { %3931 = vrcp.f32 %v2878_v49 }
 0x79d   : > { %v2880_v59 = vpop.xlane.xlu1 %2879 }
 0x79e   : > { %3933 = vrcp.f32 %v2880_v59 }
 0x7a2   : > { %v3928_v0 = vpop.eup %3927 }
 0x7a3   : > { %v2959_v24 = vmul.f32 %v3928_v0, %v5407_v62 }
 0x7a4   : > { %v3930_v41 = vpop.eup %3929 }
 0x7a5   : > { %2991 = vst [vmem:[%s5470_s21 + $0x90] sm:$0xff] %v2959_v24  ;;  %v2960_v2 = vmul.f32 %v3930_v41, %v5410_v21 }
 0x7a6   : > { %v3932_v3 = vpop.eup %3931 }
 0x7a7   : > { %2992 = vst [vmem:[%s5470_s21 + $0x98] sm:$0xff] %v2960_v2  ;;  %v2957_v26 = vmul.f32 %v3932_v3, %v5414_v20  ;;  %v2890_v34 = vpop.xlane.xlu0 %2889 }
 0x7a8   : > { %v3934_v7 = vpop.eup %3933  ;;  %3935 = vrcp.f32 %v2890_v34 }
 0x7a9   : > { %2989 = vst [vmem:[%s5470_s21 + $0x80] sm:$0xff] %v2957_v26  ;;  %v2958_v8 = vmul.f32 %v3934_v7, %v5418_v38  ;;  %v2892_v9 = vpop.xlane.xlu1 %2891 }
 0x7aa   : > { %3937 = vrcp.f32 %v2892_v9 }
 0x7ab   : > { %2990 = vst [vmem:[%s5470_s21 + $0x88] sm:$0xff] %v2958_v8  ;;  %v2886_v62 = vpop.xlane.xlu0 %2885 }
 0x7ac   : > { %3939 = vrcp.f32 %v2886_v62 }
 0x7ad   : > { %v2888_v19 = vpop.xlane.xlu1 %2887 }
 0x7ae   : > { %3941 = vrcp.f32 %v2888_v19 }
 0x7b2   : > { %v3936_v21 = vpop.eup %3935 }
 0x7b3   : > { %v2963_v20 = vmul.f32 %v3936_v21, %v5423_v14 }
 0x7b4   : > { %v3938_v15 = vpop.eup %3937 }
 0x7b5   : > { %2995 = vst [vmem:[%s5470_s21 + $0xb0] sm:$0xff] %v2963_v20  ;;  %v2964_v13 = vmul.f32 %v3938_v15, %v5426_v42 }
 0x7b6   : > { %v3940_v17 = vpop.eup %3939 }
 0x7b7   : > { %2996 = vst [vmem:[%s5470_s21 + $0xb8] sm:$0xff] %v2964_v13  ;;  %v2961_v38 = vmul.f32 %v3940_v17, %v5430_v4  ;;  %v2898_v11 = vpop.xlane.xlu0 %2897 }
 0x7b8   : > { %v3942_v16 = vpop.eup %3941  ;;  %3943 = vrcp.f32 %v2898_v11 }
 0x7b9   : > { %2993 = vst [vmem:[%s5470_s21 + $0xa0] sm:$0xff] %v2961_v38  ;;  %v2962_v32 = vmul.f32 %v3942_v16, %v5434_v47  ;;  %v2900_v10 = vpop.xlane.xlu1 %2899 }
 0x7ba   : > { %3945 = vrcp.f32 %v2900_v10 }
 0x7bb   : > { %2994 = vst [vmem:[%s5470_s21 + $0xa8] sm:$0xff] %v2962_v32  ;;  %v2894_v14 = vpop.xlane.xlu0 %2893 }
 0x7bc   : > { %3947 = vrcp.f32 %v2894_v14 }
 0x7bd   : > { %v2896_v25 = vpop.xlane.xlu1 %2895 }
 0x7be   : > { %3949 = vrcp.f32 %v2896_v25 }
 0x7c2   : > { %v3944_v42 = vpop.eup %3943 }
 0x7c3   : > { %v2967_v4 = vmul.f32 %v3944_v42, %v5439_v35 }
 0x7c4   : > { %v3946_v50 = vpop.eup %3945 }
 0x7c5   : > { %2999 = vst [vmem:[%s5470_s21 + $0xd0] sm:$0xff] %v2967_v4  ;;  %v2968_v51 = vmul.f32 %v3946_v50, %v5442_v18 }
 0x7c6   : > { %v3948_v22 = vpop.eup %3947 }
 0x7c7   : > { %3000 = vst [vmem:[%s5470_s21 + $0xd8] sm:$0xff] %v2968_v51  ;;  %v2965_v47 = vmul.f32 %v3948_v22, %v5446_v63 }
 0x7c8   : > { %v3950_v31 = vpop.eup %3949  ;;  %v2902_v27 = vpop.xlane.xlu0 %2901 }
 0x7c9   : > { %2997 = vst [vmem:[%s5470_s21 + $0xc0] sm:$0xff] %v2965_v47  ;;  %v2966_v37 = vmul.f32 %v3950_v31, %v5450_v33  ;;  %3951 = vrcp.f32 %v2902_v27 }
 0x7ca   : > { %v2904_v43 = vpop.xlane.xlu1 %2903 }
 0x7cb   : > { %2998 = vst [vmem:[%s5470_s21 + $0xc8] sm:$0xff] %v2966_v37  ;;  %3953 = vrcp.f32 %v2904_v43 }
 0x7cc   : > { %v2906_v35 = vpop.xlane.xlu0 %2905 }
 0x7cd   : > { %3955 = vrcp.f32 %v2906_v35 }
 0x7ce   : > { %v2908_v18 = vpop.xlane.xlu1 %2907 }
 0x7cf   : > { %3957 = vrcp.f32 %v2908_v18 }
 0x7d3   : > { %v3952_v63 = vpop.eup %3951 }
 0x7d4   : > { %v2969_v28 = vmul.f32 %v3952_v63, %v5455_v48 }
 0x7d5   : > { %v3954_v36 = vpop.eup %3953 }
 0x7d6   : > { %3001 = vst [vmem:[%s5470_s21 + $0xe0] sm:$0xff] %v2969_v28  ;;  %v2970_v33 = vmul.f32 %v3954_v36, %v5458_v46 }
 0x7d7   : > { %v3956_v60 = vpop.eup %3955 }
 0x7d8   : > { %3002 = vst [vmem:[%s5470_s21 + $0xe8] sm:$0xff] %v2970_v33  ;;  %v2971_v45 = vmul.f32 %v3956_v60, %v5461_v52 }
 0x7d9   : > { %v3958_v29 = vpop.eup %3957 }
 0x7da   : > { %3003 = vst [vmem:[%s5470_s21 + $0xf0] sm:$0xff] %v2971_v45  ;;  %v2972_v48 = vmul.f32 %v3958_v29, %v5464_v61 }
 0x7dc   : > { %3004 = vst [vmem:[%s5470_s21 + $0xf8] sm:$0xff] %v2972_v48 }
 0x7dd   : > { %4170 = shalt.err (!%p4167_p8)
}
 0x7de   : > { %s4171_s21 = scalar_lea.hbm %s5537_s2, 4096  ;;  %s4175_s17 = scalar_lea.hbm %s5638_s23, 8192 }
 0x7df   : > { %p4172_p10 = scmp.ne.s32.totalorder %s5537_s2, %s4171_s21  ;;  %p4176_p3 = scmp.lt.u32.totalorder %s5537_s2, %s5638_s23 }
 0x7e0   : > { %p4177_p5 = scmp.lt.u32.totalorder %s4175_s17, %s4171_s21  ;;  %p4179_p6 = scmp.lt.u32.totalorder %s4171_s21, %s5537_s2 }
 0x7e1   : > { %p4173_p11 = pnand %p4172_p10, %p5639_p9 }
 0x7e2   : > { %p4178_p7 = por %p4177_p5, %p4176_p3 }
 0x7e3   : > { %p4174_p12 = pneg %p4173_p11 }
 0x7e4   : > { %p4180_p4 = por %p4179_p6, %p4178_p7 }
 0x7e6   : > { %p4181_p1 = pnand %p4180_p4, %p4174_p12 }
 0x7e8   : > { %4184 = shalt.err (!%p4181_p1)
}
 0x7e9   : > { %s4250_s15 = smov 128   ;;  %s4251_s29 = smov 8  }
 0x7ea   : > { %3639 = dma.vmem_to_hbm [thread:$0]  (%p5639_p9), %s5539_s12, 4096, %s5537_s2, %s3006_s14, %s4250_s15, %s4250_s15, %s4251_s29  }
 0x7eb PF: > { %s3034_s30 = sand.u32 1, %s4223_s25   ;;  %p5640_p13 = scmp.ne.s32.totalorder %s5624_s24, 0 }
 0x7ec   : > { %p5641_p0 = scmp.ge.s32.totalorder %s4235_s28, 2  ;;  %s3035_s21 = scalar_lea.sflag [#allocation4], %s3034_s30 }
 0x7ee   : > { %p3665_p2 = pnand %p5641_p0, %p5640_p13 }
 0x7f0   : > { %4218 = dma.done.wait (!%p3665_p2), %s3035_s21, 4096  }
 0x7f1   : > { %4220 = vsyncadd (!%p3665_p2), %s3035_s21, 4294963200  ;;  %p29_p8 = scmp.ge.s32.totalorder %s4512_s18, 4   ;;  %s5642_s25 = smov %s4227_s26 }
 0x7f2   : > { %s5643_s26 = smov %s4231_s27  ;;  %s5644_s27 = smov %s4523_s13 }
 0x7f3   : > { %s5645_s28 = smov %s4512_s18  ;;  %31 = sbr.rel (!%p29_p8) target bundleno = 14 (0xe), region = 141 }
 0x7fa   :  { %3040 = vsyncpa [#allocation3], 1 }
 0x7fb   :  { %3042 = vsyncpa [#allocation3 + $0x1], 1 }
 0x7fc   :  { %3043 = vsyncpa [#allocation6], 1 }
 0x7fd   :  { %3044 = vsyncpa [#allocation9], 1 }
 0x7fe   :  { %3045 = vsyncpa [#allocation12], 1 }
 0x7ff   :  { %3046 = vsyncpa [#allocation4], 1 }
 0x800   :  { %3048 = vsyncpa [#allocation4 + $0x1], 1 }

</bundles_post_ra>
